<compile_context>
chip_gen: v7x
topology: tpu7x:2x2x1
jax: 0.10.0
libtpu: 0.0.40
codegen_flags: <defaults>
</compile_context>

<pallas_src>
import functools

import jax
import jax.numpy as jnp
from jax.experimental import pallas as pl
from jax.experimental.pallas import tpu as pltpu

_LANE = 128     # TPU lane width; channels padded to this
_LPAD = 16      # left pad inside the conv scratch (aligned for f32 and bf16)


# ----------------------------------------------------------------------------
# Hardware probing (import time, guarded) for generation-aware budgets.
# ----------------------------------------------------------------------------
def _device_kind():
    try:
        return jax.devices()[0].device_kind.lower()
    except Exception:
        return ""


def _probe_vmem_bytes():
    try:
        info = pltpu.get_tpu_info()
        v = int(getattr(info, "vmem_capacity_bytes"))
        if v > 0:
            return v
    except Exception:
        pass
    try:
        if "v7" in jax.devices()[0].device_kind.lower():
            return 64 << 20
    except Exception:
        return 64 << 20
    return 128 << 20


_KIND = _device_kind()
_IS_V5E = ("v5e" in _KIND) or ("v5 lite" in _KIND) or ("v5litepod" in _KIND)
_PHYS_VMEM = _probe_vmem_bytes()
# ~96 MiB scoped VMEM on v5e/v6e (128 MiB chips), ~48 MiB on v7x (64 MiB chip).
_VMEM_LIMIT = min(_PHYS_VMEM * 3 // 4, 100 << 20)
_TILE_BUDGET_A = max(6 << 20, _PHYS_VMEM // 6)


def _round_up(n, m):
    return ((n + m - 1) // m) * m


def _fit_axis(x, axis, target):
    """Pad (with zeros) or slice axis `axis` of x to exactly `target`."""
    size = x.shape[axis]
    if size == target:
        return x
    if size > target:
        idx = [slice(None)] * x.ndim
        idx[axis] = slice(0, target)
        return x[tuple(idx)]
    widths = [(0, 0)] * x.ndim
    widths[axis] = (0, target - size)
    return jnp.pad(x, widths)


def _pick_row_tile(H, Wp, c_ch, p_ch, itemsize, budget):
    """Largest even divisor of H whose kernel-A blocks (double-buffered c / p /
    s tiles) fit the per-generation VMEM budget."""
    if H % 2:
        return H
    best = 2
    for t in range(2, H + 1, 2):
        if H % t:
            continue
        blk = itemsize * Wp * t * (2 * c_ch + 3 * p_ch)
        if blk <= budget:
            best = t
    return best


def _pick_conv_stripe(H, Wp, Cpp, TCo, itemsize, budget):
    """Largest divisor of H whose kernel-B footprint (im2col slab + padded
    scratch + double-buffered out/weight tiles) fits the budget."""
    best = 1
    for t in range(1, H + 1):
        if H % t:
            continue
        slab = t * Wp * 9 * Cpp * itemsize
        xpad = (t + 2) * (Wp + 2 * _LPAD) * Cpp * itemsize
        outb = 2 * t * Wp * TCo * itemsize
        wb = 2 * 9 * Cpp * TCo * itemsize
        if slab + xpad + outb + wb + (1 << 20) <= budget:
            best = t
    return best


def _pick_rows_chunk(THB, Wp, target=512):
    """Divisor of THB so each register-accumulated matmul chunk has ~<=512 rows."""
    best = 1
    for d in range(1, THB + 1):
        if THB % d == 0 and d * Wp <= target:
            best = d
    return best


# ----------------------------------------------------------------------------
# Kernel A: fused nearest x2 upsample (H) + 1x1 lateral conv + bias + add.
# ----------------------------------------------------------------------------
def _lateral_up_add_kernel(c_ref, p_ref, w_ref, b_ref, s_ref, *, valid_w):
    """c_ref: (1, TH, Wp, Ccp)   p_ref: (1, THp, Wp, Cpp)  (p already x2 in W)
       w_ref: (Ccp, Cpp)         b_ref: (1, Cpp) f32       s_ref: (1, TH, Wp, Cpp)
    """
    _, TH, Wp, Ccp = c_ref.shape
    THp = p_ref.shape[1]
    Cpp = s_ref.shape[3]

    # 1x1 conv == one deep matmul over the flattened spatial tile (Wp % 8 == 0
    # so the sublane->leading merge is a layout no-op).
    c2 = c_ref[...].reshape(TH * Wp, Ccp)
    lat = jnp.dot(c2, w_ref[...], preferred_element_type=jnp.float32)
    lat = (lat + b_ref[...]).reshape(TH, Wp, Cpp)

    # Nearest x2 upsample along H fused in-kernel (leading-dim duplication).
    p_t = p_ref[...].reshape(THp, Wp, Cpp)
    p_up = jnp.broadcast_to(p_t[:, None], (THp, 2, Wp, Cpp))
    p_up = p_up.reshape(2 * THp, Wp, Cpp)[:TH]

    s = lat + p_up.astype(jnp.float32)
    if valid_w < Wp:
        # Zero the padded W columns so kernel B's right-edge taps stay correct.
        col = jax.lax.broadcasted_iota(jnp.int32, (1, Wp, 1), 1)
        s = jnp.where(col < valid_w, s, 0.0)
    s_ref[...] = s.reshape(1, TH, Wp, Cpp).astype(s_ref.dtype)


# ----------------------------------------------------------------------------
# Kernel B: 3x3 conv, stride 1, padding 1.  Grid = (batch, H-stripes, Cout).
# ----------------------------------------------------------------------------
def _conv3x3_kernel(s_hbm, w_ref, b_ref, o_ref, xpad_ref, slab_ref, sem, *,
                    rows_chunk):
    """s_hbm: (N, H, Wp, C) raw HBM ref (memory_space=ANY)
       w_ref: (9*C, TCo) weights, K packed (kx, ky, ci)   b_ref: (1, TCo) f32
       o_ref: (1, THB, Wp, TCo)
       xpad_ref: VMEM (THB+2, Wp+2*_LPAD, C)  -- padded stripe (+1-row halos)
       slab_ref: VMEM (THB*Wp, 9*C)           -- im2col slab for this stripe
       sem:      DMA semaphores (3,)
    """
    n = pl.program_id(0)
    i = pl.program_id(1)
    j = pl.program_id(2)
    nhs = pl.num_programs(1)

    _, THB, Wp, TCo = o_ref.shape
    C = xpad_ref.shape[2]
    M = THB * Wp

    # ---- once per (batch, stripe): DMA stripe + halos, build im2col slab ----
    @pl.when(j == 0)
    def _fill():
        row0 = i * THB

        # Interior rows straight from HBM into the padded scratch (no
        # auto-pipelined plane double-buffer, no VMEM->VMEM copy).
        main = pltpu.make_async_copy(
            s_hbm.at[n, pl.ds(row0, THB), :, :],
            xpad_ref.at[1:THB + 1, _LPAD:_LPAD + Wp, :],
            sem.at[0])
        main.start()

        # Zero only the halo the taps actually read (no full-plane memset).
        zcol = jnp.zeros((THB + 2, 1, C), xpad_ref.dtype)
        xpad_ref[:, _LPAD - 1:_LPAD, :] = zcol
        xpad_ref[:, _LPAD + Wp:_LPAD + Wp + 1, :] = zcol
        zrow = jnp.zeros((1, Wp, C), xpad_ref.dtype)

        # Top halo row: previous s row, or zeros for the first stripe.
        @pl.when(i == 0)
        def _():
            xpad_ref[0:1, _LPAD:_LPAD + Wp, :] = zrow

        @pl.when(i > 0)
        def _():
            cp = pltpu.make_async_copy(
                s_hbm.at[n, pl.ds(row0 - 1, 1), :, :],
                xpad_ref.at[0:1, _LPAD:_LPAD + Wp, :],
                sem.at[1])
            cp.start()
            cp.wait()

        # Bottom halo row: next s row, or zeros for the last stripe.
        @pl.when(i == nhs - 1)
        def _():
            xpad_ref[THB + 1:THB + 2, _LPAD:_LPAD + Wp, :] = zrow

        @pl.when(i < nhs - 1)
        def _():
            cp = pltpu.make_async_copy(
                s_hbm.at[n, pl.ds(row0 + THB, 1), :, :],
                xpad_ref.at[THB + 1:THB + 2, _LPAD:_LPAD + Wp, :],
                sem.at[2])
            cp.start()
            cp.wait()

        main.wait()

        # im2col slab (K packed kx-major, then ky, then ci).  The kx = 0 / 2
        # slices are sublane-unaligned relayouts, paid once per stripe instead
        # of once per Cout tile.
        for kx in range(3):
            col = xpad_ref[:, _LPAD - 1 + kx:_LPAD - 1 + kx + Wp, :]
            colf = col.reshape((THB + 2) * Wp, C)
            for ky in range(3):
                kk = kx * 3 + ky
                slab_ref[:, kk * C:(kk + 1) * C] = colf[ky * Wp:ky * Wp + M]

    # ---- per Cout tile: matmul-only body, register/MRB accumulation --------
    n_chunks = THB // rows_chunk
    cm = rows_chunk * Wp
    if n_chunks == 1:
        acc = jnp.dot(slab_ref[...], w_ref[...],
                      preferred_element_type=jnp.float32) + b_ref[...]
        o_ref[...] = acc.reshape(1, THB, Wp, TCo).astype(o_ref.dtype)
    else:
        def body(ci, carry):
            r0 = ci * rows_chunk
            m0 = pl.multiple_of(ci * cm, 8)
            acc = jnp.dot(slab_ref[pl.ds(m0, cm), :], w_ref[...],
                          preferred_element_type=jnp.float32) + b_ref[...]
            o_ref[0, pl.ds(r0, rows_chunk), :, :] = (
                acc.reshape(rows_chunk, Wp, TCo).astype(o_ref.dtype))
            return carry

        jax.lax.fori_loop(0, n_chunks, body, 0)


# ----------------------------------------------------------------------------
# LateralBlock forward wrapper.  Inputs/outputs are NCHW like the PyTorch module.
# ----------------------------------------------------------------------------
@functools.partial(
    jax.jit,
    static_argnames=("compute_dtype", "lateral_rows", "conv_rows",
                     "conv_rows_chunk"))
def lateral_block_forward(c_nchw, p_nchw, w_lat, b_lat, w_top, b_top,
                          compute_dtype=jnp.float32,
                          lateral_rows=None, conv_rows=None,
                          conv_rows_chunk=None):
    N, Cc, H, W = c_nchw.shape
    Cp = w_lat.shape[0]
    Co = w_top.shape[0]
    Hp0, Wp0 = p_nchw.shape[2], p_nchw.shape[3]
    assert 2 * Hp0 >= H and 2 * Wp0 >= W, "coarse level too small for x2 upsample"

    out_dtype = c_nchw.dtype
    itemsize = jnp.dtype(compute_dtype).itemsize

    Ccp = _round_up(Cc, _LANE)
    Cpp = _round_up(Cp, _LANE)
    Cop = _round_up(Co, _LANE)
    Wp = _round_up(W, 8)   # make in-kernel sublane->leading reshapes free

    # Cout tile: 256 on the 256-wide MXUs (v6e/v7x), 128 on v5e / small Cout.
    TCo = 256 if (not _IS_V5E and Cop % 256 == 0) else _LANE

    # ---- layout plumbing (XLA glue): NCHW -> NHWC, cast, pad channels & W.
    c_nhwc = jnp.transpose(c_nchw, (0, 2, 3, 1)).astype(compute_dtype)
    c_nhwc = _fit_axis(_fit_axis(c_nhwc, 3, Ccp), 2, Wp)
    p_nhwc = jnp.transpose(p_nchw, (0, 2, 3, 1)).astype(compute_dtype)
    p_nhwc = _fit_axis(p_nhwc, 3, Cpp)
    # Nearest x2 along W only on the small p tensor; the H-direction repeat is
    # fused inside kernel A so the 4x-upsampled tensor never hits HBM.
    p_w = _fit_axis(jnp.repeat(p_nhwc, 2, axis=2), 2, Wp)

    # 1x1 weight (O, I, 1, 1) -> (I_pad, O_pad); biases kept in f32.
    w_lat_k = jnp.transpose(w_lat[:, :, 0, 0], (1, 0))
    w_lat_k = _fit_axis(_fit_axis(w_lat_k, 0, Ccp), 1, Cpp).astype(compute_dtype)
    b_lat_k = _fit_axis(b_lat.astype(jnp.float32), 0, Cpp).reshape(1, Cpp)

    # 3x3 weight (O, I, 3, 3) -> (9*I_pad, O_pad), K packed (kx, ky, ci).
    w_top_k = jnp.transpose(w_top, (3, 2, 1, 0))            # (kx, ky, I, O)
    w_top_k = _fit_axis(_fit_axis(w_top_k, 2, Cpp), 3, Cop)
    w_top_k = w_top_k.reshape(9 * Cpp, Cop).astype(compute_dtype)
    b_top_k = _fit_axis(b_top.astype(jnp.float32), 0, Cop).reshape(1, Cop)

    # ------------------------------------------------------------------
    # Kernel A: row-striped over (N, H/TH), both axes parallel.
    # ------------------------------------------------------------------
    TH = (lateral_rows if lateral_rows is not None else
          _pick_row_tile(H, Wp, Ccp, Cpp, itemsize, _TILE_BUDGET_A))
    assert H % TH == 0 and (TH % 2 == 0 or TH == H)
    n_stripes = H // TH
    THp = (TH + 1) // 2
    p_w = _fit_axis(p_w, 1, n_stripes * THp)

    flops_a = 2 * N * H * Wp * Ccp * Cpp
    bytes_a = itemsize * (N * H * Wp * (Ccp + Cpp)
                          + N * n_stripes * THp * Wp * Cpp + Ccp * Cpp) + 4 * Cpp

    s_nhwc = pl.pallas_call(
        functools.partial(_lateral_up_add_kernel, valid_w=W),
        out_shape=jax.ShapeDtypeStruct((N, H, Wp, Cpp), compute_dtype),
        grid=(N, n_stripes),
        in_specs=[
            pl.BlockSpec((1, TH, Wp, Ccp), lambda n, i: (n, i, 0, 0)),
            pl.BlockSpec((1, THp, Wp, Cpp), lambda n, i: (n, i, 0, 0)),
            pl.BlockSpec((Ccp, Cpp), lambda n, i: (0, 0)),
            pl.BlockSpec((1, Cpp), lambda n, i: (0, 0)),
        ],
        out_specs=pl.BlockSpec((1, TH, Wp, Cpp), lambda n, i: (n, i, 0, 0)),
        compiler_params=pltpu.CompilerParams(
            dimension_semantics=("parallel", "parallel"),
            vmem_limit_bytes=_VMEM_LIMIT),
        cost_estimate=pl.CostEstimate(flops=flops_a, transcendentals=0,
                                      bytes_accessed=bytes_a),
    )(c_nhwc, p_w, w_lat_k, b_lat_k)

    # ------------------------------------------------------------------
    # Kernel B: 3x3 conv over halo-striped rows, grid (N, H-stripes, Cout).
    # ------------------------------------------------------------------
    THB = (conv_rows if conv_rows is not None else
           _pick_conv_stripe(H, Wp, Cpp, TCo, itemsize, int(_VMEM_LIMIT * 0.8)))
    assert H % THB == 0
    rows_chunk = (conv_rows_chunk if conv_rows_chunk is not None else
                  _pick_rows_chunk(THB, Wp))
    assert THB % rows_chunk == 0
    nhs = H // THB
    n_co = Cop // TCo

    flops_b = 2 * 9 * N * H * Wp * Cpp * Cop
    bytes_b = itemsize * (N * H * Wp * Cpp + N * nhs * 9 * Cpp * Cop
                          + N * H * Wp * Cop) + 4 * Cop

    out_nhwc = pl.pallas_call(
        functools.partial(_conv3x3_kernel, rows_chunk=rows_chunk),
        out_shape=jax.ShapeDtypeStruct((N, H, Wp, Cop), compute_dtype),
        grid=(N, nhs, n_co),
        in_specs=[
            pl.BlockSpec(memory_space=pl.ANY),                    # s stays in HBM
            pl.BlockSpec((9 * Cpp, TCo), lambda n, i, j: (0, j)),
            pl.BlockSpec((1, TCo), lambda n, i, j: (0, j)),
        ],
        out_specs=pl.BlockSpec((1, THB, Wp, TCo), lambda n, i, j: (n, i, 0, j)),
        scratch_shapes=[
            pltpu.VMEM((THB + 2, Wp + 2 * _LPAD, Cpp), compute_dtype),
            pltpu.VMEM((THB * Wp, 9 * Cpp), compute_dtype),
            pltpu.SemaphoreType.DMA((3,)),
        ],
        compiler_params=pltpu.CompilerParams(
            dimension_semantics=("parallel", "parallel", "arbitrary"),
            vmem_limit_bytes=_VMEM_LIMIT),
        cost_estimate=pl.CostEstimate(flops=flops_b, transcendentals=0,
                                      bytes_accessed=bytes_b),
    )(s_nhwc, w_top_k, b_top_k)

    # NHWC -> NCHW, drop W / channel padding.
    out = out_nhwc[:, :, :W, :Co]
    return jnp.transpose(out, (0, 3, 1, 2)).astype(out_dtype)


# ----------------------------------------------------------------------------
# Pure-JAX reference (lax.conv) to validate the kernels.
# ----------------------------------------------------------------------------
def reference_forward(c, p, w_lat, b_lat, w_top, b_top):
    _, _, H, W = c.shape
    lat = jax.lax.conv_general_dilated(
        c, w_lat, window_strides=(1, 1), padding="VALID",
        dimension_numbers=("NCHW", "OIHW", "NCHW")) + b_lat[None, :, None, None]
    p_up = jnp.repeat(jnp.repeat(p, 2, axis=2), 2, axis=3)[:, :, :H, :W]
    s = p_up + lat
    out = jax.lax.conv_general_dilated(
        s, w_top, window_strides=(1, 1), padding=((1, 1), (1, 1)),
        dimension_numbers=("NCHW", "OIHW", "NCHW")) + b_top[None, :, None, None]
    return out


if __name__ == "__main__":
    N, c_planes, p_planes, out_planes = 2, 8, 16, 8
    H = W = 16

    key = jax.random.PRNGKey(0)
    k_c, k_p, k_wl, k_bl, k_wt, k_bt = jax.random.split(key, 6)

    c = jax.random.normal(k_c, (N, c_planes, H, W), jnp.float32)
    p = jax.random.normal(k_p, (N, p_planes, H // 2, W // 2), jnp.float32)

    # PyTorch weight layouts: OIHW.
    w_lat = 0.1 * jax.random.normal(k_wl, (p_planes, c_planes, 1, 1), jnp.float32)
    b_lat = 0.1 * jax.random.normal(k_bl, (p_planes,), jnp.float32)
    w_top = 0.1 * jax.random.normal(k_wt, (out_planes, p_planes, 3, 3), jnp.float32)
    b_top = 0.1 * jax.random.normal(k_bt, (out_planes,), jnp.float32)

    ref = reference_forward(c, p, w_lat, b_lat, w_top, b_top)

    # f32, auto tiling (single stripe in kernel B at this size): tight check.
    out = jax.block_until_ready(
        lateral_block_forward(c, p, w_lat, b_lat, w_top, b_top))
    assert out.shape == (N, out_planes, H, W), out.shape
    assert jnp.allclose(out, ref, atol=2e-4, rtol=2e-4), (
        float(jnp.max(jnp.abs(out - ref))))

    # f32, forced small stripes: exercises the halo-row DMA branches of kernel
    # B, the multi-stripe kernel A path, and the chunked-matmul fori_loop path.
    out_s = jax.block_until_ready(
        lateral_block_forward(c, p, w_lat, b_lat, w_top, b_top,
                              lateral_rows=4, conv_rows=4, conv_rows_chunk=1))
    assert jnp.allclose(out_s, ref, atol=2e-4, rtol=2e-4), (
        float(jnp.max(jnp.abs(out_s - ref))))

    # bf16 compute, f32 accumulation (intermediate s rounded to bf16): loose.
    out_bf16 = jax.block_until_ready(
        lateral_block_forward(c, p, w_lat, b_lat, w_top, b_top,
                              compute_dtype=jnp.bfloat16))
    assert jnp.allclose(out_bf16, ref, atol=1e-1, rtol=1e-1), (
        float(jnp.max(jnp.abs(out_bf16 - ref))))

    print("KERNEL_OK")
</pallas_src>

<mosaic_0001>
module attributes {stable_mosaic.version = 11 : i64} {
  func.func @_conv3x3_kernel(%arg0: i32, %arg1: i32, %arg2: i32, %arg3: memref<2x16x16x128xf32, #tpu.memory_space<any>>, %arg4: memref<1152x128xf32, #tpu.memory_space<vmem>>, %arg5: memref<1x128xf32, #tpu.memory_space<vmem>>, %arg6: memref<1x16x16x128xf32, #tpu.memory_space<vmem>>, %arg7: memref<18x48x128xf32, #tpu.memory_space<vmem>>, %arg8: memref<256x1152xf32, #tpu.memory_space<vmem>>, %arg9: memref<3x!tpu.dma_semaphore, #tpu.memory_space<semaphore_mem>>) attributes {dimension_semantics = [#tpu.dimension_semantics<parallel>, #tpu.dimension_semantics<parallel>, #tpu.dimension_semantics<arbitrary>], iteration_bounds = array<i64: 2, 1, 1>, scalar_prefetch = 0 : i64, scratch_operands = 3 : i64, tpu.core_type = #tpu.core_type<tc>, window_params = [{}, {transform_indices = @transform_1, window_bounds = array<i64: 1152, 128>}, {transform_indices = @transform_2, window_bounds = array<i64: 1, 128>}, {transform_indices = @transform_3, window_bounds = array<i64: 1, 16, 16, 128>}]} {
    %c0_i32 = arith.constant 0 : i32
    %0 = arith.cmpi eq, %arg2, %c0_i32 : i32
    %1 = arith.extui %0 : i1 to i32
    %c0_i32_0 = arith.constant 0 : i32
    %2 = arith.cmpi ne, %1, %c0_i32_0 : i32
    scf.if %2 {
      %c16_i32 = arith.constant 16 : i32
      %11 = arith.muli %arg1, %c16_i32 : i32
      %c0_i32_10 = arith.constant 0 : i32
      %c0_i32_11 = arith.constant 0 : i32
      %c0_i32_12 = arith.constant 0 : i32
      %12 = tpu.memref_slice %arg3[%arg0, %11, %c0_i32_11, %c0_i32_12] : memref<2x16x16x128xf32, #tpu.memory_space<any>> -> memref<1x16x16x128xf32, #tpu.memory_space<any>>
      %13 = tpu.memref_squeeze %12 : memref<1x16x16x128xf32, #tpu.memory_space<any>> -> memref<16x16x128xf32, #tpu.memory_space<any>>
      %c1_i32 = arith.constant 1 : i32
      %c16_i32_13 = arith.constant 16 : i32
      %c0_i32_14 = arith.constant 0 : i32
      %14 = tpu.memref_slice %arg7[%c1_i32, %c16_i32_13, %c0_i32_14] : memref<18x48x128xf32, #tpu.memory_space<vmem>> -> memref<16x16x128xf32, #tpu.memory_space<vmem>>
      %15 = tpu.memref_slice %arg9[%c0_i32_10] : memref<3x!tpu.dma_semaphore, #tpu.memory_space<semaphore_mem>> -> memref<1x!tpu.dma_semaphore, #tpu.memory_space<semaphore_mem>>
      %16 = tpu.memref_squeeze %15 : memref<1x!tpu.dma_semaphore, #tpu.memory_space<semaphore_mem>> -> memref<!tpu.dma_semaphore, #tpu.memory_space<semaphore_mem>>
      tpu.enqueue_dma source(%13 : memref<16x16x128xf32, #tpu.memory_space<any>>) target(%14 : memref<16x16x128xf32, #tpu.memory_space<vmem>>) target_semaphore(%16 : memref<!tpu.dma_semaphore, #tpu.memory_space<semaphore_mem>>)
      %cst_15 = arith.constant 0.000000e+00 : f32
      %17 = vector.broadcast %cst_15 : f32 to vector<18x1x128xf32>
      %c0_16 = arith.constant 0 : index
      %c15 = arith.constant 15 : index
      %c0_17 = arith.constant 0 : index
      %18 = vector.load %arg7[%c0_16, %c15, %c0_17] : memref<18x48x128xf32, #tpu.memory_space<vmem>>, vector<18x1x128xf32>
      tpu.vector_store %arg7[%c0_16, %c15, %c0_17], %17 {strides = array<i32>} : memref<18x48x128xf32, #tpu.memory_space<vmem>>, vector<18x1x128xf32>,
      %c0_18 = arith.constant 0 : index
      %c32 = arith.constant 32 : index
      %c0_19 = arith.constant 0 : index
      %19 = vector.load %arg7[%c0_18, %c32, %c0_19] : memref<18x48x128xf32, #tpu.memory_space<vmem>>, vector<18x1x128xf32>
      tpu.vector_store %arg7[%c0_18, %c32, %c0_19], %17 {strides = array<i32>} : memref<18x48x128xf32, #tpu.memory_space<vmem>>, vector<18x1x128xf32>,
      %cst_20 = arith.constant 0.000000e+00 : f32
      %20 = vector.broadcast %cst_20 : f32 to vector<1x16x128xf32>
      %c0_i32_21 = arith.constant 0 : i32
      %21 = arith.cmpi eq, %arg1, %c0_i32_21 : i32
      %22 = arith.extui %21 : i1 to i32
      %c0_i32_22 = arith.constant 0 : i32
      %23 = arith.cmpi ne, %22, %c0_i32_22 : i32
      scf.if %23 {
        %c0_52 = arith.constant 0 : index
        %c16_53 = arith.constant 16 : index
        %c0_54 = arith.constant 0 : index
        %62 = vector.load %arg7[%c0_52, %c16_53, %c0_54] : memref<18x48x128xf32, #tpu.memory_space<vmem>>, vector<1x16x128xf32>
        tpu.vector_store %arg7[%c0_52, %c16_53, %c0_54], %20 {strides = array<i32>} : memref<18x48x128xf32, #tpu.memory_space<vmem>>, vector<1x16x128xf32>,
      } else {
      }
      %c0_i32_23 = arith.constant 0 : i32
      %24 = arith.cmpi sgt, %arg1, %c0_i32_23 : i32
      %25 = arith.extui %24 : i1 to i32
      %c0_i32_24 = arith.constant 0 : i32
      %26 = arith.cmpi ne, %25, %c0_i32_24 : i32
      scf.if %26 {
        %c1_i32_52 = arith.constant 1 : i32
        %62 = arith.subi %11, %c1_i32_52 : i32
        %c1_i32_53 = arith.constant 1 : i32
        %c0_i32_54 = arith.constant 0 : i32
        %c0_i32_55 = arith.constant 0 : i32
        %63 = tpu.memref_slice %arg3[%arg0, %62, %c0_i32_54, %c0_i32_55] : memref<2x16x16x128xf32, #tpu.memory_space<any>> -> memref<1x1x16x128xf32, #tpu.memory_space<any>>
        %64 = tpu.memref_squeeze %63 : memref<1x1x16x128xf32, #tpu.memory_space<any>> -> memref<1x16x128xf32, #tpu.memory_space<any>>
        %c0_i32_56 = arith.constant 0 : i32
        %c16_i32_57 = arith.constant 16 : i32
        %c0_i32_58 = arith.constant 0 : i32
        %65 = tpu.memref_slice %arg7[%c0_i32_56, %c16_i32_57, %c0_i32_58] : memref<18x48x128xf32, #tpu.memory_space<vmem>> -> memref<1x16x128xf32, #tpu.memory_space<vmem>>
        %66 = tpu.memref_slice %arg9[%c1_i32_53] : memref<3x!tpu.dma_semaphore, #tpu.memory_space<semaphore_mem>> -> memref<1x!tpu.dma_semaphore, #tpu.memory_space<semaphore_mem>>
        %67 = tpu.memref_squeeze %66 : memref<1x!tpu.dma_semaphore, #tpu.memory_space<semaphore_mem>> -> memref<!tpu.dma_semaphore, #tpu.memory_space<semaphore_mem>>
        tpu.enqueue_dma source(%64 : memref<1x16x128xf32, #tpu.memory_space<any>>) target(%65 : memref<1x16x128xf32, #tpu.memory_space<vmem>>) target_semaphore(%67 : memref<!tpu.dma_semaphore, #tpu.memory_space<semaphore_mem>>)
        %c1_i32_59 = arith.constant 1 : i32
        %c0_i32_60 = arith.constant 0 : i32
        %c0_i32_61 = arith.constant 0 : i32
        %68 = tpu.memref_slice %arg3[%arg0, %62, %c0_i32_60, %c0_i32_61] : memref<2x16x16x128xf32, #tpu.memory_space<any>> -> memref<1x1x16x128xf32, #tpu.memory_space<any>>
        %69 = tpu.memref_squeeze %68 : memref<1x1x16x128xf32, #tpu.memory_space<any>> -> memref<1x16x128xf32, #tpu.memory_space<any>>
        %c0_i32_62 = arith.constant 0 : i32
        %c16_i32_63 = arith.constant 16 : i32
        %c0_i32_64 = arith.constant 0 : i32
        %70 = tpu.memref_slice %arg7[%c0_i32_62, %c16_i32_63, %c0_i32_64] : memref<18x48x128xf32, #tpu.memory_space<vmem>> -> memref<1x16x128xf32, #tpu.memory_space<vmem>>
        %71 = tpu.memref_slice %arg9[%c1_i32_59] : memref<3x!tpu.dma_semaphore, #tpu.memory_space<semaphore_mem>> -> memref<1x!tpu.dma_semaphore, #tpu.memory_space<semaphore_mem>>
        %72 = tpu.memref_squeeze %71 : memref<1x!tpu.dma_semaphore, #tpu.memory_space<semaphore_mem>> -> memref<!tpu.dma_semaphore, #tpu.memory_space<semaphore_mem>>
        tpu.wait_dma2 semaphore(%72 : memref<!tpu.dma_semaphore, #tpu.memory_space<semaphore_mem>>) src(%69 : memref<1x16x128xf32, #tpu.memory_space<any>>) dst(%70 : memref<1x16x128xf32, #tpu.memory_space<vmem>>)
      } else {
      }
      %c0_i32_25 = arith.constant 0 : i32
      %27 = arith.cmpi eq, %arg1, %c0_i32_25 : i32
      %28 = arith.extui %27 : i1 to i32
      %c0_i32_26 = arith.constant 0 : i32
      %29 = arith.cmpi ne, %28, %c0_i32_26 : i32
      scf.if %29 {
        %c17_52 = arith.constant 17 : index
        %c16_53 = arith.constant 16 : index
        %c0_54 = arith.constant 0 : index
        %62 = vector.load %arg7[%c17_52, %c16_53, %c0_54] : memref<18x48x128xf32, #tpu.memory_space<vmem>>, vector<1x16x128xf32>
        tpu.vector_store %arg7[%c17_52, %c16_53, %c0_54], %20 {strides = array<i32>} : memref<18x48x128xf32, #tpu.memory_space<vmem>>, vector<1x16x128xf32>,
      } else {
      }
      %c0_i32_27 = arith.constant 0 : i32
      %30 = arith.cmpi slt, %arg1, %c0_i32_27 : i32
      %31 = arith.extui %30 : i1 to i32
      %c0_i32_28 = arith.constant 0 : i32
      %32 = arith.cmpi ne, %31, %c0_i32_28 : i32
      scf.if %32 {
        %c16_i32_52 = arith.constant 16 : i32
        %62 = arith.addi %11, %c16_i32_52 : i32
        %c2_i32 = arith.constant 2 : i32
        %c0_i32_53 = arith.constant 0 : i32
        %c0_i32_54 = arith.constant 0 : i32
        %63 = tpu.memref_slice %arg3[%arg0, %62, %c0_i32_53, %c0_i32_54] : memref<2x16x16x128xf32, #tpu.memory_space<any>> -> memref<1x1x16x128xf32, #tpu.memory_space<any>>
        %64 = tpu.memref_squeeze %63 : memref<1x1x16x128xf32, #tpu.memory_space<any>> -> memref<1x16x128xf32, #tpu.memory_space<any>>
        %c17_i32 = arith.constant 17 : i32
        %c16_i32_55 = arith.constant 16 : i32
        %c0_i32_56 = arith.constant 0 : i32
        %65 = tpu.memref_slice %arg7[%c17_i32, %c16_i32_55, %c0_i32_56] : memref<18x48x128xf32, #tpu.memory_space<vmem>> -> memref<1x16x128xf32, #tpu.memory_space<vmem>>
        %66 = tpu.memref_slice %arg9[%c2_i32] : memref<3x!tpu.dma_semaphore, #tpu.memory_space<semaphore_mem>> -> memref<1x!tpu.dma_semaphore, #tpu.memory_space<semaphore_mem>>
        %67 = tpu.memref_squeeze %66 : memref<1x!tpu.dma_semaphore, #tpu.memory_space<semaphore_mem>> -> memref<!tpu.dma_semaphore, #tpu.memory_space<semaphore_mem>>
        tpu.enqueue_dma source(%64 : memref<1x16x128xf32, #tpu.memory_space<any>>) target(%65 : memref<1x16x128xf32, #tpu.memory_space<vmem>>) target_semaphore(%67 : memref<!tpu.dma_semaphore, #tpu.memory_space<semaphore_mem>>)
        %c2_i32_57 = arith.constant 2 : i32
        %c0_i32_58 = arith.constant 0 : i32
        %c0_i32_59 = arith.constant 0 : i32
        %68 = tpu.memref_slice %arg3[%arg0, %62, %c0_i32_58, %c0_i32_59] : memref<2x16x16x128xf32, #tpu.memory_space<any>> -> memref<1x1x16x128xf32, #tpu.memory_space<any>>
        %69 = tpu.memref_squeeze %68 : memref<1x1x16x128xf32, #tpu.memory_space<any>> -> memref<1x16x128xf32, #tpu.memory_space<any>>
        %c17_i32_60 = arith.constant 17 : i32
        %c16_i32_61 = arith.constant 16 : i32
        %c0_i32_62 = arith.constant 0 : i32
        %70 = tpu.memref_slice %arg7[%c17_i32_60, %c16_i32_61, %c0_i32_62] : memref<18x48x128xf32, #tpu.memory_space<vmem>> -> memref<1x16x128xf32, #tpu.memory_space<vmem>>
        %71 = tpu.memref_slice %arg9[%c2_i32_57] : memref<3x!tpu.dma_semaphore, #tpu.memory_space<semaphore_mem>> -> memref<1x!tpu.dma_semaphore, #tpu.memory_space<semaphore_mem>>
        %72 = tpu.memref_squeeze %71 : memref<1x!tpu.dma_semaphore, #tpu.memory_space<semaphore_mem>> -> memref<!tpu.dma_semaphore, #tpu.memory_space<semaphore_mem>>
        tpu.wait_dma2 semaphore(%72 : memref<!tpu.dma_semaphore, #tpu.memory_space<semaphore_mem>>) src(%69 : memref<1x16x128xf32, #tpu.memory_space<any>>) dst(%70 : memref<1x16x128xf32, #tpu.memory_space<vmem>>)
      } else {
      }
      %c0_i32_29 = arith.constant 0 : i32
      %c0_i32_30 = arith.constant 0 : i32
      %c0_i32_31 = arith.constant 0 : i32
      %33 = tpu.memref_slice %arg3[%arg0, %11, %c0_i32_30, %c0_i32_31] : memref<2x16x16x128xf32, #tpu.memory_space<any>> -> memref<1x16x16x128xf32, #tpu.memory_space<any>>
      %34 = tpu.memref_squeeze %33 : memref<1x16x16x128xf32, #tpu.memory_space<any>> -> memref<16x16x128xf32, #tpu.memory_space<any>>
      %c1_i32_32 = arith.constant 1 : i32
      %c16_i32_33 = arith.constant 16 : i32
      %c0_i32_34 = arith.constant 0 : i32
      %35 = tpu.memref_slice %arg7[%c1_i32_32, %c16_i32_33, %c0_i32_34] : memref<18x48x128xf32, #tpu.memory_space<vmem>> -> memref<16x16x128xf32, #tpu.memory_space<vmem>>
      %36 = tpu.memref_slice %arg9[%c0_i32_29] : memref<3x!tpu.dma_semaphore, #tpu.memory_space<semaphore_mem>> -> memref<1x!tpu.dma_semaphore, #tpu.memory_space<semaphore_mem>>
      %37 = tpu.memref_squeeze %36 : memref<1x!tpu.dma_semaphore, #tpu.memory_space<semaphore_mem>> -> memref<!tpu.dma_semaphore, #tpu.memory_space<semaphore_mem>>
      tpu.wait_dma2 semaphore(%37 : memref<!tpu.dma_semaphore, #tpu.memory_space<semaphore_mem>>) src(%34 : memref<16x16x128xf32, #tpu.memory_space<any>>) dst(%35 : memref<16x16x128xf32, #tpu.memory_space<vmem>>)
      %c0_35 = arith.constant 0 : index
      %c15_36 = arith.constant 15 : index
      %c0_37 = arith.constant 0 : index
      %38 = vector.load %arg7[%c0_35, %c15_36, %c0_37] : memref<18x48x128xf32, #tpu.memory_space<vmem>>, vector<18x16x128xf32>
      %39 = vector.shape_cast %38 : vector<18x16x128xf32> to vector<288x128xf32>
      %40 = vector.extract_strided_slice %39 {offsets = [0, 0], sizes = [256, 128], strides = [1, 1]} : vector<288x128xf32> to vector<256x128xf32>
      %c0_38 = arith.constant 0 : index
      %c0_39 = arith.constant 0 : index
      %41 = vector.load %arg8[%c0_38, %c0_39] : memref<256x1152xf32, #tpu.memory_space<vmem>>, vector<256x128xf32>
      tpu.vector_store %arg8[%c0_38, %c0_39], %40 {strides = array<i32>} : memref<256x1152xf32, #tpu.memory_space<vmem>>, vector<256x128xf32>,
      %42 = vector.extract_strided_slice %39 {offsets = [16, 0], sizes = [256, 128], strides = [1, 1]} : vector<288x128xf32> to vector<256x128xf32>
      %c0_40 = arith.constant 0 : index
      %c128 = arith.constant 128 : index
      %43 = vector.load %arg8[%c0_40, %c128] : memref<256x1152xf32, #tpu.memory_space<vmem>>, vector<256x128xf32>
      tpu.vector_store %arg8[%c0_40, %c128], %42 {strides = array<i32>} : memref<256x1152xf32, #tpu.memory_space<vmem>>, vector<256x128xf32>,
      %44 = vector.extract_strided_slice %39 {offsets = [32, 0], sizes = [256, 128], strides = [1, 1]} : vector<288x128xf32> to vector<256x128xf32>
      %c0_41 = arith.constant 0 : index
      %c256 = arith.constant 256 : index
      %45 = vector.load %arg8[%c0_41, %c256] : memref<256x1152xf32, #tpu.memory_space<vmem>>, vector<256x128xf32>
      tpu.vector_store %arg8[%c0_41, %c256], %44 {strides = array<i32>} : memref<256x1152xf32, #tpu.memory_space<vmem>>, vector<256x128xf32>,
      %c0_42 = arith.constant 0 : index
      %c16 = arith.constant 16 : index
      %c0_43 = arith.constant 0 : index
      %46 = vector.load %arg7[%c0_42, %c16, %c0_43] : memref<18x48x128xf32, #tpu.memory_space<vmem>>, vector<18x16x128xf32>
      %47 = vector.shape_cast %46 : vector<18x16x128xf32> to vector<288x128xf32>
      %48 = vector.extract_strided_slice %47 {offsets = [0, 0], sizes = [256, 128], strides = [1, 1]} : vector<288x128xf32> to vector<256x128xf32>
      %c0_44 = arith.constant 0 : index
      %c384 = arith.constant 384 : index
      %49 = vector.load %arg8[%c0_44, %c384] : memref<256x1152xf32, #tpu.memory_space<vmem>>, vector<256x128xf32>
      tpu.vector_store %arg8[%c0_44, %c384], %48 {strides = array<i32>} : memref<256x1152xf32, #tpu.memory_space<vmem>>, vector<256x128xf32>,
      %50 = vector.extract_strided_slice %47 {offsets = [16, 0], sizes = [256, 128], strides = [1, 1]} : vector<288x128xf32> to vector<256x128xf32>
      %c0_45 = arith.constant 0 : index
      %c512 = arith.constant 512 : index
      %51 = vector.load %arg8[%c0_45, %c512] : memref<256x1152xf32, #tpu.memory_space<vmem>>, vector<256x128xf32>
      tpu.vector_store %arg8[%c0_45, %c512], %50 {strides = array<i32>} : memref<256x1152xf32, #tpu.memory_space<vmem>>, vector<256x128xf32>,
      %52 = vector.extract_strided_slice %47 {offsets = [32, 0], sizes = [256, 128], strides = [1, 1]} : vector<288x128xf32> to vector<256x128xf32>
      %c0_46 = arith.constant 0 : index
      %c640 = arith.constant 640 : index
      %53 = vector.load %arg8[%c0_46, %c640] : memref<256x1152xf32, #tpu.memory_space<vmem>>, vector<256x128xf32>
      tpu.vector_store %arg8[%c0_46, %c640], %52 {strides = array<i32>} : memref<256x1152xf32, #tpu.memory_space<vmem>>, vector<256x128xf32>,
      %c0_47 = arith.constant 0 : index
      %c17 = arith.constant 17 : index
      %c0_48 = arith.constant 0 : index
      %54 = vector.load %arg7[%c0_47, %c17, %c0_48] : memref<18x48x128xf32, #tpu.memory_space<vmem>>, vector<18x16x128xf32>
      %55 = vector.shape_cast %54 : vector<18x16x128xf32> to vector<288x128xf32>
      %56 = vector.extract_strided_slice %55 {offsets = [0, 0], sizes = [256, 128], strides = [1, 1]} : vector<288x128xf32> to vector<256x128xf32>
      %c0_49 = arith.constant 0 : index
      %c768 = arith.constant 768 : index
      %57 = vector.load %arg8[%c0_49, %c768] : memref<256x1152xf32, #tpu.memory_space<vmem>>, vector<256x128xf32>
      tpu.vector_store %arg8[%c0_49, %c768], %56 {strides = array<i32>} : memref<256x1152xf32, #tpu.memory_space<vmem>>, vector<256x128xf32>,
      %58 = vector.extract_strided_slice %55 {offsets = [16, 0], sizes = [256, 128], strides = [1, 1]} : vector<288x128xf32> to vector<256x128xf32>
      %c0_50 = arith.constant 0 : index
      %c896 = arith.constant 896 : index
      %59 = vector.load %arg8[%c0_50, %c896] : memref<256x1152xf32, #tpu.memory_space<vmem>>, vector<256x128xf32>
      tpu.vector_store %arg8[%c0_50, %c896], %58 {strides = array<i32>} : memref<256x1152xf32, #tpu.memory_space<vmem>>, vector<256x128xf32>,
      %60 = vector.extract_strided_slice %55 {offsets = [32, 0], sizes = [256, 128], strides = [1, 1]} : vector<288x128xf32> to vector<256x128xf32>
      %c0_51 = arith.constant 0 : index
      %c1024 = arith.constant 1024 : index
      %61 = vector.load %arg8[%c0_51, %c1024] : memref<256x1152xf32, #tpu.memory_space<vmem>>, vector<256x128xf32>
      tpu.vector_store %arg8[%c0_51, %c1024], %60 {strides = array<i32>} : memref<256x1152xf32, #tpu.memory_space<vmem>>, vector<256x128xf32>,
    } else {
    }
    %c0 = arith.constant 0 : index
    %c0_1 = arith.constant 0 : index
    %3 = vector.load %arg8[%c0, %c0_1] : memref<256x1152xf32, #tpu.memory_space<vmem>>, vector<256x1152xf32>
    %c0_2 = arith.constant 0 : index
    %c0_3 = arith.constant 0 : index
    %4 = vector.load %arg4[%c0_2, %c0_3] : memref<1152x128xf32, #tpu.memory_space<vmem>>, vector<1152x128xf32>
    %cst = arith.constant dense<0.000000e+00> : vector<256x128xf32>
    %5 = tpu.matmul %3, %4, %cst {dimension_numbers = #tpu.dot_dimension_numbers<[1], [0], [0], [1], [0, 0, 1, 1], [], []>} : vector<256x1152xf32>, vector<1152x128xf32>, vector<256x128xf32> -> vector<256x128xf32>
    %c0_4 = arith.constant 0 : index
    %c0_5 = arith.constant 0 : index
    %6 = vector.load %arg5[%c0_4, %c0_5] : memref<1x128xf32, #tpu.memory_space<vmem>>, vector<1x128xf32>
    %7 = vector.broadcast %6 : vector<1x128xf32> to vector<256x128xf32>
    %8 = arith.addf %5, %7 : vector<256x128xf32>
    %9 = vector.shape_cast %8 : vector<256x128xf32> to vector<1x16x16x128xf32>
    %c0_6 = arith.constant 0 : index
    %c0_7 = arith.constant 0 : index
    %c0_8 = arith.constant 0 : index
    %c0_9 = arith.constant 0 : index
    %10 = vector.load %arg6[%c0_6, %c0_7, %c0_8, %c0_9] : memref<1x16x16x128xf32, #tpu.memory_space<vmem>>, vector<1x16x16x128xf32>
    tpu.vector_store %arg6[%c0_6, %c0_7, %c0_8, %c0_9], %9 {strides = array<i32>} : memref<1x16x16x128xf32, #tpu.memory_space<vmem>>, vector<1x16x16x128xf32>,
    return
  }
  func.func @transform_1(%arg0: i32, %arg1: i32, %arg2: i32) -> (i32, i32) {
    %c0_i32 = arith.constant 0 : i32
    %c0_i32_0 = arith.constant 0 : i32
    return %c0_i32, %arg2 : i32, i32
  }
  func.func @transform_2(%arg0: i32, %arg1: i32, %arg2: i32) -> (i32, i32) {
    %c0_i32 = arith.constant 0 : i32
    %c0_i32_0 = arith.constant 0 : i32
    return %c0_i32, %arg2 : i32, i32
  }
  func.func @transform_3(%arg0: i32, %arg1: i32, %arg2: i32) -> (i32, i32, i32, i32) {
    %c0_i32 = arith.constant 0 : i32
    %c0_i32_0 = arith.constant 0 : i32
    return %arg0, %arg1, %c0_i32, %arg2 : i32, i32, i32, i32
  }
}

module attributes {stable_mosaic.version = 11 : i64} {
  func.func @_lateral_up_add_kernel(%arg0: i32, %arg1: i32, %arg2: memref<1x16x16x128xf32, #tpu.memory_space<vmem>>, %arg3: memref<1x8x16x128xf32, #tpu.memory_space<vmem>>, %arg4: memref<128x128xf32, #tpu.memory_space<vmem>>, %arg5: memref<1x128xf32, #tpu.memory_space<vmem>>, %arg6: memref<1x16x16x128xf32, #tpu.memory_space<vmem>>) attributes {dimension_semantics = [#tpu.dimension_semantics<parallel>, #tpu.dimension_semantics<parallel>], iteration_bounds = array<i64: 2, 1>, scalar_prefetch = 0 : i64, scratch_operands = 0 : i64, tpu.core_type = #tpu.core_type<tc>, window_params = [{transform_indices = @transform_0, window_bounds = array<i64: 1, 16, 16, 128>}, {transform_indices = @transform_1, window_bounds = array<i64: 1, 8, 16, 128>}, {pipeline_mode = #tpu.pipeline_mode<synchronous>, transform_indices = @transform_2, window_bounds = array<i64: 128, 128>}, {pipeline_mode = #tpu.pipeline_mode<synchronous>, transform_indices = @transform_3, window_bounds = array<i64: 1, 128>}, {transform_indices = @transform_4, window_bounds = array<i64: 1, 16, 16, 128>}]} {
    %c0 = arith.constant 0 : index
    %c0_0 = arith.constant 0 : index
    %c0_1 = arith.constant 0 : index
    %c0_2 = arith.constant 0 : index
    %0 = vector.load %arg2[%c0, %c0_0, %c0_1, %c0_2] : memref<1x16x16x128xf32, #tpu.memory_space<vmem>>, vector<1x16x16x128xf32>
    %1 = vector.shape_cast %0 : vector<1x16x16x128xf32> to vector<256x128xf32>
    %c0_3 = arith.constant 0 : index
    %c0_4 = arith.constant 0 : index
    %2 = vector.load %arg4[%c0_3, %c0_4] : memref<128x128xf32, #tpu.memory_space<vmem>>, vector<128x128xf32>
    %cst = arith.constant dense<0.000000e+00> : vector<256x128xf32>
    %3 = tpu.matmul %1, %2, %cst {dimension_numbers = #tpu.dot_dimension_numbers<[1], [0], [0], [1], [0, 0, 1, 1], [], []>} : vector<256x128xf32>, vector<128x128xf32>, vector<256x128xf32> -> vector<256x128xf32>
    %c0_5 = arith.constant 0 : index
    %c0_6 = arith.constant 0 : index
    %4 = vector.load %arg5[%c0_5, %c0_6] : memref<1x128xf32, #tpu.memory_space<vmem>>, vector<1x128xf32>
    %5 = vector.broadcast %4 : vector<1x128xf32> to vector<256x128xf32>
    %6 = arith.addf %3, %5 : vector<256x128xf32>
    %7 = vector.shape_cast %6 : vector<256x128xf32> to vector<16x16x128xf32>
    %c0_7 = arith.constant 0 : index
    %c0_8 = arith.constant 0 : index
    %c0_9 = arith.constant 0 : index
    %c0_10 = arith.constant 0 : index
    %8 = vector.load %arg3[%c0_7, %c0_8, %c0_9, %c0_10] : memref<1x8x16x128xf32, #tpu.memory_space<vmem>>, vector<1x8x16x128xf32>
    %9 = vector.shape_cast %8 : vector<1x8x16x128xf32> to vector<8x16x128xf32>
    %10 = vector.shape_cast %9 : vector<8x16x128xf32> to vector<8x1x16x128xf32>
    %11 = vector.shape_cast %10 : vector<8x1x16x128xf32> to vector<8x1x16x128xf32>
    %12 = vector.broadcast %11 : vector<8x1x16x128xf32> to vector<8x2x16x128xf32>
    %13 = vector.shape_cast %12 : vector<8x2x16x128xf32> to vector<16x16x128xf32>
    %14 = arith.addf %7, %13 : vector<16x16x128xf32>
    %15 = vector.shape_cast %14 : vector<16x16x128xf32> to vector<1x16x16x128xf32>
    %c0_11 = arith.constant 0 : index
    %c0_12 = arith.constant 0 : index
    %c0_13 = arith.constant 0 : index
    %c0_14 = arith.constant 0 : index
    %16 = vector.load %arg6[%c0_11, %c0_12, %c0_13, %c0_14] : memref<1x16x16x128xf32, #tpu.memory_space<vmem>>, vector<1x16x16x128xf32>
    tpu.vector_store %arg6[%c0_11, %c0_12, %c0_13, %c0_14], %15 {strides = array<i32>} : memref<1x16x16x128xf32, #tpu.memory_space<vmem>>, vector<1x16x16x128xf32>,
    return
  }
  func.func @transform_0(%arg0: i32, %arg1: i32) -> (i32, i32, i32, i32) {
    %c0_i32 = arith.constant 0 : i32
    %c0_i32_0 = arith.constant 0 : i32
    %c0_i32_1 = arith.constant 0 : i32
    return %arg0, %arg1, %c0_i32, %c0_i32_0 : i32, i32, i32, i32
  }
  func.func @transform_1(%arg0: i32, %arg1: i32) -> (i32, i32, i32, i32) {
    %c0_i32 = arith.constant 0 : i32
    %c0_i32_0 = arith.constant 0 : i32
    %c0_i32_1 = arith.constant 0 : i32
    return %arg0, %arg1, %c0_i32, %c0_i32_0 : i32, i32, i32, i32
  }
  func.func @transform_2(%arg0: i32, %arg1: i32) -> (i32, i32) {
    %c0_i32 = arith.constant 0 : i32
    %c0_i32_0 = arith.constant 0 : i32
    %c0_i32_1 = arith.constant 0 : i32
    return %c0_i32, %c0_i32_0 : i32, i32
  }
  func.func @transform_3(%arg0: i32, %arg1: i32) -> (i32, i32) {
    %c0_i32 = arith.constant 0 : i32
    %c0_i32_0 = arith.constant 0 : i32
    %c0_i32_1 = arith.constant 0 : i32
    return %c0_i32, %c0_i32_0 : i32, i32
  }
  func.func @transform_4(%arg0: i32, %arg1: i32) -> (i32, i32, i32, i32) {
    %c0_i32 = arith.constant 0 : i32
    %c0_i32_0 = arith.constant 0 : i32
    %c0_i32_1 = arith.constant 0 : i32
    return %arg0, %arg1, %c0_i32, %c0_i32_0 : i32, i32, i32, i32
  }
}

</mosaic_0001>

<bundles_post_ra>
// kernel: lateral_block_forward.2
= control target key start
LH: loop header
LB: loop body
LE: loop exit
PB: predicated region body
PF: predicated region fallthrough
CT: control target
= control target key end

     0   :  { %s1797_s0 = inlined_call_operand.hbm [shape: f32[2,16,16,128], index: 0, kind: input, shape index: {}]   ;;  %s1798_s1 = inlined_call_operand.hbm [shape: f32[2,8,16,128], index: 1, kind: input, shape index: {}]   ;;  %s1799_s2 = inlined_call_operand.hbm [shape: f32[128,128], index: 2, kind: input, shape index: {}]   ;;  %s1800_s3 = inlined_call_operand.hbm [shape: f32[1,128], index: 3, kind: input, shape index: {}]   ;;  %s1801_s4 = inlined_call_operand.hbm [shape: f32[2,16,16,128], index: 4, kind: output, shape index: {}]  }
   0x1   :  { %1808 = sst [smem:[#allocation17_spill]] %s1797_s0 }
   0x2   :  { %1809 = sst [smem:[#allocation18_spill]] %s1799_s2 }
   0x3   :  { %1810 = sst [smem:[#allocation19_spill]] %s1800_s3 }
   0x4   :  { %9 = vsyncpa [#allocation3], 0 }
   0x5   :  { %11 = vsyncpa [#allocation3 + $0x1], 0 }
   0x6   :  { %12 = vsyncpa [#allocation6], 0 }
   0x7   :  { %14 = vsyncpa [#allocation6 + $0x1], 0 }
   0x8   :  { %15 = vsyncpa [#allocation9], 0 }
   0x9   :  { %16 = vsyncpa [#allocation4], 0 }
   0xa   :  { %18 = vsyncpa [#allocation4 + $0x1], 0  ;;  %s1360_s15 = smov 0   ;;  %s1362_s16 = smov 0  }
   0xb   :  { %s1364_s17 = smov 0   ;;  %s1366_s18 = smov 0  }
   0xc   :  { %s1368_s19 = smov 0   ;;  %s1370_s20 = smov 0  }
   0xd LB: > { %s1391_s21 = sadd.s32 4294967295, %s1324_s20   ;;  %s820_s22 = sadd.s32 4294967294, %s1324_s20   ;;  %s1324_s20 = sphi %s1370_s20, %s24_s20   ;;  %s1320_s19 = sphi %s1368_s19, %s1837_s19   ;;  %s1316_s18 = sphi %s1366_s18, %s1836_s18   ;;  %s1312_s17 = sphi %s1364_s17, %s1835_s17   ;;  %s1308_s16 = sphi %s1362_s16, %s1834_s16   ;;  %s1304_s15 = sphi %s1360_s15, %s1833_s15  }
   0xe   : > { %p58_p0 = scmp.ne.s32.totalorder %s1308_s16, %s1304_s15  ;;  %p1802_p1 = scmp.eq.s32.totalorder %s1391_s21, 0 }
   0xf   : > { %p160_p3 = scmp.eq.s32.totalorder %s820_s22, 1  ;;  %p821_p5 = scmp.ge.s32.totalorder %s1324_s20, 1 }
  0x10   : > { %p1400_p4 = por %p1802_p1, %p58_p0  ;;  %p167_p7 = scmp.lt.s32.totalorder %s1324_s20, 3 }
  0x11   : > { %p1405_p6 = por %p160_p3, %p58_p0  ;;  %s1326_s26 = smov [#allocation7]  }
  0x12   : > { %s1811_s23 = scalar_select %p1400_p4, 1, 0 }
  0x13   : > { %s1812_s24 = scalar_select %p1405_p6, 1, 0 }
  0x14   : > { %p1410_p8 = pnand %p821_p5, %p167_p7  ;;  %s179_s27 = sshll.u32 %s1326_s26, 4  ;;  %s1414_s27 = int_to_ptr.vmem [resolvable:$true] %s179_s27 }
  0x15   : > { %s1327_s29 = smov [#allocation8]   ;;  %s1815_s2 = sld [smem:[#allocation18_spill]] }
  0x16   : > { %p1036_p9 = pneg %p1410_p8  ;;  %s193_s30 = sshll.u32 %s1327_s29, 4  ;;  %s1425_s30 = int_to_ptr.vmem [resolvable:$true] %s193_s30 }
  0x18   : > { %p1421_p11 = pnand %p1036_p9, %p1802_p1 }
  0x1a   : > { %p1116_p13 = pneg %p1421_p11 }
  0x1b   : > { %s1114_s7 = scalar_lea.hbm %s1815_s2, 2048 }
  0x1c   : > { %p1115_p12 = scmp.ne.s32.totalorder %s1815_s2, %s1114_s7  ;;  %p1121_p5 = scmp.lt.u32.totalorder %s1114_s7, %s1815_s2 }
  0x1e   : > { %p1117_p0 = pnand %p1116_p13, %p1115_p12 }
  0x20   : > { %p1118_p3 = pneg %p1117_p0 }
  0x22   : > { %p1123_p7 = pnand %p1121_p5, %p1118_p3 }
  0x24   : > { %1126 = shalt.err (!%p1123_p7)
}
  0x25   : > { %s1127_s12 = scalar_lea.vmem %s1414_s27, 2048  ;;  %p1135_p2 = scmp.lt.s32.totalorder %s1414_s27, %s1414_s27 }
  0x26   : > { %p1128_p9 = scmp.ne.s32.totalorder %s1414_s27, %s1127_s12  ;;  %p1136_p12 = scmp.lt.s32.totalorder %s1127_s12, %s1127_s12 }
  0x28   : > { %p1130_p10 = pnand %p1128_p9, %p1116_p13  ;;  %p1137_p0 = por %p1136_p12, %p1135_p2 }
  0x2a   : > { %p1131_p1 = pneg %p1130_p10 }
  0x2c   : > { %p1138_p6 = pnand %p1137_p0, %p1131_p1 }
  0x2e   : > { %1141 = shalt.err (!%p1138_p6)
}
  0x2f   : > { %s1803_s13 = smov 128   ;;  %s1329_s14 = smov 8  }
  0x30   : > { %1039 = dma.hbm_to_vmem [thread:$0]  (!%p1421_p11), %s1815_s2, 2048, %s1414_s27, [#allocation6], %s1803_s13, %s1803_s13, %s1329_s14  }
  0x31   : > { %s1816_s3 = sld [smem:[#allocation19_spill]] }
  0x37   : > { %s1142_s6 = scalar_lea.hbm %s1816_s3, 16 }
  0x38   : > { %p1143_p1 = scmp.ne.s32.totalorder %s1816_s3, %s1142_s6  ;;  %p1149_p10 = scmp.lt.u32.totalorder %s1142_s6, %s1816_s3 }
  0x3a   : > { %p1145_p2 = pnand %p1143_p1, %p1116_p13 }
  0x3c   : > { %p1146_p6 = pneg %p1145_p2 }
  0x3e   : > { %p1151_p3 = pnand %p1149_p10, %p1146_p6 }
  0x40   : > { %1154 = shalt.err (!%p1151_p3)
}
  0x41   : > { %s1155_s27 = scalar_lea.vmem %s1425_s30, 16  ;;  %s1162_s11 = scalar_lea.vmem %s1425_s30, 32 }
  0x42   : > { %p1156_p5 = scmp.ne.s32.totalorder %s1425_s30, %s1155_s27  ;;  %p1163_p12 = scmp.lt.s32.totalorder %s1425_s30, %s1425_s30 }
  0x43   : > { %p1164_p0 = scmp.lt.s32.totalorder %s1162_s11, %s1155_s27 }
  0x44   : > { %p1158_p7 = pnand %p1156_p5, %p1116_p13 }
  0x45   : > { %p1165_p1 = por %p1164_p0, %p1163_p12 }
  0x46   : > { %p1159_p9 = pneg %p1158_p7 }
  0x48   : > { %p1166_p2 = pnand %p1165_p1, %p1159_p9 }
  0x4a   : > { %1169 = shalt.err (!%p1166_p2)
}
  0x4b   : > { %1042 = dma.hbm_to_vmem [thread:$0]  (!%p1421_p11), %s1816_s3, 16, %s1425_s30, [#allocation9]  }
  0x4c   : > { %s36_s26 = sadd.s32 1, %s1320_s19  ;;  %s45_s29 = sadd.s32 1, %s1312_s17 }
  0x4d   : > { %p38_p13 = scmp.ge.s32.totalorder %s36_s26, 2  ;;  %p52_p6 = scmp.ne.s32.totalorder %s1312_s17, %s1308_s16 }
  0x4e   : > { %p53_p10 = scmp.eq.s32.totalorder %s1324_s20, 0  ;;  %p1056_p3 = scmp.lt.s32.totalorder %s1324_s20, 2 }
  0x4f   : > { %s1839_s26 = smov (%p38_p13, %s36_s26), 0  ;;  %p1818_p7 = scmp.eq.s32.totalorder %s1391_s21, 1 }
  0x50   : > { %1817 = sst [smem:[#allocation16_spill]] %s1839_s26  ;;  %p54_p5 = por %p53_p10, %p52_p6 }
  0x51   : > { %p1493_p9 = por %p1818_p7, %p52_p6  ;;  %s40_s5 = ssub.s32 %s1320_s19, %s1839_s26 }
  0x52   : > { %s1500_s6 = sand.u32 1, %s1312_s17   ;;  %p43_p11 = scmp.eq.s32.totalorder %s40_s5, 0 }
  0x53   : > { %s1819_s28 = scalar_select %p1493_p9, 1, 0 }
  0x54   : > { %s825_s30 = sshll.u32 %s1500_s6, 8  ;;  %s843_s7 = sshll.u32 %s1320_s19, 12 }
  0x55   : > { %s1505_s8 = scalar_select %p43_p11, %s1312_s17, %s45_s29  }
  0x56   : > { %s1820_s0 = sld [smem:[#allocation17_spill]]  ;;  %s208_s11 = scalar_lea.vmem [#allocation2], %s825_s30 }
  0x57   : > { %s218_s12 = sshll.u32 %s208_s11, 4  ;;  %p1514_p12 = pnand %p1056_p3, %p54_p5  ;;  %s1518_s12 = int_to_ptr.vmem [resolvable:$true] %s218_s12 }
  0x58   : > { %s205_s5 = scalar_lea.sflag [#allocation3], %s1500_s6 }
  0x59   : > { %p1172_p1 = pneg %p1514_p12 }
  0x5c   : > { %s1510_s27 = scalar_lea.hbm %s1820_s0, %s843_s7  ;;  %s1175_s10 = scalar_lea.hbm %s1820_s0, 8192 }
  0x5d   : > { %s1170_s9 = scalar_lea.hbm %s1510_s27, 4096  ;;  %p1176_p6 = scmp.lt.u32.totalorder %s1510_s27, %s1820_s0 }
  0x5e   : > { %p1171_p0 = scmp.ne.s32.totalorder %s1510_s27, %s1170_s9  ;;  %p1177_p10 = scmp.lt.u32.totalorder %s1175_s10, %s1170_s9 }
  0x5f   : > { %p1179_p5 = scmp.lt.u32.totalorder %s1170_s9, %s1510_s27 }
  0x60   : > { %p1173_p2 = pnand %p1172_p1, %p1171_p0  ;;  %p1178_p3 = por %p1177_p10, %p1176_p6 }
  0x62   : > { %p1174_p13 = pneg %p1173_p2  ;;  %p1180_p7 = por %p1179_p5, %p1178_p3 }
  0x64   : > { %p1181_p11 = pnand %p1180_p7, %p1174_p13 }
  0x66   : > { %1184 = shalt.err (!%p1181_p11)
}
  0x67   : > { %s1185_s29 = scalar_lea.vmem %s1518_s12, 4096  ;;  %s1330_s30 = smov [#allocation2]  }
  0x68   : > { %p1186_p0 = scmp.ne.s32.totalorder %s1518_s12, %s1185_s29  ;;  %s1190_s7 = sshll.u32 %s1330_s30, 4  ;;  %s1191_s7 = int_to_ptr.vmem [resolvable:$false] %s1190_s7 }
  0x69   : > { %s1192_s13 = scalar_lea.vmem %s1191_s7, 8192  ;;  %p1193_p4 = scmp.lt.s32.totalorder %s1518_s12, %s1191_s7 }
  0x6a   : > { %p1188_p2 = pnand %p1186_p0, %p1172_p1  ;;  %p1194_p6 = scmp.lt.s32.totalorder %s1192_s13, %s1185_s29 }
  0x6c   : > { %p1189_p9 = pneg %p1188_p2  ;;  %p1195_p10 = por %p1194_p6, %p1193_p4 }
  0x6e   : > { %p1196_p3 = pnand %p1195_p10, %p1189_p9 }
  0x70   : > { %1199 = shalt.err (!%p1196_p3)
}
  0x71   : > { %s1822_s9 = smov 128   ;;  %s828_s10 = sshll.u32 %s1500_s6, 7 }
  0x72   : > { %1046 = dma.hbm_to_vmem [thread:$0]  (!%p1514_p12), %s1510_s27, 4096, %s1518_s12, %s205_s5, %s1822_s9, %s1822_s9, %s1329_s14  }
  0x73   : > { %s844_s11 = sshll.u32 %s1320_s19, 11  ;;  %s232_s13 = scalar_lea.vmem [#allocation5], %s828_s10 }
  0x74   : > { %s1557_s7 = scalar_lea.hbm %s1798_s1, %s844_s11  ;;  %s242_s0 = sshll.u32 %s232_s13, 4  ;;  %s1559_s0 = int_to_ptr.vmem [resolvable:$true] %s242_s0 }
  0x75   : > { %s1823_s2 = sand.u32 1, %s1324_s20   ;;  %s1200_s26 = scalar_lea.hbm %s1557_s7, 2048 }
  0x76   : > { %s1563_s3 = scalar_lea.sflag [#allocation6], %s1823_s2  ;;  %p1201_p4 = scmp.ne.s32.totalorder %s1557_s7, %s1200_s26 }
  0x77   : > { %s1205_s12 = scalar_lea.hbm %s1798_s1, 4096  ;;  %p1206_p5 = scmp.lt.u32.totalorder %s1557_s7, %s1798_s1 }
  0x78   : > { %p1203_p9 = pnand %p1201_p4, %p1172_p1  ;;  %p1207_p7 = scmp.lt.u32.totalorder %s1205_s12, %s1200_s26 }
  0x79   : > { %p1209_p0 = scmp.lt.u32.totalorder %s1200_s26, %s1557_s7 }
  0x7a   : > { %p1204_p13 = pneg %p1203_p9  ;;  %p1208_p11 = por %p1207_p7, %p1206_p5 }
  0x7c   : > { %p1210_p2 = por %p1209_p0, %p1208_p11 }
  0x7e   : > { %p1211_p6 = pnand %p1210_p2, %p1204_p13 }
  0x80   : > { %1214 = shalt.err (!%p1211_p6)
}
  0x81   : > { %s1215_s2 = scalar_lea.vmem %s1559_s0, 2048  ;;  %s1331_s10 = smov [#allocation5]  }
  0x82   : > { %p1216_p10 = scmp.ne.s32.totalorder %s1559_s0, %s1215_s2  ;;  %s1220_s29 = sshll.u32 %s1331_s10, 4  ;;  %s1221_s29 = int_to_ptr.vmem [resolvable:$false] %s1220_s29 }
  0x83   : > { %s1222_s30 = scalar_lea.vmem %s1221_s29, 4096  ;;  %p1223_p9 = scmp.lt.s32.totalorder %s1559_s0, %s1221_s29 }
  0x84   : > { %p1218_p3 = pnand %p1216_p10, %p1172_p1  ;;  %p1224_p5 = scmp.lt.s32.totalorder %s1222_s30, %s1215_s2 }
  0x86   : > { %p1219_p4 = pneg %p1218_p3  ;;  %p1225_p7 = por %p1224_p5, %p1223_p9 }
  0x88   : > { %p1226_p11 = pnand %p1225_p7, %p1219_p4 }
  0x8a   : > { %1229 = shalt.err (!%p1226_p11)
}
  0x8b   : > { %1049 = dma.hbm_to_vmem [thread:$0]  (!%p1514_p12), %s1557_s7, 2048, %s1559_s0, %s1563_s3, %s1822_s9, %s1822_s9, %s1329_s14  }
  0x8c   : > { %254 = sbr.rel (%p1410_p8) target bundleno = 452 (0x1c4), region = 36  ;;  %s1595_s26 = sand.u32 (!%p1410_p8), 1, %s1308_s16  }
  0x8d   : > { %s832_s13 = sshll.u32 (!%p1410_p8), %s1595_s26, 8  ;;  %s257_s6 = scalar_lea.sflag (!%p1410_p8), [#allocation3], %s1595_s26 }
  0x8e   : > { %s1601_s22 = scalar_lea.vmem (!%p1410_p8), [#allocation2], %s832_s13  ;;  %p1824_p1 = scmp.ne.s32.totalorder (!%p1410_p8), %s1811_s23, 0 }
  0x93   : > { %1283 = dma.done.wait (%p1824_p1), %s257_s6, 4096  }
  0x94   : > { %1285 = vsyncadd (%p1824_p1), %s257_s6, 4294963200  ;;  %s265_s0 = sand.u32 1, %s1391_s21   ;;  %s833_s3 = sshll.u32 %s1595_s26, 7 }
  0x95   : > { %s266_s25 = scalar_lea.sflag [#allocation6], %s265_s0  ;;  %s1609_s14 = scalar_lea.vmem [#allocation5], %s833_s3 }
  0x96   : > { %1287 = dma.done.wait (%p1824_p1), %s266_s25, 2048  }
  0x97   : > { %1289 = vsyncadd (%p1824_p1), %s266_s25, 4294965248  ;;  %p1825_p8 = scmp.eq.s32.totalorder %s1391_s21, 0 }
  0x99   : > { %1291 = dma.done.wait (%p1825_p8), [#allocation6], 2048   ;;  %p1826_p12 = pmov %p1825_p8 }
  0x9a   : > { %p1827_p13 = pmov %p1825_p8 }
  0x9b   : > { %1293 = vsyncadd (%p1826_p12), [#allocation6], 4294965248 }
  0x9c   : > { %1295 = dma.done.wait (%p1827_p13), [#allocation9], 16   ;;  %p1828_p0 = pmov %p1825_p8 }
  0x9d   : > { %v342_v0 = vld [vmem:[#allocation7] sm:$0xff]  ;;  %v343_v1 = vld [vmem:[#allocation7 + $0x8] sm:$0xff]  ;;  %v344_v2 = vld [vmem:[#allocation7 + $0x10] sm:$0xff]  ;;  %s1667_s21 = scalar_lea.vmem [#allocation10], %s832_s13  ;;  %s845_s23 = sshll.u32 %s1316_s18, 12 }
  0x9e   : > { %1297 = vsyncadd (%p1828_p0), [#allocation9], 4294967280  ;;  %v974_v3 = vpack.c.bf16 %v343_v1, %v342_v0  ;;  %v345_v4 = vld [vmem:[#allocation7 + $0x18] sm:$0xff]  ;;  %v346_v6 = vld [vmem:[#allocation7 + $0x20] sm:$0xff]  ;;  %s687_s9 = sshll.u32 %s1667_s21, 4  ;;  %s1742_s27 = scalar_lea.hbm %s1801_s4, %s845_s23  ;;  %s1744_s9 = int_to_ptr.vmem [resolvable:$true] %s687_s9 }
  0x9f   : > { %v978_v5 = vpack.c.bf16 %v345_v4, %v344_v2  ;;  %v347_v7 = vld [vmem:[#allocation7 + $0x28] sm:$0xff]  ;;  %v310_v9 = vld [vmem:[%s1601_s22] sm:$0xff]  ;;  %v348_v11 = vld [vmem:[#allocation7 + $0x30] sm:$0xff]  ;;  %s671_s12 = scalar_lea.sflag [#allocation4], %s1595_s26  ;;  %s1230_s5 = scalar_lea.vmem %s1744_s9, 4096 }
  0xa0   : > { %975 = vmatprep.subr.bf16.mxu0 %v974_v3  ;;  %1006 = vmatprep.subr.bf16.mxu1 %v974_v3  ;;  %v982_v8 = vpack.c.bf16 %v347_v7, %v346_v6  ;;  %v326_v10 = vld [vmem:[%s1601_s22 + $0x80] sm:$0xff]  ;;  %v349_v12 = vld [vmem:[#allocation7 + $0x38] sm:$0xff]  ;;  %v351_v15 = vld [vmem:[#allocation7 + $0x48] sm:$0xff]  ;;  %p1231_p2 = scmp.ne.s32.totalorder %s1744_s9, %s1230_s5  ;;  %p1829_p6 = scmp.ne.s32.totalorder %s1819_s28, 0 }
  0xa1   : > { %977 = vmatpush3.bf16.msra.mxu0 %v974_v3  ;;  %1014 = vmatpush3.bf16.msra.mxu1 %v974_v3  ;;  %v986_v13 = vpack.c.bf16 %v349_v12, %v348_v11  ;;  %v350_v14 = vld [vmem:[#allocation7 + $0x40] sm:$0xff]  ;;  %v352_v17 = vld [vmem:[#allocation7 + $0x50] sm:$0xff]  ;;  %v353_v18 = vld [vmem:[#allocation7 + $0x58] sm:$0xff]  ;;  %s1332_s11 = smov [#allocation10]  }
  0xa2   : > { %979 = vmatprep.subr.bf16.mxu0 %v978_v5  ;;  %1007 = vmatprep.subr.bf16.mxu1 %v978_v5  ;;  %v990_v16 = vpack.c.bf16 %v351_v15, %v350_v14  ;;  %v994_v19 = vpack.c.bf16 %v353_v18, %v352_v17  ;;  %v354_v20 = vld [vmem:[#allocation7 + $0x60] sm:$0xff]  ;;  %v355_v21 = vld [vmem:[#allocation7 + $0x68] sm:$0xff]  ;;  %v356_v23 = vld [vmem:[#allocation7 + $0x70] sm:$0xff]  ;;  %p1232_p10 = pnand %p1231_p2, %p1829_p6  ;;  %s1234_s2 = sshll.u32 %s1332_s11, 4  ;;  %s1235_s2 = int_to_ptr.vmem [resolvable:$false] %s1234_s2 }
  0xa3   : > { %926 = vmatprep.mubr.f32.mxu0 %v310_v9  ;;  %950 = vmatprep.mubr.f32.mxu1 %v326_v10  ;;  %v998_v22 = vpack.c.bf16 %v355_v21, %v354_v20  ;;  %v357_v24 = vld [vmem:[#allocation7 + $0x78] sm:$0xff]  ;;  %v311_v26 = vld [vmem:[%s1601_s22 + $0x8] sm:$0xff]  ;;  %v312_v28 = vld [vmem:[%s1601_s22 + $0x10] sm:$0xff]  ;;  %s1236_s10 = scalar_lea.vmem %s1235_s2, 8192  ;;  %p1237_p4 = scmp.lt.s32.totalorder %s1744_s9, %s1235_s2 }
  0xa4   : > { %v1002_v25 = vpack.c.bf16 %v357_v24, %v356_v23  ;;  %v327_v27 = vld [vmem:[%s1601_s22 + $0x88] sm:$0xff]  ;;  %v328_v29 = vld [vmem:[%s1601_s22 + $0x90] sm:$0xff]  ;;  %v313_v30 = vld [vmem:[%s1601_s22 + $0x18] sm:$0xff]  ;;  %p1233_p3 = pneg %p1232_p10  ;;  %p1238_p9 = scmp.lt.s32.totalorder %s1236_s10, %s1230_s5 }
  0xa5   : > { %981 = vmatpush3.bf16.msra.mxu0 %v978_v5  ;;  %1015 = vmatpush3.bf16.msra.mxu1 %v978_v5  ;;  %v329_v31 = vld [vmem:[%s1601_s22 + $0x98] sm:$0xff]  ;;  %v314_v32 = vld [vmem:[%s1601_s22 + $0x20] sm:$0xff]  ;;  %v315_v34 = vld [vmem:[%s1601_s22 + $0x28] sm:$0xff] }
  0xa6   : > { %983 = vmatprep.subr.bf16.mxu0 %v982_v8  ;;  %1008 = vmatprep.subr.bf16.mxu1 %v982_v8  ;;  %v330_v33 = vld [vmem:[%s1601_s22 + $0xa0] sm:$0xff]  ;;  %v331_v35 = vld [vmem:[%s1601_s22 + $0xa8] sm:$0xff]  ;;  %v316_v36 = vld [vmem:[%s1601_s22 + $0x30] sm:$0xff]  ;;  %p1239_p5 = por %p1238_p9, %p1237_p4 }
  0xa7   : > { %v332_v37 = vld [vmem:[%s1601_s22 + $0xb0] sm:$0xff]  ;;  %v317_v38 = vld [vmem:[%s1601_s22 + $0x38] sm:$0xff]  ;;  %v318_v40 = vld [vmem:[%s1601_s22 + $0x40] sm:$0xff] }
  0xa8   : > { %v333_v39 = vld [vmem:[%s1601_s22 + $0xb8] sm:$0xff]  ;;  %v334_v41 = vld [vmem:[%s1601_s22 + $0xc0] sm:$0xff]  ;;  %v319_v42 = vld [vmem:[%s1601_s22 + $0x48] sm:$0xff]  ;;  %p1240_p7 = pnand %p1239_p5, %p1233_p3 }
  0xa9   : > { %985 = vmatpush3.bf16.msra.mxu0 %v982_v8  ;;  %1016 = vmatpush3.bf16.msra.mxu1 %v982_v8  ;;  %v335_v43 = vld [vmem:[%s1601_s22 + $0xc8] sm:$0xff]  ;;  %v320_v44 = vld [vmem:[%s1601_s22 + $0x50] sm:$0xff]  ;;  %v321_v46 = vld [vmem:[%s1601_s22 + $0x58] sm:$0xff] }
  0xaa   : > { %987 = vmatprep.subr.bf16.mxu0 %v986_v13  ;;  %1009 = vmatprep.subr.bf16.mxu1 %v986_v13  ;;  %v336_v45 = vld [vmem:[%s1601_s22 + $0xd0] sm:$0xff]  ;;  %v337_v47 = vld [vmem:[%s1601_s22 + $0xd8] sm:$0xff]  ;;  %v322_v48 = vld [vmem:[%s1601_s22 + $0x60] sm:$0xff] }
  0xab   : > { %v338_v49 = vld [vmem:[%s1601_s22 + $0xe0] sm:$0xff]  ;;  %v323_v50 = vld [vmem:[%s1601_s22 + $0x68] sm:$0xff]  ;;  %v324_v52 = vld [vmem:[%s1601_s22 + $0x70] sm:$0xff] }
  0xac   : > { %v339_v51 = vld [vmem:[%s1601_s22 + $0xe8] sm:$0xff]  ;;  %v340_v53 = vld [vmem:[%s1601_s22 + $0xf0] sm:$0xff]  ;;  %v325_v54 = vld [vmem:[%s1601_s22 + $0x78] sm:$0xff] }
  0xad   : > { %989 = vmatpush3.bf16.msra.mxu0 %v986_v13  ;;  %1017 = vmatpush3.bf16.msra.mxu1 %v986_v13  ;;  %v341_v55 = vld [vmem:[%s1601_s22 + $0xf8] sm:$0xff]  ;;  %v1655_v56 = vld [vmem:[#allocation8] ss:$0 sm:$0xff]  ;;  %v591_v58 = vld [vmem:[%s1609_s14 + $0x8] sm:$0xff] }
  0xae   : > { %991 = vmatprep.subr.bf16.mxu0 %v990_v16  ;;  %1010 = vmatprep.subr.bf16.mxu1 %v990_v16  ;;  %v599_v60 = vld [vmem:[%s1609_s14 + $0x48] sm:$0xff]  ;;  %v590_v0 = vld [vmem:[%s1609_s14] sm:$0xff]  ;;  %v601_v24 = vld [vmem:[%s1609_s14 + $0x58] sm:$0xff] }
  0xaf   : > { %v598_v2 = vld [vmem:[%s1609_s14 + $0x40] sm:$0xff] }
  0xb1   : > { %993 = vmatpush3.bf16.msra.mxu0 %v990_v16  ;;  %1018 = vmatpush3.bf16.msra.mxu1 %v990_v16 }
  0xb2   : > { %995 = vmatprep.subr.bf16.mxu0 %v994_v19  ;;  %1011 = vmatprep.subr.bf16.mxu1 %v994_v19 }
  0xb5   : > { %997 = vmatpush3.bf16.msra.mxu0 %v994_v19  ;;  %1019 = vmatpush3.bf16.msra.mxu1 %v994_v19 }
  0xb6   : > { %999 = vmatprep.subr.bf16.mxu0 %v998_v22  ;;  %1012 = vmatprep.subr.bf16.mxu1 %v998_v22 }
  0xb9   : > { %1001 = vmatpush3.bf16.msra.mxu0 %v998_v22  ;;  %1020 = vmatpush3.bf16.msra.mxu1 %v998_v22  ;;  %v593_v22 = vld [vmem:[%s1609_s14 + $0x18] sm:$0xff] }
  0xba   : > { %1003 = vmatprep.subr.bf16.mxu0 %v1002_v25  ;;  %1013 = vmatprep.subr.bf16.mxu1 %v1002_v25 }
  0xbd   : > { %1005 = vmatpush3.bf16.msra.mxu0 %v1002_v25  ;;  %1021 = vmatpush3.bf16.msra.mxu1 %v1002_v25 }
  0xc0   : > { %927 = vmatmul.mubr.f32.vlgmr.msra.gmra.mrb[0].mxu0 %v311_v26  ;;  %951 = vmatmul.mubr.f32.vlgmr.msra.gmra.mrb[0].mxu1 %v327_v27 }
  0xc1   : > { %929 = vmatprep.mubr.f32.mxu0 %v312_v28  ;;  %953 = vmatprep.mubr.f32.mxu1 %v328_v29  ;;  %v592_v28 = vld [vmem:[%s1609_s14 + $0x10] sm:$0xff] }
  0xc4   : > { %930 = vmatmul.mubr.f32.gmra.mrb[2].mxu0 %v313_v30  ;;  %954 = vmatmul.mubr.f32.gmra.mrb[2].mxu1 %v329_v31  ;;  %v600_v30 = vld [vmem:[%s1609_s14 + $0x50] sm:$0xff] }
  0xc5   : > { %932 = vmatprep.mubr.f32.mxu0 %v314_v32  ;;  %956 = vmatprep.mubr.f32.mxu1 %v330_v33 }
  0xc8   : > { %933 = vmatmul.mubr.f32.gmra.mrb[4].mxu0 %v315_v34  ;;  %957 = vmatmul.mubr.f32.gmra.mrb[4].mxu1 %v331_v35 }
  0xc9   : > { %935 = vmatprep.mubr.f32.mxu0 %v316_v36  ;;  %959 = vmatprep.mubr.f32.mxu1 %v332_v37 }
  0xcc   : > { %936 = vmatmul.mubr.f32.gmra.mrb[6].mxu0 %v317_v38  ;;  %960 = vmatmul.mubr.f32.gmra.mrb[6].mxu1 %v333_v39 }
  0xcd   : > { %938 = vmatprep.mubr.f32.mxu0 %v318_v40  ;;  %962 = vmatprep.mubr.f32.mxu1 %v334_v41 }
  0xd0   : > { %939 = vmatmul.mubr.f32.gmra.mrb[8].mxu0 %v319_v42  ;;  %963 = vmatmul.mubr.f32.gmra.mrb[8].mxu1 %v335_v43 }
  0xd1   : > { %941 = vmatprep.mubr.f32.mxu0 %v320_v44  ;;  %965 = vmatprep.mubr.f32.mxu1 %v336_v45 }
  0xd4   : > { %942 = vmatmul.mubr.f32.gmra.mrb[10].mxu0 %v321_v46  ;;  %966 = vmatmul.mubr.f32.gmra.mrb[10].mxu1 %v337_v47 }
  0xd5   : > { %944 = vmatprep.mubr.f32.mxu0 %v322_v48  ;;  %968 = vmatprep.mubr.f32.mxu1 %v338_v49 }
  0xd8   : > { %945 = vmatmul.mubr.f32.gmra.mrb[12].mxu0 %v323_v50  ;;  %969 = vmatmul.mubr.f32.gmra.mrb[12].mxu1 %v339_v51  ;;  %v595_v50 = vld [vmem:[%s1609_s14 + $0x28] sm:$0xff] }
  0xd9   : > { %947 = vmatprep.mubr.f32.mxu0 %v324_v52  ;;  %971 = vmatprep.mubr.f32.mxu1 %v340_v53  ;;  %v603_v52 = vld [vmem:[%s1609_s14 + $0x68] sm:$0xff] }
  0xdc   : > { %948 = vmatmul.mubr.f32.gmra.mrb[14].mxu0 %v325_v54  ;;  %972 = vmatmul.mubr.f32.gmra.mrb[14].mxu1 %v341_v55 }
 0x193   : > { %v928_v57 = vpop.f32.mrb[0].mxu0  ;;  %v952_v59 = vpop.f32.mrb[0].mxu1 }
 0x194   : > { %v437_v61 = vadd.f32 %v928_v57, %v1655_v56  ;;  %v517_v62 = vadd.f32 %v952_v59, %v1655_v56  ;;  %v431_v63 = vpop.f32.mrb[1].mxu0  ;;  %v511_v1 = vpop.f32.mrb[1].mxu1  ;;  %v594_v57 = vld [vmem:[%s1609_s14 + $0x20] sm:$0xff] }
 0x195   : > { %v432_v3 = vadd.f32 %v1655_v56, %v431_v63  ;;  %v512_v4 = vadd.f32 %v1655_v56, %v511_v1  ;;  %v602_v59 = vld [vmem:[%s1609_s14 + $0x60] sm:$0xff] }
 0x196   : > { %v607_v5 = vadd.f32 %v591_v58, %v437_v61  ;;  %v623_v6 = vadd.f32 %v599_v60, %v517_v62 }
 0x197   : > { %v606_v7 = vadd.f32 %v590_v0, %v432_v3  ;;  %v622_v8 = vadd.f32 %v598_v2, %v512_v4  ;;  %v931_v9 = vpop.f32.mrb[2].mxu0  ;;  %v955_v10 = vpop.f32.mrb[2].mxu1 }
 0x198   : > { %639 = vst [vmem:[%s1667_s21 + $0x8] sm:$0xff] %v607_v5  ;;  %655 = vst [vmem:[%s1667_s21 + $0x88] sm:$0xff] %v623_v6  ;;  %v447_v11 = vadd.f32 %v931_v9, %v1655_v56  ;;  %v527_v12 = vadd.f32 %v955_v10, %v1655_v56  ;;  %v441_v13 = vpop.f32.mrb[3].mxu0  ;;  %v521_v14 = vpop.f32.mrb[3].mxu1 }
 0x199   : > { %638 = vst [vmem:[%s1667_s21] sm:$0xff] %v606_v7  ;;  %654 = vst [vmem:[%s1667_s21 + $0x80] sm:$0xff] %v622_v8  ;;  %v442_v15 = vadd.f32 %v1655_v56, %v441_v13  ;;  %v522_v16 = vadd.f32 %v1655_v56, %v521_v14 }
 0x19a   : > { %v609_v17 = vadd.f32 %v591_v58, %v447_v11  ;;  %v625_v18 = vadd.f32 %v599_v60, %v527_v12 }
 0x19b   : > { %v608_v19 = vadd.f32 %v590_v0, %v442_v15  ;;  %v624_v20 = vadd.f32 %v598_v2, %v522_v16  ;;  %v934_v21 = vpop.f32.mrb[4].mxu0  ;;  %v958_v23 = vpop.f32.mrb[4].mxu1  ;;  %v597_v15 = vld [vmem:[%s1609_s14 + $0x38] sm:$0xff] }
 0x19c   : > { %641 = vst [vmem:[%s1667_s21 + $0x18] sm:$0xff] %v609_v17  ;;  %657 = vst [vmem:[%s1667_s21 + $0x98] sm:$0xff] %v625_v18  ;;  %v457_v25 = vadd.f32 %v934_v21, %v1655_v56  ;;  %v537_v26 = vadd.f32 %v958_v23, %v1655_v56  ;;  %v451_v27 = vpop.f32.mrb[5].mxu0  ;;  %v531_v29 = vpop.f32.mrb[5].mxu1  ;;  %v605_v17 = vld [vmem:[%s1609_s14 + $0x78] sm:$0xff]  ;;  %v596_v21 = vld [vmem:[%s1609_s14 + $0x30] sm:$0xff] }
 0x19d   : > { %640 = vst [vmem:[%s1667_s21 + $0x10] sm:$0xff] %v608_v19  ;;  %656 = vst [vmem:[%s1667_s21 + $0x90] sm:$0xff] %v624_v20  ;;  %v452_v31 = vadd.f32 %v1655_v56, %v451_v27  ;;  %v532_v32 = vadd.f32 %v1655_v56, %v531_v29  ;;  %v604_v23 = vld [vmem:[%s1609_s14 + $0x70] sm:$0xff] }
 0x19e   : > { %v611_v33 = vadd.f32 %v593_v22, %v457_v25  ;;  %v627_v34 = vadd.f32 %v601_v24, %v537_v26 }
 0x19f   : > { %v610_v35 = vadd.f32 %v592_v28, %v452_v31  ;;  %v626_v36 = vadd.f32 %v600_v30, %v532_v32  ;;  %v937_v37 = vpop.f32.mrb[6].mxu0  ;;  %v961_v38 = vpop.f32.mrb[6].mxu1 }
 0x1a0   : > { %643 = vst [vmem:[%s1667_s21 + $0x28] sm:$0xff] %v611_v33  ;;  %659 = vst [vmem:[%s1667_s21 + $0xa8] sm:$0xff] %v627_v34  ;;  %v467_v39 = vadd.f32 %v937_v37, %v1655_v56  ;;  %v547_v40 = vadd.f32 %v961_v38, %v1655_v56  ;;  %v461_v41 = vpop.f32.mrb[7].mxu0  ;;  %v541_v42 = vpop.f32.mrb[7].mxu1 }
 0x1a1   : > { %642 = vst [vmem:[%s1667_s21 + $0x20] sm:$0xff] %v610_v35  ;;  %658 = vst [vmem:[%s1667_s21 + $0xa0] sm:$0xff] %v626_v36  ;;  %v462_v43 = vadd.f32 %v1655_v56, %v461_v41  ;;  %v542_v44 = vadd.f32 %v1655_v56, %v541_v42 }
 0x1a2   : > { %v613_v45 = vadd.f32 %v593_v22, %v467_v39  ;;  %v629_v46 = vadd.f32 %v601_v24, %v547_v40 }
 0x1a3   : > { %v612_v47 = vadd.f32 %v592_v28, %v462_v43  ;;  %v628_v48 = vadd.f32 %v600_v30, %v542_v44  ;;  %v940_v49 = vpop.f32.mrb[8].mxu0  ;;  %v964_v51 = vpop.f32.mrb[8].mxu1 }
 0x1a4   : > { %645 = vst [vmem:[%s1667_s21 + $0x38] sm:$0xff] %v613_v45  ;;  %661 = vst [vmem:[%s1667_s21 + $0xb8] sm:$0xff] %v629_v46  ;;  %v477_v53 = vadd.f32 %v940_v49, %v1655_v56  ;;  %v557_v54 = vadd.f32 %v964_v51, %v1655_v56  ;;  %v471_v55 = vpop.f32.mrb[9].mxu0  ;;  %v551_v58 = vpop.f32.mrb[9].mxu1 }
 0x1a5   : > { %644 = vst [vmem:[%s1667_s21 + $0x30] sm:$0xff] %v612_v47  ;;  %660 = vst [vmem:[%s1667_s21 + $0xb0] sm:$0xff] %v628_v48  ;;  %v472_v60 = vadd.f32 %v1655_v56, %v471_v55  ;;  %v552_v61 = vadd.f32 %v1655_v56, %v551_v58 }
 0x1a6   : > { %v615_v62 = vadd.f32 %v595_v50, %v477_v53  ;;  %v631_v63 = vadd.f32 %v603_v52, %v557_v54 }
 0x1a7   : > { %v614_v0 = vadd.f32 %v594_v57, %v472_v60  ;;  %v630_v1 = vadd.f32 %v602_v59, %v552_v61  ;;  %v943_v2 = vpop.f32.mrb[10].mxu0  ;;  %v967_v3 = vpop.f32.mrb[10].mxu1 }
 0x1a8   : > { %647 = vst [vmem:[%s1667_s21 + $0x48] sm:$0xff] %v615_v62  ;;  %663 = vst [vmem:[%s1667_s21 + $0xc8] sm:$0xff] %v631_v63  ;;  %v487_v4 = vadd.f32 %v943_v2, %v1655_v56  ;;  %v567_v5 = vadd.f32 %v967_v3, %v1655_v56  ;;  %v481_v6 = vpop.f32.mrb[11].mxu0  ;;  %v561_v7 = vpop.f32.mrb[11].mxu1 }
 0x1a9   : > { %646 = vst [vmem:[%s1667_s21 + $0x40] sm:$0xff] %v614_v0  ;;  %662 = vst [vmem:[%s1667_s21 + $0xc0] sm:$0xff] %v630_v1  ;;  %v482_v8 = vadd.f32 %v1655_v56, %v481_v6  ;;  %v562_v9 = vadd.f32 %v1655_v56, %v561_v7 }
 0x1aa   : > { %v617_v10 = vadd.f32 %v595_v50, %v487_v4  ;;  %v633_v11 = vadd.f32 %v603_v52, %v567_v5 }
 0x1ab   : > { %v616_v12 = vadd.f32 %v594_v57, %v482_v8  ;;  %v632_v13 = vadd.f32 %v602_v59, %v562_v9  ;;  %v946_v14 = vpop.f32.mrb[12].mxu0  ;;  %v970_v16 = vpop.f32.mrb[12].mxu1 }
 0x1ac   : > { %649 = vst [vmem:[%s1667_s21 + $0x58] sm:$0xff] %v617_v10  ;;  %665 = vst [vmem:[%s1667_s21 + $0xd8] sm:$0xff] %v633_v11  ;;  %v497_v18 = vadd.f32 %v946_v14, %v1655_v56  ;;  %v577_v19 = vadd.f32 %v970_v16, %v1655_v56  ;;  %v491_v20 = vpop.f32.mrb[13].mxu0  ;;  %v571_v22 = vpop.f32.mrb[13].mxu1 }
 0x1ad   : > { %648 = vst [vmem:[%s1667_s21 + $0x50] sm:$0xff] %v616_v12  ;;  %664 = vst [vmem:[%s1667_s21 + $0xd0] sm:$0xff] %v632_v13  ;;  %v492_v24 = vadd.f32 %v1655_v56, %v491_v20  ;;  %v572_v25 = vadd.f32 %v1655_v56, %v571_v22 }
 0x1ae   : > { %v619_v26 = vadd.f32 %v597_v15, %v497_v18  ;;  %v635_v27 = vadd.f32 %v605_v17, %v577_v19 }
 0x1af   : > { %v618_v28 = vadd.f32 %v596_v21, %v492_v24  ;;  %v634_v29 = vadd.f32 %v604_v23, %v572_v25  ;;  %v949_v30 = vpop.f32.mrb[14].mxu0  ;;  %v973_v31 = vpop.f32.mrb[14].mxu1 }
 0x1b0   : > { %651 = vst [vmem:[%s1667_s21 + $0x68] sm:$0xff] %v619_v26  ;;  %667 = vst [vmem:[%s1667_s21 + $0xe8] sm:$0xff] %v635_v27  ;;  %v507_v32 = vadd.f32 %v949_v30, %v1655_v56  ;;  %v587_v33 = vadd.f32 %v973_v31, %v1655_v56  ;;  %v501_v34 = vpop.f32.mrb[15].mxu0  ;;  %v581_v35 = vpop.f32.mrb[15].mxu1 }
 0x1b1   : > { %650 = vst [vmem:[%s1667_s21 + $0x60] sm:$0xff] %v618_v28  ;;  %666 = vst [vmem:[%s1667_s21 + $0xe0] sm:$0xff] %v634_v29  ;;  %v502_v36 = vadd.f32 %v1655_v56, %v501_v34  ;;  %v582_v37 = vadd.f32 %v1655_v56, %v581_v35 }
 0x1b2   : > { %v621_v38 = vadd.f32 %v597_v15, %v507_v32  ;;  %v637_v39 = vadd.f32 %v605_v17, %v587_v33 }
 0x1b3   : > { %v620_v40 = vadd.f32 %v596_v21, %v502_v36  ;;  %v636_v41 = vadd.f32 %v604_v23, %v582_v37 }
 0x1b4   : > { %653 = vst [vmem:[%s1667_s21 + $0x78] sm:$0xff] %v621_v38  ;;  %669 = vst [vmem:[%s1667_s21 + $0xf8] sm:$0xff] %v637_v39 }
 0x1b5   : > { %652 = vst [vmem:[%s1667_s21 + $0x70] sm:$0xff] %v620_v40  ;;  %668 = vst [vmem:[%s1667_s21 + $0xf0] sm:$0xff] %v636_v41 }
 0x1b6   : > { %1243 = shalt.err (!%p1240_p7)
}
 0x1b7   : > { %s1244_s29 = scalar_lea.hbm %s1742_s27, 4096  ;;  %s1248_s6 = scalar_lea.hbm %s1801_s4, 8192 }
 0x1b8   : > { %p1245_p11 = scmp.ne.s32.totalorder %s1742_s27, %s1244_s29  ;;  %p1249_p12 = scmp.lt.u32.totalorder %s1742_s27, %s1801_s4 }
 0x1b9   : > { %p1250_p13 = scmp.lt.u32.totalorder %s1248_s6, %s1244_s29  ;;  %p1252_p2 = scmp.lt.u32.totalorder %s1244_s29, %s1742_s27 }
 0x1ba   : > { %p1246_p1 = pnand %p1245_p11, %p1829_p6 }
 0x1bb   : > { %p1251_p0 = por %p1250_p13, %p1249_p12 }
 0x1bc   : > { %p1247_p8 = pneg %p1246_p1 }
 0x1bd   : > { %p1253_p10 = por %p1252_p2, %p1251_p0 }
 0x1bf   : > { %p1254_p3 = pnand %p1253_p10, %p1247_p8 }
 0x1c1   : > { %1257 = shalt.err (!%p1254_p3)
}
 0x1c2   : > { %s1333_s3 = smov 128   ;;  %s1334_s25 = smov 8  }
 0x1c3   : > { %1034 = dma.vmem_to_hbm [thread:$0]  (%p1829_p6), %s1744_s9, 4096, %s1742_s27, %s671_s12, %s1333_s3, %s1333_s3, %s1334_s25  }
 0x1c4 PF: > { %s702_s14 = sand.u32 1, %s1304_s15   ;;  %p1830_p4 = scmp.ne.s32.totalorder %s1812_s24, 0 }
 0x1c5   : > { %p1831_p9 = scmp.ge.s32.totalorder %s1324_s20, 2  ;;  %s703_s21 = scalar_lea.sflag [#allocation4], %s702_s14 }
 0x1c7   : > { %p1051_p5 = pnand %p1831_p9, %p1830_p4 }
 0x1c9   : > { %1299 = dma.done.wait (!%p1051_p5), %s703_s21, 4096  }
 0x1ca   : > { %1301 = vsyncadd (!%p1051_p5), %s703_s21, 4294963200  ;;  %s24_s20 = sadd.s32 1, %s1324_s20   ;;  %s1832_s28 = sld [smem:[#allocation16_spill]] }
 0x1cb   : > { %p21_p7 = scmp.ge.s32.totalorder %s24_s20, 4   ;;  %s1833_s15 = smov %s1308_s16 }
 0x1cc   : > { %s1834_s16 = smov %s1312_s17  ;;  %s1835_s17 = smov %s1505_s8 }
 0x1cd   : > { %s1836_s18 = smov %s1320_s19  ;;  %23 = sbr.rel (!%p21_p7) target bundleno = 13 (0xd), region = 102 }
 0x1d0   : > { %s1837_s19 = smov %s1832_s28 }
 0x1d4   :  { %708 = vsyncpa [#allocation3], 1 }
 0x1d5   :  { %710 = vsyncpa [#allocation3 + $0x1], 1 }
 0x1d6   :  { %711 = vsyncpa [#allocation6], 1 }
 0x1d7   :  { %713 = vsyncpa [#allocation6 + $0x1], 1 }
 0x1d8   :  { %714 = vsyncpa [#allocation9], 1 }
 0x1d9   :  { %715 = vsyncpa [#allocation4], 1 }
 0x1da   :  { %717 = vsyncpa [#allocation4 + $0x1], 1 }

// kernel: lateral_block_forward.3
= control target key start
LH: loop header
LB: loop body
LE: loop exit
PB: predicated region body
PF: predicated region fallthrough
CT: control target
= control target key end

     0   :  { %8 = vsyncpa [#allocation6], 0  ;;  %s4350_s0 = inlined_call_operand.hbm [shape: f32[2,16,16,128], index: 0, kind: input, shape index: {}]   ;;  %s4351_s1 = inlined_call_operand.hbm [shape: f32[1152,128], index: 1, kind: input, shape index: {}]   ;;  %s4352_s2 = inlined_call_operand.hbm [shape: f32[1,128], index: 2, kind: input, shape index: {}]   ;;  %s4353_s3 = inlined_call_operand.hbm [shape: f32[2,16,16,128], index: 3, kind: output, shape index: {}]  }
   0x1   :  { %9 = vsyncpa [#allocation9], 0 }
   0x2   :  { %10 = vsyncpa [#allocation7], 0 }
   0x3   :  { %12 = vsyncpa [#allocation7 + $0x1], 0  ;;  %s3315_s12 = smov 0   ;;  %s3317_s13 = smov 0  }
   0x4   :  { %s3319_s14 = smov 0   ;;  %s3321_s15 = smov 0  }
   0x5   :  { %s3323_s16 = smov 0   ;;  %s3325_s17 = smov 0  }
   0x6 LB: > { %s2447_s18 = sadd.s32 4294967295, %s3279_s17   ;;  %s2448_s19 = sadd.s32 4294967294, %s3279_s17   ;;  %s3279_s17 = sphi %s3325_s17, %s18_s17   ;;  %s3275_s16 = sphi %s3323_s16, %s4371_s16   ;;  %s3271_s15 = sphi %s3321_s15, %s4370_s15   ;;  %s3267_s14 = sphi %s3319_s14, %s4369_s14   ;;  %s3263_s13 = sphi %s3317_s13, %s4368_s13   ;;  %s3259_s12 = sphi %s3315_s12, %s4367_s12  }
   0x7   : > { %s37_s20 = sadd.s32 1, %s3275_s16  ;;  %s100_s21 = sadd.s32 1, %s3267_s14 }
   0x8   : > { %p39_p0 = scmp.ge.s32.totalorder %s37_s20, 2  ;;  %p110_p1 = scmp.ne.s32.totalorder %s3267_s14, %s3263_s13 }
   0x9   : > { %p111_p2 = scmp.eq.s32.totalorder %s2447_s18, 1  ;;  %p116_p3 = scmp.ne.s32.totalorder %s3263_s13, %s3259_s12 }
   0xa   : > { %s4373_s20 = smov (%p39_p0, %s37_s20), 0  ;;  %p117_p5 = scmp.eq.s32.totalorder %s2448_s19, 1 }
   0xb   : > { %p3355_p4 = por %p111_p2, %p110_p1  ;;  %s93_s23 = ssub.s32 %s3275_s16, %s4373_s20 }
   0xc   : > { %p2449_p6 = scmp.ge.s32.totalorder %s3279_s17, 1  ;;  %p98_p7 = scmp.eq.s32.totalorder %s93_s23, 0 }
   0xd   : > { %s4358_s22 = scalar_select %p3355_p4, 1, 0 }
   0xe   : > { %p3362_p8 = por %p117_p5, %p116_p3  ;;  %p124_p9 = scmp.lt.s32.totalorder %s3279_s17, 3 }
   0xf   : > { %s3368_s25 = scalar_select %p98_p7, %s3267_s14, %s100_s21  }
  0x10   : > { %s4359_s24 = scalar_select %p3362_p8, 1, 0 }
  0x11   : > { %p3370_p10 = pnand %p2449_p6, %p124_p9  ;;  %p3374_p11 = scmp.eq.s32.totalorder %s2447_s18, 0 }
  0x12   : > { %s3281_s28 = smov [#allocation5]   ;;  %s3282_s4 = smov [#allocation8]  }
  0x13   : > { %s4360_s26 = scalar_select %p3370_p10, 1, 0 }
  0x14   : > { %s4361_s27 = scalar_select %p3374_p11, 1, 0 }
  0x15   : > { %p3035_p12 = pneg %p3370_p10  ;;  %s138_s29 = sshll.u32 %s3281_s28, 4  ;;  %s139_s29 = int_to_ptr.vmem [resolvable:$true] %s138_s29 }
  0x16   : > { %s154_s5 = sshll.u32 %s3282_s4, 4  ;;  %s3111_s8 = scalar_lea.hbm %s4351_s1, 18432  ;;  %s3386_s5 = int_to_ptr.vmem [resolvable:$true] %s154_s5 }
  0x17   : > { %p3382_p13 = pnand %p3374_p11, %p3035_p12  ;;  %p3112_p0 = scmp.ne.s32.totalorder %s4351_s1, %s3111_s8 }
  0x18   : > { %p3118_p5 = scmp.lt.u32.totalorder %s3111_s8, %s4351_s1 }
  0x19   : > { %p3113_p1 = pneg %p3382_p13 }
  0x1b   : > { %p3114_p2 = pnand %p3113_p1, %p3112_p0 }
  0x1d   : > { %p3115_p3 = pneg %p3114_p2 }
  0x1f   : > { %p3120_p6 = pnand %p3118_p5, %p3115_p3 }
  0x21   : > { %3123 = shalt.err (!%p3120_p6)
}
  0x22   : > { %s3124_s19 = scalar_lea.vmem %s139_s29, 18432  ;;  %p3132_p8 = scmp.lt.s32.totalorder %s139_s29, %s139_s29 }
  0x23   : > { %p3125_p7 = scmp.ne.s32.totalorder %s139_s29, %s3124_s19  ;;  %p3133_p4 = scmp.lt.s32.totalorder %s3124_s19, %s3124_s19 }
  0x25   : > { %p3127_p9 = pnand %p3125_p7, %p3113_p1  ;;  %p3134_p11 = por %p3133_p4, %p3132_p8 }
  0x27   : > { %p3128_p12 = pneg %p3127_p9 }
  0x29   : > { %p3135_p10 = pnand %p3134_p11, %p3128_p12 }
  0x2b   : > { %3138 = shalt.err (!%p3135_p10)
}
  0x2c   : > { %s3283_s21 = smov 128   ;;  %s3284_s23 = smov 8  }
  0x2d   : > { %3038 = dma.hbm_to_vmem [thread:$0]  (!%p3382_p13), %s4351_s1, 18432, %s139_s29, [#allocation6], %s3283_s21, %s3283_s21, %s3284_s23  }
  0x2e   : > { %s3139_s8 = scalar_lea.hbm %s4352_s2, 16 }
  0x2f   : > { %p3140_p0 = scmp.ne.s32.totalorder %s4352_s2, %s3139_s8  ;;  %p3146_p10 = scmp.lt.u32.totalorder %s3139_s8, %s4352_s2 }
  0x31   : > { %p3142_p4 = pnand %p3140_p0, %p3113_p1 }
  0x33   : > { %p3143_p8 = pneg %p3142_p4 }
  0x35   : > { %p3148_p11 = pnand %p3146_p10, %p3143_p8 }
  0x37   : > { %3151 = shalt.err (!%p3148_p11)
}
  0x38   : > { %s3152_s29 = scalar_lea.vmem %s3386_s5, 16  ;;  %s3159_s19 = scalar_lea.vmem %s3386_s5, 32 }
  0x39   : > { %p3153_p2 = scmp.ne.s32.totalorder %s3386_s5, %s3152_s29  ;;  %p3160_p6 = scmp.lt.s32.totalorder %s3386_s5, %s3386_s5 }
  0x3a   : > { %p3161_p7 = scmp.lt.s32.totalorder %s3159_s19, %s3152_s29 }
  0x3b   : > { %p3155_p3 = pnand %p3153_p2, %p3113_p1 }
  0x3c   : > { %p3162_p9 = por %p3161_p7, %p3160_p6 }
  0x3d   : > { %p3156_p5 = pneg %p3155_p3 }
  0x3f   : > { %p3163_p12 = pnand %p3162_p9, %p3156_p5 }
  0x41   : > { %3166 = shalt.err (!%p3163_p12)
}
  0x42   : > { %3041 = dma.hbm_to_vmem [thread:$0]  (!%p3382_p13), %s4352_s2, 16, %s3386_s5, [#allocation9]  }
  0x43   : > { %p4363_p0 = scmp.ne.s32.totalorder %s4360_s26, 0 }
  0x44   : > { %p4364_p1 = scmp.ne.s32.totalorder (!%p4363_p0), %s4361_s27, 0 }
  0x45   : > { %167 = sbr.rel (%p4363_p0) target bundleno = 709 (0x2c5), region = 28 }
  0x4c   : > { %3244 = dma.done.wait (%p4364_p1), [#allocation6], 18432  }
  0x4d   : > { %3246 = vsyncadd (%p4364_p1), [#allocation6], 4294948864 }
  0x4e   : > { %3248 = dma.done.wait (%p4364_p1), [#allocation9], 16  }
  0x4f   : > { %3250 = vsyncadd (%p4364_p1), [#allocation9], 4294967280  ;;  %s185_s30 = sand.u32 1, %s3263_s13   ;;  %s2470_s5 = sshll.u32 %s3271_s15, 12 }
  0x50   : > { %s3450_s26 = sshll.u32 %s185_s30, 8  ;;  %s3457_s6 = scalar_lea.hbm %s4350_s0, %s2470_s5 }
  0x51   : > { %s3285_s27 = smov [#allocation2 + $0x40]   ;;  %s3167_s8 = scalar_lea.hbm %s3457_s6, 4096 }
  0x52   : > { %s201_s7 = sshll.u32 %s3285_s27, 4  ;;  %p3168_p13 = scmp.ne.s32.totalorder %s3457_s6, %s3167_s8  ;;  %s202_s7 = int_to_ptr.vmem [resolvable:$true] %s201_s7 }
  0x53   : > { %s3169_s11 = scalar_lea.hbm %s4350_s0, 8192  ;;  %p3170_p4 = scmp.lt.u32.totalorder %s3457_s6, %s4350_s0 }
  0x54   : > { %p3171_p8 = scmp.lt.u32.totalorder %s3169_s11, %s3167_s8  ;;  %p3173_p11 = scmp.lt.u32.totalorder %s3167_s8, %s3457_s6 }
  0x56   : > { %p3172_p10 = por %p3171_p8, %p3170_p4 }
  0x58   : > { %p3174_p2 = por %p3173_p11, %p3172_p10 }
  0x5a   : > { %p3175_p3 = pnand %p3174_p2, %p3168_p13 }
  0x5c   : > { %3178 = shalt.err (!%p3175_p3)  }
  0x5d   : > { %s3179_s19 = scalar_lea.vmem %s202_s7, 4096  ;;  %s3286_s21 = smov [#allocation2]  }
  0x5e   : > { %p3180_p5 = scmp.ne.s32.totalorder %s202_s7, %s3179_s19  ;;  %s3181_s23 = sshll.u32 %s3286_s21, 4  ;;  %s3182_s23 = int_to_ptr.vmem [resolvable:$false] %s3181_s23 }
  0x5f   : > { %s3183_s28 = scalar_lea.vmem %s3182_s23, 13824  ;;  %p3184_p6 = scmp.lt.s32.totalorder %s202_s7, %s3182_s23 }
  0x60   : > { %p3185_p7 = scmp.lt.s32.totalorder %s3183_s28, %s3179_s19 }
  0x62   : > { %p3186_p9 = por %p3185_p7, %p3184_p6 }
  0x64   : > { %p3187_p12 = pnand %p3186_p9, %p3180_p5 }
  0x66   : > { %3190 = shalt.err (!%p3187_p12)  }
  0x67   : > { %s3287_s4 = smov 256   ;;  %s3288_s27 = smov 768   ;;  %v3290_v0 = vmov 0.0  }
  0x68   : > { %s3289_s9 = smov 16  }
  0x69   : > { %204 = dma.hbm_to_vmem [thread:$0]  %s3457_s6, 4096, %s202_s7, [#allocation4], %s3287_s4, %s3288_s27, %s3289_s9 }
  0x6a   : > { %205 = vst [vmem:[#allocation2 + $0xf] sm:$0x1] %v3290_v0  ;;  %206 = vst [vmem:[#allocation2 + $0x3f] sm:$0x1] %v3290_v0  ;;  %s3471_s6 = scalar_lea.vmem [#allocation10], %s3450_s26 }
  0x6b   : > { %207 = vst [vmem:[#allocation2 + $0x6f] sm:$0x1] %v3290_v0  ;;  %208 = vst [vmem:[#allocation2 + $0x9f] sm:$0x1] %v3290_v0 }
  0x6c   : > { %209 = vst [vmem:[#allocation2 + $0xcf] sm:$0x1] %v3290_v0  ;;  %210 = vst [vmem:[#allocation2 + $0xff] sm:$0x1] %v3290_v0 }
  0x6d   : > { %211 = vst [vmem:[#allocation2 + $0x12f] sm:$0x1] %v3290_v0  ;;  %212 = vst [vmem:[#allocation2 + $0x15f] sm:$0x1] %v3290_v0 }
  0x6e   : > { %213 = vst [vmem:[#allocation2 + $0x18f] sm:$0x1] %v3290_v0  ;;  %214 = vst [vmem:[#allocation2 + $0x1bf] sm:$0x1] %v3290_v0 }
  0x6f   : > { %215 = vst [vmem:[#allocation2 + $0x1ef] sm:$0x1] %v3290_v0  ;;  %216 = vst [vmem:[#allocation2 + $0x21f] sm:$0x1] %v3290_v0 }
  0x70   : > { %217 = vst [vmem:[#allocation2 + $0x24f] sm:$0x1] %v3290_v0  ;;  %218 = vst [vmem:[#allocation2 + $0x27f] sm:$0x1] %v3290_v0 }
  0x71   : > { %219 = vst [vmem:[#allocation2 + $0x2af] sm:$0x1] %v3290_v0  ;;  %220 = vst [vmem:[#allocation2 + $0x2df] sm:$0x1] %v3290_v0 }
  0x72   : > { %221 = vst [vmem:[#allocation2 + $0x30f] sm:$0x1] %v3290_v0  ;;  %222 = vst [vmem:[#allocation2 + $0x33f] sm:$0x1] %v3290_v0 }
  0x73   : > { %223 = vst [vmem:[#allocation2 + $0x20] sm:$0x1] %v3290_v0  ;;  %224 = vst [vmem:[#allocation2 + $0x50] sm:$0x1] %v3290_v0 }
  0x74   : > { %225 = vst [vmem:[#allocation2 + $0x80] sm:$0x1] %v3290_v0  ;;  %226 = vst [vmem:[#allocation2 + $0xb0] sm:$0x1] %v3290_v0 }
  0x75   : > { %227 = vst [vmem:[#allocation2 + $0xe0] sm:$0x1] %v3290_v0  ;;  %228 = vst [vmem:[#allocation2 + $0x110] sm:$0x1] %v3290_v0 }
  0x76   : > { %229 = vst [vmem:[#allocation2 + $0x140] sm:$0x1] %v3290_v0  ;;  %230 = vst [vmem:[#allocation2 + $0x170] sm:$0x1] %v3290_v0 }
  0x77   : > { %231 = vst [vmem:[#allocation2 + $0x1a0] sm:$0x1] %v3290_v0  ;;  %232 = vst [vmem:[#allocation2 + $0x1d0] sm:$0x1] %v3290_v0 }
  0x78   : > { %233 = vst [vmem:[#allocation2 + $0x200] sm:$0x1] %v3290_v0  ;;  %234 = vst [vmem:[#allocation2 + $0x230] sm:$0x1] %v3290_v0 }
  0x79   : > { %235 = vst [vmem:[#allocation2 + $0x260] sm:$0x1] %v3290_v0  ;;  %236 = vst [vmem:[#allocation2 + $0x290] sm:$0x1] %v3290_v0 }
  0x7a   : > { %237 = vst [vmem:[#allocation2 + $0x2c0] sm:$0x1] %v3290_v0  ;;  %238 = vst [vmem:[#allocation2 + $0x2f0] sm:$0x1] %v3290_v0 }
  0x7b   : > { %239 = vst [vmem:[#allocation2 + $0x320] sm:$0x1] %v3290_v0  ;;  %240 = vst [vmem:[#allocation2 + $0x350] sm:$0x1] %v3290_v0 }
  0x7c   : > { %245 = vst [vmem:[#allocation2 + $0x10] sm:$0xff] %v3290_v0  ;;  %246 = vst [vmem:[#allocation2 + $0x18] sm:$0xff] %v3290_v0 }
  0x7d   : > { %277 = vst [vmem:[#allocation2 + $0x340] sm:$0xff] %v3290_v0  ;;  %278 = vst [vmem:[#allocation2 + $0x348] sm:$0xff] %v3290_v0 }
  0x7e   : > { %3251 = dma.done.wait [#allocation4], 4096 }
  0x7f   : > { %3252 = vsyncadd [#allocation4], 4294963200  ;;  %v3291_v1 = vmov 0.0|0.0   ;;  %v993_v2 = vld [vmem:[#allocation5] sm:$0xff]  ;;  %v994_v3 = vld [vmem:[#allocation5 + $0x8] sm:$0xff]  ;;  %s2319_s26 = sshll.u32 %s3471_s6, 4  ;;  %s4295_s10 = scalar_lea.hbm %s4353_s3, %s2470_s5  ;;  %s4297_s26 = int_to_ptr.vmem [resolvable:$true] %s2319_s26 }
  0x80   : > { %2601 = vmatprep.subr.bf16.mxu1 %v3291_v1  ;;  %2649 = vmatprep.subr.bf16.mxu0 %v3291_v1  ;;  %v1025_v4 = vld [vmem:[#allocation5 + $0x100] sm:$0xff]  ;;  %v2602_v5 = vpack.c.bf16 %v994_v3, %v993_v2  ;;  %v1026_v6 = vld [vmem:[#allocation5 + $0x108] sm:$0xff]  ;;  %v995_v7 = vld [vmem:[#allocation5 + $0x10] sm:$0xff]  ;;  %s4304_s11 = scalar_lea.sflag [#allocation7], %s185_s30  ;;  %s3191_s18 = scalar_lea.vmem %s4297_s26, 4096 }
  0x81   : > { %v996_v8 = vld [vmem:[#allocation5 + $0x18] sm:$0xff]  ;;  %v2650_v9 = vpack.c.bf16 %v1026_v6, %v1025_v4  ;;  %v1027_v10 = vld [vmem:[#allocation5 + $0x110] sm:$0xff]  ;;  %v997_v14 = vld [vmem:[#allocation5 + $0x20] sm:$0xff]  ;;  %p3192_p0 = scmp.ne.s32.totalorder %s4297_s26, %s3191_s18  ;;  %p4365_p1 = scmp.ne.s32.totalorder %s4358_s22, 0 }
  0x82   : > { %v1028_v11 = vld [vmem:[#allocation5 + $0x118] sm:$0xff]  ;;  %2603 = vmatpush1.bf16.msra.mxu1 %v2602_v5  ;;  %v2605_v12 = vpack.c.bf16 %v996_v8, %v995_v7  ;;  %v998_v15 = vld [vmem:[#allocation5 + $0x28] sm:$0xff]  ;;  %v1029_v16 = vld [vmem:[#allocation5 + $0x120] sm:$0xff]  ;;  %s3292_s15 = smov [#allocation10]  }
  0x83   : > { %2651 = vmatpush1.bf16.msra.mxu0 %v2650_v9  ;;  %2604 = vmatprep.subr.bf16.mxu1 %v3291_v1  ;;  %v2653_v13 = vpack.c.bf16 %v1028_v11, %v1027_v10  ;;  %v1030_v17 = vld [vmem:[#allocation5 + $0x128] sm:$0xff]  ;;  %v2608_v18 = vpack.c.bf16 %v998_v15, %v997_v14  ;;  %v999_v20 = vld [vmem:[#allocation5 + $0x30] sm:$0xff]  ;;  %v1000_v21 = vld [vmem:[#allocation5 + $0x38] sm:$0xff]  ;;  %p3193_p13 = pnand %p3192_p0, %p4365_p1  ;;  %s3195_s5 = sshll.u32 %s3292_s15, 4  ;;  %s3196_s5 = int_to_ptr.vmem [resolvable:$false] %s3195_s5 }
  0x84   : > { %2652 = vmatprep.subr.bf16.mxu0 %v3291_v1  ;;  %v2656_v19 = vpack.c.bf16 %v1030_v17, %v1029_v16  ;;  %v1031_v22 = vld [vmem:[#allocation5 + $0x130] sm:$0xff]  ;;  %v1032_v23 = vld [vmem:[#allocation5 + $0x138] sm:$0xff]  ;;  %v2611_v24 = vpack.c.bf16 %v1000_v21, %v999_v20  ;;  %v1001_v26 = vld [vmem:[#allocation5 + $0x40] sm:$0xff]  ;;  %s3197_s29 = scalar_lea.vmem %s3196_s5, 8192  ;;  %p3198_p8 = scmp.lt.s32.totalorder %s4297_s26, %s3196_s5 }
  0x85   : > { %v2659_v25 = vpack.c.bf16 %v1032_v23, %v1031_v22  ;;  %v1002_v27 = vld [vmem:[#allocation5 + $0x48] sm:$0xff]  ;;  %v1033_v28 = vld [vmem:[#allocation5 + $0x140] sm:$0xff]  ;;  %v1003_v32 = vld [vmem:[#allocation5 + $0x50] sm:$0xff]  ;;  %p3194_p4 = pneg %p3193_p13  ;;  %p3199_p10 = scmp.lt.s32.totalorder %s3197_s29, %s3191_s18 }
  0x86   : > { %2606 = vmatpush1.bf16.msra.mxu1 %v2605_v12  ;;  %v1034_v29 = vld [vmem:[#allocation5 + $0x148] sm:$0xff]  ;;  %v2614_v30 = vpack.c.bf16 %v1002_v27, %v1001_v26  ;;  %v1004_v33 = vld [vmem:[#allocation5 + $0x58] sm:$0xff]  ;;  %v1035_v34 = vld [vmem:[#allocation5 + $0x150] sm:$0xff] }
  0x87   : > { %2654 = vmatpush1.bf16.msra.mxu0 %v2653_v13  ;;  %2607 = vmatprep.subr.bf16.mxu1 %v3291_v1  ;;  %v2662_v31 = vpack.c.bf16 %v1034_v29, %v1033_v28  ;;  %v1036_v35 = vld [vmem:[#allocation5 + $0x158] sm:$0xff]  ;;  %v2617_v36 = vpack.c.bf16 %v1004_v33, %v1003_v32  ;;  %v1005_v38 = vld [vmem:[#allocation5 + $0x60] sm:$0xff]  ;;  %v1006_v39 = vld [vmem:[#allocation5 + $0x68] sm:$0xff]  ;;  %p3200_p11 = por %p3199_p10, %p3198_p8 }
  0x88   : > { %2655 = vmatprep.subr.bf16.mxu0 %v3291_v1  ;;  %v2665_v37 = vpack.c.bf16 %v1036_v35, %v1035_v34  ;;  %v1037_v40 = vld [vmem:[#allocation5 + $0x160] sm:$0xff]  ;;  %v1038_v41 = vld [vmem:[#allocation5 + $0x168] sm:$0xff]  ;;  %v441_v43 = vld [vmem:[#allocation2 + $0x10] sm:$0xff]  ;;  %v2620_v44 = vpack.c.bf16 %v1006_v39, %v1005_v38 }
  0x89   : > { %v3485_v42 = vld [vmem:[#allocation2 + $0x3f] sm:$0xff]  ;;  %1433 = vmatprep.mubr.f32.mxu0 %v441_v43  ;;  %v2668_v45 = vpack.c.bf16 %v1038_v41, %v1037_v40  ;;  %v1007_v46 = vld [vmem:[#allocation5 + $0x70] sm:$0xff]  ;;  %v1010_v53 = vld [vmem:[#allocation5 + $0x88] sm:$0xff]  ;;  %p3201_p2 = pnand %p3200_p11, %p3194_p4 }
  0x8a   : > { %2609 = vmatpush1.bf16.msra.mxu1 %v2608_v18  ;;  %1208 = vmatprep.mubr.f32.mxu1 %v3485_v42  ;;  %v1008_v47 = vld [vmem:[#allocation5 + $0x78] sm:$0xff]  ;;  %v1039_v48 = vld [vmem:[#allocation5 + $0x170] sm:$0xff]  ;;  %v1009_v52 = vld [vmem:[#allocation5 + $0x80] sm:$0xff] }
  0x8b   : > { %2657 = vmatpush1.bf16.msra.mxu0 %v2656_v19  ;;  %2610 = vmatprep.subr.bf16.mxu1 %v3291_v1  ;;  %v1040_v49 = vld [vmem:[#allocation5 + $0x178] sm:$0xff]  ;;  %v2623_v50 = vpack.c.bf16 %v1008_v47, %v1007_v46  ;;  %v1041_v54 = vld [vmem:[#allocation5 + $0x180] sm:$0xff]  ;;  %v1042_v55 = vld [vmem:[#allocation5 + $0x188] sm:$0xff]  ;;  %v2626_v56 = vpack.c.bf16 %v1010_v53, %v1009_v52 }
  0x8c   : > { %2658 = vmatprep.subr.bf16.mxu0 %v3291_v1  ;;  %v2671_v51 = vpack.c.bf16 %v1040_v49, %v1039_v48  ;;  %v2674_v57 = vpack.c.bf16 %v1042_v55, %v1041_v54  ;;  %v1011_v58 = vld [vmem:[#allocation5 + $0x90] sm:$0xff]  ;;  %v1012_v59 = vld [vmem:[#allocation5 + $0x98] sm:$0xff]  ;;  %v1013_v0 = vld [vmem:[#allocation5 + $0xa0] sm:$0xff] }
  0x8d   : > { %v1043_v60 = vld [vmem:[#allocation5 + $0x190] sm:$0xff]  ;;  %v1044_v61 = vld [vmem:[#allocation5 + $0x198] sm:$0xff]  ;;  %v2629_v62 = vpack.c.bf16 %v1012_v59, %v1011_v58  ;;  %v1014_v2 = vld [vmem:[#allocation5 + $0xa8] sm:$0xff] }
  0x8e   : > { %2612 = vmatpush1.bf16.msra.mxu1 %v2611_v24  ;;  %v2677_v63 = vpack.c.bf16 %v1044_v61, %v1043_v60  ;;  %v1045_v3 = vld [vmem:[#allocation5 + $0x1a0] sm:$0xff]  ;;  %v1046_v4 = vld [vmem:[#allocation5 + $0x1a8] sm:$0xff]  ;;  %v2632_v5 = vpack.c.bf16 %v1014_v2, %v1013_v0  ;;  %v1015_v7 = vld [vmem:[#allocation5 + $0xb0] sm:$0xff] }
  0x8f   : > { %2660 = vmatpush1.bf16.msra.mxu0 %v2659_v25  ;;  %2613 = vmatprep.subr.bf16.mxu1 %v3291_v1  ;;  %v2680_v6 = vpack.c.bf16 %v1046_v4, %v1045_v3  ;;  %v1016_v8 = vld [vmem:[#allocation5 + $0xb8] sm:$0xff]  ;;  %v1047_v9 = vld [vmem:[#allocation5 + $0x1b0] sm:$0xff]  ;;  %v1017_v13 = vld [vmem:[#allocation5 + $0xc0] sm:$0xff] }
  0x90   : > { %2661 = vmatprep.subr.bf16.mxu0 %v3291_v1  ;;  %v1048_v10 = vld [vmem:[#allocation5 + $0x1b8] sm:$0xff]  ;;  %v2635_v11 = vpack.c.bf16 %v1016_v8, %v1015_v7  ;;  %v1018_v14 = vld [vmem:[#allocation5 + $0xc8] sm:$0xff]  ;;  %v1049_v15 = vld [vmem:[#allocation5 + $0x1c0] sm:$0xff] }
  0x91   : > { %v2683_v12 = vpack.c.bf16 %v1048_v10, %v1047_v9  ;;  %v1050_v16 = vld [vmem:[#allocation5 + $0x1c8] sm:$0xff]  ;;  %v2638_v17 = vpack.c.bf16 %v1018_v14, %v1017_v13  ;;  %v1019_v19 = vld [vmem:[#allocation5 + $0xd0] sm:$0xff]  ;;  %v1020_v20 = vld [vmem:[#allocation5 + $0xd8] sm:$0xff] }
  0x92   : > { %2615 = vmatpush1.bf16.msra.mxu1 %v2614_v30  ;;  %v2686_v18 = vpack.c.bf16 %v1050_v16, %v1049_v15  ;;  %v1051_v21 = vld [vmem:[#allocation5 + $0x1d0] sm:$0xff]  ;;  %v1052_v22 = vld [vmem:[#allocation5 + $0x1d8] sm:$0xff]  ;;  %v2641_v23 = vpack.c.bf16 %v1020_v20, %v1019_v19  ;;  %v1021_v25 = vld [vmem:[#allocation5 + $0xe0] sm:$0xff] }
  0x93   : > { %2663 = vmatpush1.bf16.msra.mxu0 %v2662_v31  ;;  %2616 = vmatprep.subr.bf16.mxu1 %v3291_v1  ;;  %v2689_v24 = vpack.c.bf16 %v1052_v22, %v1051_v21  ;;  %v1022_v26 = vld [vmem:[#allocation5 + $0xe8] sm:$0xff]  ;;  %v1053_v27 = vld [vmem:[#allocation5 + $0x1e0] sm:$0xff]  ;;  %v1023_v31 = vld [vmem:[#allocation5 + $0xf0] sm:$0xff] }
  0x94   : > { %2664 = vmatprep.subr.bf16.mxu0 %v3291_v1  ;;  %v1054_v28 = vld [vmem:[#allocation5 + $0x1e8] sm:$0xff]  ;;  %v2644_v29 = vpack.c.bf16 %v1022_v26, %v1021_v25  ;;  %v1024_v32 = vld [vmem:[#allocation5 + $0xf8] sm:$0xff]  ;;  %v1055_v33 = vld [vmem:[#allocation5 + $0x1f0] sm:$0xff] }
  0x95   : > { %v2692_v30 = vpack.c.bf16 %v1054_v28, %v1053_v27  ;;  %v1056_v34 = vld [vmem:[#allocation5 + $0x1f8] sm:$0xff]  ;;  %v2647_v35 = vpack.c.bf16 %v1024_v32, %v1023_v31  ;;  %v1090_v38 = vld [vmem:[#allocation5 + $0x308] sm:$0xff]  ;;  %v1057_v39 = vld [vmem:[#allocation5 + $0x200] sm:$0xff] }
  0x96   : > { %2618 = vmatpush1.bf16.msra.mxu1 %v2617_v36  ;;  %v2695_v36 = vpack.c.bf16 %v1056_v34, %v1055_v33  ;;  %v1058_v40 = vld [vmem:[#allocation5 + $0x208] sm:$0xff]  ;;  %v1059_v47 = vld [vmem:[#allocation5 + $0x210] sm:$0xff]  ;;  %v1060_v48 = vld [vmem:[#allocation5 + $0x218] sm:$0xff] }
  0x97   : > { %2666 = vmatpush1.bf16.msra.mxu0 %v2665_v37  ;;  %2619 = vmatprep.subr.bf16.mxu1 %v3291_v1  ;;  %v1089_v37 = vld [vmem:[#allocation5 + $0x300] sm:$0xff]  ;;  %v309_v41 = vld [vmem:[#allocation2 + $0xf] sm:$0xff]  ;;  %v442_v49 = vld [vmem:[#allocation2 + $0x18] sm:$0xff]  ;;  %v2701_v54 = vpack.c.bf16 %v1060_v48, %v1059_v47 }
  0x98   : > { %2667 = vmatprep.subr.bf16.mxu0 %v3291_v1  ;;  %v3508_v43 = vpack.c.bf16 %v1090_v38, %v1089_v37  ;;  %v312_v46 = vld [vmem:[#allocation2 + $0x47] sm:$0xff]  ;;  %v310_v52 = vld [vmem:[#allocation2 + $0x17] sm:$0xff]  ;;  %v3527_v61 = vld [vmem:[#allocation2 + $0x9f] sm:$0xff] }
  0x99   : > { %v3516_v53 = vld [vmem:[#allocation2 + $0x77] sm:$0xff]  ;;  %v3518_v55 = vld [vmem:[#allocation2 + $0x40] sm:$0xff]  ;;  %v1062_v58 = vld [vmem:[#allocation5 + $0x228] sm:$0xff] }
  0x9a   : > { %2621 = vmatpush1.bf16.msra.mxu1 %v2620_v44  ;;  %v3510_v44 = vld [vmem:[#allocation2 + $0x6f] sm:$0xff]  ;;  %v1093_v59 = vld [vmem:[#allocation5 + $0x320] sm:$0xff]  ;;  %v1064_v3 = vld [vmem:[#allocation5 + $0x238] sm:$0xff] }
  0x9b   : > { %2669 = vmatpush1.bf16.msra.mxu0 %v2668_v45  ;;  %2622 = vmatprep.subr.bf16.mxu1 %v3291_v1  ;;  %v2698_v45 = vpack.c.bf16 %v1058_v40, %v1057_v39  ;;  %v1094_v60 = vld [vmem:[#allocation5 + $0x328] sm:$0xff]  ;;  %v1063_v2 = vld [vmem:[#allocation5 + $0x230] sm:$0xff]  ;;  %v1065_v9 = vld [vmem:[#allocation5 + $0x240] sm:$0xff] }
  0x9c   : > { %2670 = vmatprep.subr.bf16.mxu0 %v3291_v1  ;;  %v3533_v0 = vpack.c.bf16 %v1094_v60, %v1093_v59  ;;  %v1095_v4 = vld [vmem:[#allocation5 + $0x330] sm:$0xff]  ;;  %v2707_v7 = vpack.c.bf16 %v1064_v3, %v1063_v2  ;;  %v1066_v10 = vld [vmem:[#allocation5 + $0x248] sm:$0xff]  ;;  %v3554_v15 = vld [vmem:[#allocation2 + $0x78] sm:$0xff] }
  0x9d   : > { %v3542_v8 = vld [vmem:[#allocation2 + $0x70] sm:$0xff]  ;;  %v2710_v14 = vpack.c.bf16 %v1066_v10, %v1065_v9  ;;  %v1100_v20 = vld [vmem:[#allocation5 + $0x358] sm:$0xff]  ;;  %v1069_v25 = vld [vmem:[#allocation5 + $0x260] sm:$0xff] }
  0x9e   : > { %2624 = vmatpush1.bf16.msra.mxu1 %v2623_v50  ;;  %v1091_v50 = vld [vmem:[#allocation5 + $0x310] sm:$0xff]  ;;  %v1070_v26 = vld [vmem:[#allocation5 + $0x268] sm:$0xff]  ;;  %v1101_v27 = vld [vmem:[#allocation5 + $0x360] sm:$0xff] }
  0x9f   : > { %2672 = vmatpush1.bf16.msra.mxu0 %v2671_v51  ;;  %2625 = vmatprep.subr.bf16.mxu1 %v3291_v1  ;;  %v1092_v51 = vld [vmem:[#allocation5 + $0x318] sm:$0xff]  ;;  %v3552_v13 = vld [vmem:[#allocation2 + $0xcf] sm:$0xff]  ;;  %v3591_v37 = vld [vmem:[#allocation2 + $0x107] sm:$0xff] }
  0xa0   : > { %2673 = vmatprep.subr.bf16.mxu0 %v3291_v1  ;;  %v1099_v19 = vld [vmem:[#allocation5 + $0x350] sm:$0xff]  ;;  %v1102_v28 = vld [vmem:[#allocation5 + $0x368] sm:$0xff]  ;;  %v1072_v34 = vld [vmem:[#allocation5 + $0x278] sm:$0xff] }
  0xa1   : > { %v3565_v21 = vld [vmem:[#allocation2 + $0xd7] sm:$0xff]  ;;  %v3580_v31 = vld [vmem:[#allocation2 + $0xa8] sm:$0xff]  ;;  %v3584_v32 = vpack.c.bf16 %v1102_v28, %v1101_v27  ;;  %v3619_v59 = vld [vmem:[#allocation2 + $0x100] sm:$0xff] }
  0xa2   : > { %2627 = vmatpush1.bf16.msra.mxu1 %v2626_v56  ;;  %v3521_v56 = vpack.c.bf16 %v1092_v51, %v1091_v50  ;;  %v1071_v33 = vld [vmem:[#allocation5 + $0x270] sm:$0xff]  ;;  %v1109_v2 = vld [vmem:[#allocation5 + $0x3a0] sm:$0xff]  ;;  %v1110_v3 = vld [vmem:[#allocation5 + $0x3a8] sm:$0xff] }
  0xa3   : > { %2675 = vmatpush1.bf16.msra.mxu0 %v2674_v57  ;;  %2628 = vmatprep.subr.bf16.mxu1 %v3291_v1  ;;  %v1061_v57 = vld [vmem:[#allocation5 + $0x220] sm:$0xff]  ;;  %v2719_v38 = vpack.c.bf16 %v1072_v34, %v1071_v33  ;;  %v3593_v39 = vld [vmem:[#allocation2 + $0xd0] sm:$0xff]  ;;  %v1080_v10 = vld [vmem:[#allocation5 + $0x2b8] sm:$0xff] }
  0xa4   : > { %2676 = vmatprep.subr.bf16.mxu0 %v3291_v1  ;;  %v3604_v47 = vld [vmem:[#allocation2 + $0x12f] sm:$0xff]  ;;  %v3658_v27 = vld [vmem:[#allocation2 + $0x138] sm:$0xff] }
  0xa5   : > { %v1075_v51 = vld [vmem:[#allocation5 + $0x290] sm:$0xff]  ;;  %v1116_v34 = vld [vmem:[#allocation5 + $0x3d8] sm:$0xff] }
  0xa6   : > { %2630 = vmatpush1.bf16.msra.mxu1 %v2629_v62  ;;  %v2704_v62 = vpack.c.bf16 %v1062_v58, %v1061_v57  ;;  %v3617_v57 = vld [vmem:[#allocation2 + $0x137] sm:$0xff] }
  0xa7   : > { %2678 = vmatpush1.bf16.msra.mxu0 %v2677_v63  ;;  %2631 = vmatprep.subr.bf16.mxu1 %v3291_v1  ;;  %v3530_v63 = vld [vmem:[#allocation2 + $0x48] sm:$0xff]  ;;  %v1079_v9 = vld [vmem:[#allocation5 + $0x2b0] sm:$0xff] }
  0xa8   : > { %2679 = vmatprep.subr.bf16.mxu0 %v3291_v1  ;;  %v1115_v33 = vld [vmem:[#allocation5 + $0x3d0] sm:$0xff] }
  0xaa   : > { %2633 = vmatpush1.bf16.msra.mxu1 %v2632_v5  ;;  %v1096_v5 = vld [vmem:[#allocation5 + $0x338] sm:$0xff] }
  0xab   : > { %2681 = vmatpush1.bf16.msra.mxu0 %v2680_v6  ;;  %2634 = vmatprep.subr.bf16.mxu1 %v3291_v1  ;;  %v3540_v6 = vld [vmem:[#allocation2 + $0xa7] sm:$0xff] }
  0xac   : > { %2682 = vmatprep.subr.bf16.mxu0 %v3291_v1 }
  0xae   : > { %2636 = vmatpush1.bf16.msra.mxu1 %v2635_v11  ;;  %v1097_v11 = vld [vmem:[#allocation5 + $0x340] sm:$0xff] }
  0xaf   : > { %2684 = vmatpush1.bf16.msra.mxu0 %v2683_v12  ;;  %2637 = vmatprep.subr.bf16.mxu1 %v3291_v1  ;;  %v1098_v12 = vld [vmem:[#allocation5 + $0x348] sm:$0xff] }
  0xb0   : > { %2685 = vmatprep.subr.bf16.mxu0 %v3291_v1  ;;  %v3558_v16 = vpack.c.bf16 %v1098_v12, %v1097_v11  ;;  %v1111_v11 = vld [vmem:[#allocation5 + $0x3b0] sm:$0xff]  ;;  %v1112_v12 = vld [vmem:[#allocation5 + $0x3b8] sm:$0xff] }
  0xb2   : > { %2639 = vmatpush1.bf16.msra.mxu1 %v2638_v17  ;;  %v1067_v17 = vld [vmem:[#allocation5 + $0x250] sm:$0xff] }
  0xb3   : > { %2687 = vmatpush1.bf16.msra.mxu0 %v2686_v18  ;;  %2640 = vmatprep.subr.bf16.mxu1 %v3291_v1  ;;  %v1068_v18 = vld [vmem:[#allocation5 + $0x258] sm:$0xff] }
  0xb4   : > { %2688 = vmatprep.subr.bf16.mxu0 %v3291_v1  ;;  %v2713_v22 = vpack.c.bf16 %v1068_v18, %v1067_v17  ;;  %v3645_v17 = vld [vmem:[#allocation2 + $0x130] sm:$0xff]  ;;  %v3649_v18 = vpack.c.bf16 %v1112_v12, %v1111_v11  ;;  %v3699_v11 = vld [vmem:[#allocation2 + $0x198] sm:$0xff] }
  0xb5   : > { %v330_v12 = vld [vmem:[#allocation2 + $0x1f7] sm:$0xff] }
  0xb6   : > { %2642 = vmatpush1.bf16.msra.mxu1 %v2641_v23  ;;  %v3567_v23 = vld [vmem:[#allocation2 + $0xa0] sm:$0xff] }
  0xb7   : > { %2690 = vmatpush1.bf16.msra.mxu0 %v2689_v24  ;;  %2643 = vmatprep.subr.bf16.mxu1 %v3291_v1  ;;  %v3571_v24 = vpack.c.bf16 %v1100_v20, %v1099_v19  ;;  %v1081_v19 = vld [vmem:[#allocation5 + $0x2c0] sm:$0xff]  ;;  %v1082_v20 = vld [vmem:[#allocation5 + $0x2c8] sm:$0xff] }
  0xb8   : > { %2691 = vmatprep.subr.bf16.mxu0 %v3291_v1 }
  0xba   : > { %2645 = vmatpush1.bf16.msra.mxu1 %v2644_v29  ;;  %v3578_v29 = vld [vmem:[#allocation2 + $0xff] sm:$0xff] }
  0xbb   : > { %2693 = vmatpush1.bf16.msra.mxu0 %v2692_v30  ;;  %2646 = vmatprep.subr.bf16.mxu1 %v3291_v1  ;;  %v2716_v30 = vpack.c.bf16 %v1070_v26, %v1069_v25  ;;  %v3656_v25 = vld [vmem:[#allocation2 + $0x18f] sm:$0xff]  ;;  %v2734_v26 = vpack.c.bf16 %v1082_v20, %v1081_v19  ;;  %v332_v20 = vld [vmem:[#allocation2 + $0x227] sm:$0xff] }
  0xbc   : > { %2694 = vmatprep.subr.bf16.mxu0 %v3291_v1  ;;  %v3709_v19 = vld [vmem:[#allocation2 + $0x1c8] sm:$0xff] }
  0xbe   : > { %2648 = vmatpush1.bf16.msra.mxu1 %v2647_v35  ;;  %v1103_v35 = vld [vmem:[#allocation5 + $0x370] sm:$0xff] }
  0xbf   : > { %2696 = vmatpush1.bf16.msra.mxu0 %v2695_v36  ;;  %2825 = vmatprep.subr.bf16.mxu1 %v3291_v1  ;;  %v1104_v36 = vld [vmem:[#allocation5 + $0x378] sm:$0xff] }
  0xc0   : > { %2697 = vmatprep.subr.bf16.mxu0 %v3291_v1  ;;  %v3597_v40 = vpack.c.bf16 %v1104_v36, %v1103_v35  ;;  %v326_v35 = vld [vmem:[#allocation2 + $0x197] sm:$0xff] }
  0xc1   : > { %1209 = vmatmul.mubr.f32.vlgmr.msra.gmra.mrb[0].mxu1 %v309_v41  ;;  %v1073_v41 = vld [vmem:[#allocation5 + $0x280] sm:$0xff] }
  0xc2   : > { %1434 = vmatmul.mubr.f32.vlgmr.msra.gmra.mrb[0].mxu0 %v3510_v44  ;;  %2841 = vmatpush1.bf16.msra.mxu1 %v3508_v43 }
  0xc3   : > { %2699 = vmatpush1.bf16.msra.mxu0 %v2698_v45  ;;  %1213 = vmatprep.mubr.f32.mxu1 %v312_v46  ;;  %v1105_v45 = vld [vmem:[#allocation5 + $0x380] sm:$0xff] }
  0xc4   : > { %1438 = vmatprep.mubr.f32.mxu0 %v442_v49  ;;  %2700 = vmatprep.subr.bf16.mxu0 %v3291_v1  ;;  %v3606_v49 = vld [vmem:[#allocation2 + $0xd8] sm:$0xff] }
  0xc5   : > { %1214 = vmatmul.mubr.f32.gmra.mrb[2].mxu1 %v310_v52  ;;  %2826 = vmatprep.subr.bf16.mxu1 %v3291_v1  ;;  %v1076_v52 = vld [vmem:[#allocation5 + $0x298] sm:$0xff] }
  0xc6   : > { %1439 = vmatmul.mubr.f32.gmra.mrb[2].mxu0 %v3516_v53  ;;  %1218 = vmatprep.mubr.f32.mxu1 %v3510_v44  ;;  %v2725_v58 = vpack.c.bf16 %v1076_v52, %v1075_v51  ;;  %v3679_v51 = vld [vmem:[#allocation2 + $0x168] sm:$0xff] }
  0xc7   : > { %1443 = vmatprep.mubr.f32.mxu0 %v3518_v55  ;;  %2702 = vmatpush1.bf16.msra.mxu0 %v2701_v54  ;;  %v1108_v54 = vld [vmem:[#allocation5 + $0x398] sm:$0xff] }
  0xc8   : > { %2842 = vmatpush1.bf16.msra.mxu1 %v3521_v56  ;;  %2703 = vmatprep.subr.bf16.mxu0 %v3291_v1 }
  0xc9   : > { %1219 = vmatmul.mubr.f32.gmra.mrb[4].mxu1 %v3485_v42  ;;  %2827 = vmatprep.subr.bf16.mxu1 %v3291_v1  ;;  %v3546_v42 = vpack.c.bf16 %v1096_v5, %v1095_v4  ;;  %v3630_v4 = vld [vmem:[#allocation2 + $0x15f] sm:$0xff] }
  0xca   : > { %1444 = vmatmul.mubr.f32.gmra.mrb[4].mxu0 %v3527_v61  ;;  %1223 = vmatprep.mubr.f32.mxu1 %v3516_v53 }
  0xcb   : > { %1448 = vmatprep.mubr.f32.mxu0 %v3530_v63  ;;  %2705 = vmatpush1.bf16.msra.mxu0 %v2704_v62  ;;  %v1078_v62 = vld [vmem:[#allocation5 + $0x2a8] sm:$0xff] }
  0xcc   : > { %2843 = vmatpush1.bf16.msra.mxu1 %v3533_v0  ;;  %2706 = vmatprep.subr.bf16.mxu0 %v3291_v1 }
  0xcd   : > { %1224 = vmatmul.mubr.f32.gmra.mrb[6].mxu1 %v312_v46  ;;  %2828 = vmatprep.subr.bf16.mxu1 %v3291_v1  ;;  %v1106_v46 = vld [vmem:[#allocation5 + $0x388] sm:$0xff] }
  0xce   : > { %1449 = vmatmul.mubr.f32.gmra.mrb[6].mxu0 %v3540_v6  ;;  %1228 = vmatprep.mubr.f32.mxu1 %v3527_v61  ;;  %v3610_v50 = vpack.c.bf16 %v1106_v46, %v1105_v45  ;;  %v1117_v45 = vld [vmem:[#allocation5 + $0x3e0] sm:$0xff]  ;;  %v1118_v46 = vld [vmem:[#allocation5 + $0x3e8] sm:$0xff] }
  0xcf   : > { %1453 = vmatprep.mubr.f32.mxu0 %v3542_v8  ;;  %2708 = vmatpush1.bf16.msra.mxu0 %v2707_v7  ;;  %v3636_v7 = vpack.c.bf16 %v1110_v3, %v1109_v2  ;;  %v3683_v52 = vpack.c.bf16 %v1118_v46, %v1117_v45  ;;  %v328_v2 = vld [vmem:[#allocation2 + $0x1c7] sm:$0xff]  ;;  %v339_v46 = vld [vmem:[#allocation2 + $0x2df] sm:$0xff] }
  0xd0   : > { %2844 = vmatpush1.bf16.msra.mxu1 %v3546_v42  ;;  %2709 = vmatprep.subr.bf16.mxu0 %v3291_v1  ;;  %v3730_v45 = vld [vmem:[#allocation2 + $0x280] sm:$0xff] }
  0xd1   : > { %1229 = vmatmul.mubr.f32.gmra.mrb[8].mxu1 %v3510_v44  ;;  %2829 = vmatprep.subr.bf16.mxu1 %v3291_v1  ;;  %v1074_v44 = vld [vmem:[#allocation5 + $0x288] sm:$0xff] }
  0xd2   : > { %1454 = vmatmul.mubr.f32.gmra.mrb[8].mxu0 %v3552_v13  ;;  %1233 = vmatprep.mubr.f32.mxu1 %v3540_v6  ;;  %v2722_v48 = vpack.c.bf16 %v1074_v44, %v1073_v41  ;;  %v1085_v41 = vld [vmem:[#allocation5 + $0x2e0] sm:$0xff]  ;;  %v1086_v44 = vld [vmem:[#allocation5 + $0x2e8] sm:$0xff] }
  0xd3   : > { %1458 = vmatprep.mubr.f32.mxu0 %v3554_v15  ;;  %2711 = vmatpush1.bf16.msra.mxu0 %v2710_v14  ;;  %v2731_v14 = vpack.c.bf16 %v1080_v10, %v1079_v9  ;;  %v329_v10 = vld [vmem:[#allocation2 + $0x1ef] sm:$0xff] }
  0xd4   : > { %2845 = vmatpush1.bf16.msra.mxu1 %v3558_v16  ;;  %2712 = vmatprep.subr.bf16.mxu0 %v3291_v1 }
  0xd5   : > { %1234 = vmatmul.mubr.f32.gmra.mrb[10].mxu1 %v3516_v53  ;;  %2830 = vmatprep.subr.bf16.mxu1 %v3291_v1  ;;  %v1107_v53 = vld [vmem:[#allocation5 + $0x390] sm:$0xff] }
  0xd6   : > { %1459 = vmatmul.mubr.f32.gmra.mrb[10].mxu0 %v3565_v21  ;;  %1238 = vmatprep.mubr.f32.mxu1 %v3552_v13  ;;  %v3623_v60 = vpack.c.bf16 %v1108_v54, %v1107_v53  ;;  %v1087_v53 = vld [vmem:[#allocation5 + $0x2f0] sm:$0xff]  ;;  %v1088_v54 = vld [vmem:[#allocation5 + $0x2f8] sm:$0xff] }
  0xd7   : > { %1463 = vmatprep.mubr.f32.mxu0 %v3567_v23  ;;  %2714 = vmatpush1.bf16.msra.mxu0 %v2713_v22  ;;  %v1114_v22 = vld [vmem:[#allocation5 + $0x3c8] sm:$0xff]  ;;  %v2743_v3 = vpack.c.bf16 %v1088_v54, %v1087_v53  ;;  %v3736_v53 = vld [vmem:[#allocation2 + $0x2b0] sm:$0xff] }
  0xd8   : > { %2846 = vmatpush1.bf16.msra.mxu1 %v3571_v24  ;;  %2715 = vmatprep.subr.bf16.mxu0 %v3291_v1  ;;  %v341_v54 = vld [vmem:[#allocation2 + $0x30f] sm:$0xff] }
  0xd9   : > { %1239 = vmatmul.mubr.f32.gmra.mrb[12].mxu1 %v3527_v61  ;;  %2831 = vmatprep.subr.bf16.mxu1 %v3291_v1  ;;  %v1077_v61 = vld [vmem:[#allocation5 + $0x2a0] sm:$0xff] }
  0xda   : > { %1464 = vmatmul.mubr.f32.gmra.mrb[12].mxu0 %v3578_v29  ;;  %1243 = vmatprep.mubr.f32.mxu1 %v3565_v21  ;;  %v2728_v5 = vpack.c.bf16 %v1078_v62, %v1077_v61  ;;  %v1121_v61 = vld [vmem:[#allocation5 + $0x400] sm:$0xff]  ;;  %v1122_v62 = vld [vmem:[#allocation5 + $0x408] sm:$0xff] }
  0xdb   : > { %1468 = vmatprep.mubr.f32.mxu0 %v3580_v31  ;;  %2717 = vmatpush1.bf16.msra.mxu0 %v2716_v30  ;;  %v1084_v30 = vld [vmem:[#allocation5 + $0x2d8] sm:$0xff]  ;;  %v3696_v9 = vpack.c.bf16 %v1122_v62, %v1121_v61  ;;  %v3742_v61 = vld [vmem:[#allocation2 + $0x2e0] sm:$0xff] }
  0xdc   : > { %2847 = vmatpush1.bf16.msra.mxu1 %v3584_v32  ;;  %2718 = vmatprep.subr.bf16.mxu0 %v3291_v1  ;;  %v343_v62 = vld [vmem:[#allocation2 + $0x33f] sm:$0xff] }
  0xdd   : > { %1244 = vmatmul.mubr.f32.gmra.mrb[14].mxu1 %v3540_v6  ;;  %2832 = vmatprep.subr.bf16.mxu1 %v3291_v1  ;;  %v3632_v6 = vld [vmem:[#allocation2 + $0x108] sm:$0xff] }
  0xde   : > { %1469 = vmatmul.mubr.f32.gmra.mrb[14].mxu0 %v3591_v37  ;;  %1248 = vmatprep.mubr.f32.mxu1 %v3578_v29 }
  0xdf   : > { %1473 = vmatprep.mubr.f32.mxu0 %v3593_v39  ;;  %2720 = vmatpush1.bf16.msra.mxu0 %v2719_v38  ;;  %v3673_v38 = vpack.c.bf16 %v1116_v34, %v1115_v33  ;;  %v3721_v33 = vld [vmem:[#allocation2 + $0x228] sm:$0xff] }
  0xe0   : > { %2848 = vmatpush1.bf16.msra.mxu1 %v3597_v40  ;;  %2721 = vmatprep.subr.bf16.mxu0 %v3291_v1  ;;  %v336_v34 = vld [vmem:[#allocation2 + $0x287] sm:$0xff] }
  0xe1   : > { %1249 = vmatmul.mubr.f32.gmra.mrb[16].mxu1 %v3552_v13  ;;  %2833 = vmatprep.subr.bf16.mxu1 %v3291_v1  ;;  %v3643_v13 = vld [vmem:[#allocation2 + $0x167] sm:$0xff] }
  0xe2   : > { %1474 = vmatmul.mubr.f32.gmra.mrb[16].mxu0 %v3604_v47  ;;  %1253 = vmatprep.mubr.f32.mxu1 %v3591_v37 }
  0xe3   : > { %1478 = vmatprep.mubr.f32.mxu0 %v3606_v49  ;;  %2723 = vmatpush1.bf16.msra.mxu0 %v2722_v48  ;;  %v2740_v48 = vpack.c.bf16 %v1086_v44, %v1085_v41  ;;  %v3727_v41 = vld [vmem:[#allocation2 + $0x258] sm:$0xff] }
  0xe4   : > { %2849 = vmatpush1.bf16.msra.mxu1 %v3610_v50  ;;  %2724 = vmatprep.subr.bf16.mxu0 %v3291_v1  ;;  %v338_v44 = vld [vmem:[#allocation2 + $0x2b7] sm:$0xff] }
  0xe5   : > { %1254 = vmatmul.mubr.f32.gmra.mrb[18].mxu1 %v3565_v21  ;;  %2834 = vmatprep.subr.bf16.mxu1 %v3291_v1  ;;  %v1113_v21 = vld [vmem:[#allocation5 + $0x3c0] sm:$0xff] }
  0xe6   : > { %1479 = vmatmul.mubr.f32.gmra.mrb[18].mxu0 %v3617_v57  ;;  %1258 = vmatprep.mubr.f32.mxu1 %v3604_v47  ;;  %v3662_v28 = vpack.c.bf16 %v1114_v22, %v1113_v21  ;;  %v3712_v21 = vld [vmem:[#allocation2 + $0x1f0] sm:$0xff] }
  0xe7   : > { %1483 = vmatprep.mubr.f32.mxu0 %v3619_v59  ;;  %2726 = vmatpush1.bf16.msra.mxu0 %v2725_v58  ;;  %v1120_v58 = vld [vmem:[#allocation5 + $0x3f8] sm:$0xff]  ;;  %v333_v22 = vld [vmem:[#allocation2 + $0x24f] sm:$0xff] }
  0xe8   : > { %2850 = vmatpush1.bf16.msra.mxu1 %v3623_v60  ;;  %2727 = vmatprep.subr.bf16.mxu0 %v3291_v1 }
  0xe9   : > { %1259 = vmatmul.mubr.f32.gmra.mrb[20].mxu1 %v3578_v29  ;;  %2835 = vmatprep.subr.bf16.mxu1 %v3291_v1  ;;  %v1083_v29 = vld [vmem:[#allocation5 + $0x2d0] sm:$0xff] }
  0xea   : > { %1484 = vmatmul.mubr.f32.gmra.mrb[20].mxu0 %v3630_v4  ;;  %1263 = vmatprep.mubr.f32.mxu1 %v3617_v57  ;;  %v2737_v36 = vpack.c.bf16 %v1084_v30, %v1083_v29  ;;  %v3718_v29 = vld [vmem:[#allocation2 + $0x220] sm:$0xff] }
  0xeb   : > { %1488 = vmatprep.mubr.f32.mxu0 %v3632_v6  ;;  %2729 = vmatpush1.bf16.msra.mxu0 %v2728_v5  ;;  %v3688_v5 = vld [vmem:[#allocation2 + $0x190] sm:$0xff]  ;;  %v335_v30 = vld [vmem:[#allocation2 + $0x27f] sm:$0xff] }
  0xec   : > { %2851 = vmatpush1.bf16.msra.mxu1 %v3636_v7  ;;  %2730 = vmatprep.subr.bf16.mxu0 %v3291_v1 }
  0xed   : > { %1264 = vmatmul.mubr.f32.gmra.mrb[22].mxu1 %v3591_v37  ;;  %2836 = vmatprep.subr.bf16.mxu1 %v3291_v1  ;;  %v3669_v37 = vld [vmem:[#allocation2 + $0x160] sm:$0xff] }
  0xee   : > { %1489 = vmatmul.mubr.f32.gmra.mrb[22].mxu0 %v3643_v13  ;;  %1268 = vmatprep.mubr.f32.mxu1 %v3630_v4 }
  0xef   : > { %1493 = vmatprep.mubr.f32.mxu0 %v3645_v17  ;;  %2732 = vmatpush1.bf16.msra.mxu0 %v2731_v14  ;;  %v331_v14 = vld [vmem:[#allocation2 + $0x21f] sm:$0xff] }
  0xf0   : > { %2852 = vmatpush1.bf16.msra.mxu1 %v3649_v18  ;;  %2733 = vmatprep.subr.bf16.mxu0 %v3291_v1 }
  0xf1   : > { %1269 = vmatmul.mubr.f32.gmra.mrb[24].mxu1 %v3604_v47  ;;  %2837 = vmatprep.subr.bf16.mxu1 %v3291_v1  ;;  %v327_v47 = vld [vmem:[#allocation2 + $0x1bf] sm:$0xff] }
  0xf2   : > { %1494 = vmatmul.mubr.f32.gmra.mrb[24].mxu0 %v3656_v25  ;;  %1273 = vmatprep.mubr.f32.mxu1 %v3643_v13 }
  0xf3   : > { %1498 = vmatprep.mubr.f32.mxu0 %v3658_v27  ;;  %2735 = vmatpush1.bf16.msra.mxu0 %v2734_v26  ;;  %v334_v26 = vld [vmem:[#allocation2 + $0x257] sm:$0xff] }
  0xf4   : > { %2853 = vmatpush1.bf16.msra.mxu1 %v3662_v28  ;;  %2736 = vmatprep.subr.bf16.mxu0 %v3291_v1 }
  0xf5   : > { %1274 = vmatmul.mubr.f32.gmra.mrb[26].mxu1 %v3617_v57  ;;  %2838 = vmatprep.subr.bf16.mxu1 %v3291_v1  ;;  %v1119_v57 = vld [vmem:[#allocation5 + $0x3f0] sm:$0xff] }
  0xf6   : > { %1499 = vmatmul.mubr.f32.gmra.mrb[26].mxu0 %v326_v35  ;;  %1278 = vmatprep.mubr.f32.mxu1 %v3656_v25 }
  0xf7   : > { %1503 = vmatprep.mubr.f32.mxu0 %v3669_v37  ;;  %2738 = vmatpush1.bf16.msra.mxu0 %v2737_v36  ;;  %v337_v36 = vld [vmem:[#allocation2 + $0x2af] sm:$0xff] }
  0xf8   : > { %2854 = vmatpush1.bf16.msra.mxu1 %v3673_v38  ;;  %2739 = vmatprep.subr.bf16.mxu0 %v3291_v1 }
  0xf9   : > { %1279 = vmatmul.mubr.f32.gmra.mrb[28].mxu1 %v3630_v4  ;;  %2839 = vmatprep.subr.bf16.mxu1 %v3291_v1  ;;  %v3692_v4 = vpack.c.bf16 %v1120_v58, %v1119_v57  ;;  %v3739_v57 = vld [vmem:[#allocation2 + $0x2b8] sm:$0xff] }
  0xfa   : > { %1504 = vmatmul.mubr.f32.gmra.mrb[28].mxu0 %v327_v47  ;;  %1283 = vmatprep.mubr.f32.mxu1 %v326_v35  ;;  %v342_v58 = vld [vmem:[#allocation2 + $0x317] sm:$0xff] }
  0xfb   : > { %1508 = vmatprep.mubr.f32.mxu0 %v3679_v51  ;;  %2741 = vmatpush1.bf16.msra.mxu0 %v2740_v48  ;;  %v340_v48 = vld [vmem:[#allocation2 + $0x2e7] sm:$0xff] }
  0xfc   : > { %2855 = vmatpush1.bf16.msra.mxu1 %v3683_v52  ;;  %2742 = vmatprep.subr.bf16.mxu0 %v3291_v1 }
  0xfd   : > { %1284 = vmatmul.mubr.f32.gmra.mrb[30].mxu1 %v3643_v13  ;;  %2840 = vmatprep.subr.bf16.mxu1 %v3291_v1  ;;  %v3706_v13 = vld [vmem:[#allocation2 + $0x1c0] sm:$0xff] }
  0xfe   : > { %1509 = vmatmul.mubr.f32.gmra.mrb[30].mxu0 %v328_v2  ;;  %1288 = vmatprep.mubr.f32.mxu1 %v327_v47 }
  0xff   : > { %1513 = vmatprep.mubr.f32.mxu0 %v3688_v5  ;;  %2744 = vmatpush1.bf16.msra.mxu0 %v2743_v3  ;;  %v344_v3 = vld [vmem:[#allocation2 + $0x347] sm:$0xff] }
 0x100   : > { %2856 = vmatpush1.bf16.msra.mxu1 %v3692_v4  ;;  %2745 = vmatprep.subr.bf16.mxu0 %v3291_v1 }
 0x101   : > { %1289 = vmatmul.mubr.f32.gmra.mrb[32].mxu1 %v3656_v25  ;;  %2794 = vmatprep.subr.bf16.mxu1 %v3696_v9  ;;  %v3715_v25 = vld [vmem:[#allocation2 + $0x1f8] sm:$0xff] }
 0x102   : > { %1514 = vmatmul.mubr.f32.gmra.mrb[32].mxu0 %v329_v10  ;;  %1293 = vmatprep.mubr.f32.mxu1 %v328_v2 }
 0x103   : > { %1518 = vmatprep.mubr.f32.mxu0 %v3699_v11 }
 0x105   : > { %1294 = vmatmul.mubr.f32.gmra.mrb[34].mxu1 %v326_v35  ;;  %v3724_v35 = vld [vmem:[#allocation2 + $0x250] sm:$0xff] }
 0x106   : > { %1519 = vmatmul.mubr.f32.gmra.mrb[34].mxu0 %v330_v12  ;;  %1298 = vmatprep.mubr.f32.mxu1 %v329_v10 }
 0x107   : > { %1523 = vmatprep.mubr.f32.mxu0 %v3706_v13 }
 0x109   : > { %1299 = vmatmul.mubr.f32.gmra.mrb[36].mxu1 %v327_v47  ;;  %v3733_v47 = vld [vmem:[#allocation2 + $0x288] sm:$0xff] }
 0x10a   : > { %1524 = vmatmul.mubr.f32.gmra.mrb[36].mxu0 %v331_v14  ;;  %1303 = vmatprep.mubr.f32.mxu1 %v330_v12 }
 0x10b   : > { %1528 = vmatprep.mubr.f32.mxu0 %v3709_v19 }
 0x10d   : > { %1304 = vmatmul.mubr.f32.gmra.mrb[38].mxu1 %v328_v2  ;;  %v3745_v2 = vld [vmem:[#allocation2 + $0x2e8] sm:$0xff] }
 0x10e   : > { %1529 = vmatmul.mubr.f32.gmra.mrb[38].mxu0 %v332_v20  ;;  %1308 = vmatprep.mubr.f32.mxu1 %v331_v14 }
 0x10f   : > { %1533 = vmatprep.mubr.f32.mxu0 %v3712_v21 }
 0x111   : > { %1309 = vmatmul.mubr.f32.gmra.mrb[40].mxu1 %v329_v10  ;;  %v3748_v10 = vld [vmem:[#allocation2 + $0x101] sm:$0xff] }
 0x112   : > { %1534 = vmatmul.mubr.f32.gmra.mrb[40].mxu0 %v333_v22  ;;  %1313 = vmatprep.mubr.f32.mxu1 %v332_v20 }
 0x113   : > { %1538 = vmatprep.mubr.f32.mxu0 %v3715_v25 }
 0x115   : > { %1314 = vmatmul.mubr.f32.gmra.mrb[42].mxu1 %v330_v12  ;;  %v3751_v12 = vld [vmem:[#allocation2 + $0xd1] sm:$0xff] }
 0x116   : > { %1539 = vmatmul.mubr.f32.gmra.mrb[42].mxu0 %v334_v26  ;;  %1318 = vmatprep.mubr.f32.mxu1 %v333_v22 }
 0x117   : > { %1543 = vmatprep.mubr.f32.mxu0 %v3718_v29 }
 0x119   : > { %1319 = vmatmul.mubr.f32.gmra.mrb[44].mxu1 %v331_v14  ;;  %v1123_v14 = vld [vmem:[#allocation5 + $0x410] sm:$0xff] }
 0x11a   : > { %1544 = vmatmul.mubr.f32.gmra.mrb[44].mxu0 %v335_v30  ;;  %1323 = vmatprep.mubr.f32.mxu1 %v334_v26 }
 0x11b   : > { %1548 = vmatprep.mubr.f32.mxu0 %v3721_v33 }
 0x11d   : > { %1324 = vmatmul.mubr.f32.gmra.mrb[46].mxu1 %v332_v20  ;;  %v1124_v20 = vld [vmem:[#allocation5 + $0x418] sm:$0xff] }
 0x11e   : > { %1549 = vmatmul.mubr.f32.gmra.mrb[46].mxu0 %v336_v34  ;;  %1328 = vmatprep.mubr.f32.mxu1 %v335_v30 }
 0x11f   : > { %1553 = vmatprep.mubr.f32.mxu0 %v3724_v35 }
 0x121   : > { %1329 = vmatmul.mubr.f32.gmra.mrb[48].mxu1 %v333_v22  ;;  %v3755_v22 = vld [vmem:[#allocation2 + $0x109] sm:$0xff] }
 0x122   : > { %1554 = vmatmul.mubr.f32.gmra.mrb[48].mxu0 %v337_v36  ;;  %1333 = vmatprep.mubr.f32.mxu1 %v336_v34 }
 0x123   : > { %1558 = vmatprep.mubr.f32.mxu0 %v3727_v41 }
 0x125   : > { %1334 = vmatmul.mubr.f32.gmra.mrb[50].mxu1 %v334_v26  ;;  %v2797_v26 = vpack.c.bf16 %v1124_v20, %v1123_v14  ;;  %v1134_v14 = vld [vmem:[#allocation5 + $0x468] sm:$0xff]  ;;  %v3795_v20 = vld [vmem:[#allocation2 + $0x191] sm:$0xff] }
 0x126   : > { %1559 = vmatmul.mubr.f32.gmra.mrb[50].mxu0 %v338_v44  ;;  %1338 = vmatprep.mubr.f32.mxu1 %v337_v36 }
 0x127   : > { %1563 = vmatprep.mubr.f32.mxu0 %v3730_v45 }
 0x129   : > { %1339 = vmatmul.mubr.f32.gmra.mrb[52].mxu1 %v335_v30  ;;  %v3759_v30 = vld [vmem:[#allocation2 + $0xd9] sm:$0xff] }
 0x12a   : > { %1564 = vmatmul.mubr.f32.gmra.mrb[52].mxu0 %v339_v46  ;;  %1343 = vmatprep.mubr.f32.mxu1 %v338_v44 }
 0x12b   : > { %1568 = vmatprep.mubr.f32.mxu0 %v3733_v47 }
 0x12d   : > { %1344 = vmatmul.mubr.f32.gmra.mrb[54].mxu1 %v336_v34  ;;  %v1125_v34 = vld [vmem:[#allocation5 + $0x420] sm:$0xff] }
 0x12e   : > { %1569 = vmatmul.mubr.f32.gmra.mrb[54].mxu0 %v340_v48  ;;  %1348 = vmatprep.mubr.f32.mxu1 %v339_v46 }
 0x12f   : > { %1573 = vmatprep.mubr.f32.mxu0 %v3736_v53 }
 0x131   : > { %1349 = vmatmul.mubr.f32.gmra.mrb[56].mxu1 %v337_v36  ;;  %v1126_v36 = vld [vmem:[#allocation5 + $0x428] sm:$0xff] }
 0x132   : > { %1574 = vmatmul.mubr.f32.gmra.mrb[56].mxu0 %v341_v54  ;;  %1353 = vmatprep.mubr.f32.mxu1 %v340_v48 }
 0x133   : > { %1578 = vmatprep.mubr.f32.mxu0 %v3739_v57 }
 0x135   : > { %1354 = vmatmul.mubr.f32.gmra.mrb[58].mxu1 %v338_v44  ;;  %v3763_v44 = vld [vmem:[#allocation2 + $0x131] sm:$0xff] }
 0x136   : > { %1579 = vmatmul.mubr.f32.gmra.mrb[58].mxu0 %v342_v58  ;;  %1358 = vmatprep.mubr.f32.mxu1 %v341_v54  ;;  %v1130_v54 = vld [vmem:[#allocation5 + $0x448] sm:$0xff] }
 0x137   : > { %1583 = vmatprep.mubr.f32.mxu0 %v3742_v61 }
 0x139   : > { %1359 = vmatmul.mubr.f32.gmra.mrb[60].mxu1 %v339_v46  ;;  %v1128_v46 = vld [vmem:[#allocation5 + $0x438] sm:$0xff] }
 0x13a   : > { %1584 = vmatmul.mubr.f32.gmra.mrb[60].mxu0 %v343_v62  ;;  %1363 = vmatprep.mubr.f32.mxu1 %v342_v58  ;;  %v3779_v58 = vld [vmem:[#allocation2 + $0x161] sm:$0xff]  ;;  %v1132_v62 = vld [vmem:[#allocation5 + $0x458] sm:$0xff] }
 0x13b   : > { %1588 = vmatprep.mubr.f32.mxu0 %v3745_v2 }
 0x13d   : > { %1364 = vmatmul.mubr.f32.gmra.mrb[62].mxu1 %v340_v48 }
 0x13e   : > { %1589 = vmatmul.mubr.f32.gmra.mrb[62].mxu0 %v344_v3  ;;  %1923 = vmatprep.mubr.f32.mxu1 %v3748_v10  ;;  %v3787_v3 = vld [vmem:[#allocation2 + $0x169] sm:$0xff] }
 0x13f   : > { %1658 = vmatprep.mubr.f32.mxu0 %v3542_v8 }
 0x141   : > { %1924 = vmatmul.mubr.f32.vlgmr.msra.gmra.mrb[64].mxu1 %v3751_v12 }
 0x142   : > { %1659 = vmatmul.mubr.f32.vlgmr.msra.gmra.mrb[0].mxu0 %v3518_v55  ;;  %2796 = vmatpush3.bf16.msra.mxu1 %v3696_v9  ;;  %v2801_v55 = vpack.c.bf16 %v1126_v36, %v1125_v34  ;;  %v1127_v9 = vld [vmem:[#allocation5 + $0x430] sm:$0xff]  ;;  %v3803_v34 = vld [vmem:[#allocation2 + $0x199] sm:$0xff] }
 0x143   : > { %2747 = vmatpush1.bf16.msra.mxu0 %v3508_v43  ;;  %1663 = vmatprep.mubr.f32.mxu0 %v3554_v15  ;;  %v3772_v43 = vld [vmem:[#allocation2 + $0x139] sm:$0xff]  ;;  %v2805_v48 = vpack.c.bf16 %v1128_v46, %v1127_v9 }
 0x144   : > { %1928 = vmatprep.mubr.f32.mxu1 %v3755_v22  ;;  %2748 = vmatprep.subr.bf16.mxu0 %v3291_v1  ;;  %v474_v46 = vld [vmem:[#allocation2 + $0x318] sm:$0xff] }
 0x145   : > { %1929 = vmatmul.mubr.f32.gmra.mrb[66].mxu1 %v3759_v30  ;;  %2798 = vmatprep.subr.bf16.mxu1 %v2797_v26 }
 0x146   : > { %1664 = vmatmul.mubr.f32.gmra.mrb[2].mxu0 %v3530_v63  ;;  %1933 = vmatprep.mubr.f32.mxu1 %v3763_v44  ;;  %v1129_v63 = vld [vmem:[#allocation5 + $0x440] sm:$0xff] }
 0x147   : > { %1668 = vmatprep.mubr.f32.mxu0 %v3567_v23  ;;  %2750 = vmatpush1.bf16.msra.mxu0 %v3521_v56  ;;  %v2809_v56 = vpack.c.bf16 %v1130_v54, %v1129_v63  ;;  %v575_v63 = vld [vmem:[#allocation2 + $0x41] sm:$0xff] }
 0x148   : > { %2800 = vmatpush3.bf16.msra.mxu1 %v2797_v26  ;;  %2751 = vmatprep.subr.bf16.mxu0 %v3291_v1  ;;  %v1136_v26 = vld [vmem:[#allocation5 + $0x478] sm:$0xff] }
 0x149   : > { %1934 = vmatmul.mubr.f32.gmra.mrb[68].mxu1 %v3748_v10  ;;  %2802 = vmatprep.subr.bf16.mxu1 %v2801_v55 }
 0x14a   : > { %1669 = vmatmul.mubr.f32.gmra.mrb[4].mxu0 %v3542_v8  ;;  %1938 = vmatprep.mubr.f32.mxu1 %v3772_v43  ;;  %v1131_v8 = vld [vmem:[#allocation5 + $0x450] sm:$0xff] }
 0x14b   : > { %1673 = vmatprep.mubr.f32.mxu0 %v3580_v31  ;;  %2753 = vmatpush1.bf16.msra.mxu0 %v3533_v0  ;;  %v2813_v0 = vpack.c.bf16 %v1132_v62, %v1131_v8  ;;  %v574_v62 = vld [vmem:[#allocation2 + $0x19] sm:$0xff] }
 0x14c   : > { %2754 = vmatprep.subr.bf16.mxu0 %v3291_v1  ;;  %2804 = vmatpush3.bf16.msra.mxu1 %v2801_v55  ;;  %v473_v55 = vld [vmem:[#allocation2 + $0x310] sm:$0xff] }
 0x14d   : > { %1939 = vmatmul.mubr.f32.gmra.mrb[70].mxu1 %v3755_v22  ;;  %2806 = vmatprep.subr.bf16.mxu1 %v2805_v48 }
 0x14e   : > { %1674 = vmatmul.mubr.f32.gmra.mrb[6].mxu0 %v3554_v15  ;;  %1943 = vmatprep.mubr.f32.mxu1 %v3779_v58  ;;  %v1133_v15 = vld [vmem:[#allocation5 + $0x460] sm:$0xff] }
 0x14f   : > { %1678 = vmatprep.mubr.f32.mxu0 %v3593_v39  ;;  %2756 = vmatpush1.bf16.msra.mxu0 %v3546_v42  ;;  %v2817_v42 = vpack.c.bf16 %v1134_v14, %v1133_v15 }
 0x150   : > { %2757 = vmatprep.subr.bf16.mxu0 %v3291_v1  ;;  %2808 = vmatpush3.bf16.msra.mxu1 %v2805_v48 }
 0x151   : > { %1944 = vmatmul.mubr.f32.gmra.mrb[72].mxu1 %v3763_v44  ;;  %2810 = vmatprep.subr.bf16.mxu1 %v2809_v56 }
 0x152   : > { %1679 = vmatmul.mubr.f32.gmra.mrb[8].mxu0 %v3567_v23  ;;  %1948 = vmatprep.mubr.f32.mxu1 %v3787_v3  ;;  %v1135_v23 = vld [vmem:[#allocation5 + $0x470] sm:$0xff] }
 0x153   : > { %1683 = vmatprep.mubr.f32.mxu0 %v3606_v49  ;;  %2759 = vmatpush1.bf16.msra.mxu0 %v3558_v16  ;;  %v2821_v16 = vpack.c.bf16 %v1136_v26, %v1135_v23 }
 0x154   : > { %2760 = vmatprep.subr.bf16.mxu0 %v3291_v1  ;;  %2812 = vmatpush3.bf16.msra.mxu1 %v2809_v56  ;;  %v576_v56 = vld [vmem:[#allocation2 + $0x49] sm:$0xff] }
 0x155   : > { %1949 = vmatmul.mubr.f32.gmra.mrb[74].mxu1 %v3772_v43  ;;  %2814 = vmatprep.subr.bf16.mxu1 %v2813_v0 }
 0x156   : > { %1684 = vmatmul.mubr.f32.gmra.mrb[10].mxu0 %v3580_v31  ;;  %1953 = vmatprep.mubr.f32.mxu1 %v3795_v20  ;;  %v3811_v31 = vld [vmem:[#allocation2 + $0x1c1] sm:$0xff] }
 0x157   : > { %1688 = vmatprep.mubr.f32.mxu0 %v3619_v59  ;;  %2762 = vmatpush1.bf16.msra.mxu0 %v3571_v24  ;;  %v3819_v24 = vld [vmem:[#allocation2 + $0x1c9] sm:$0xff] }
 0x158   : > { %2763 = vmatprep.subr.bf16.mxu0 %v3291_v1  ;;  %2816 = vmatpush3.bf16.msra.mxu1 %v2813_v0 }
 0x159   : > { %1954 = vmatmul.mubr.f32.gmra.mrb[76].mxu1 %v3779_v58  ;;  %2818 = vmatprep.subr.bf16.mxu1 %v2817_v42 }
 0x15a   : > { %1689 = vmatmul.mubr.f32.gmra.mrb[12].mxu0 %v3593_v39  ;;  %1958 = vmatprep.mubr.f32.mxu1 %v3803_v34  ;;  %v3835_v39 = vld [vmem:[#allocation2 + $0x1f9] sm:$0xff] }
 0x15b   : > { %1693 = vmatprep.mubr.f32.mxu0 %v3632_v6  ;;  %2765 = vmatpush1.bf16.msra.mxu0 %v3584_v32  ;;  %v3827_v32 = vld [vmem:[#allocation2 + $0x1f1] sm:$0xff] }
 0x15c   : > { %2766 = vmatprep.subr.bf16.mxu0 %v3291_v1  ;;  %2820 = vmatpush3.bf16.msra.mxu1 %v2817_v42 }
 0x15d   : > { %1959 = vmatmul.mubr.f32.gmra.mrb[78].mxu1 %v3787_v3  ;;  %2822 = vmatprep.subr.bf16.mxu1 %v2821_v16 }
 0x15e   : > { %1694 = vmatmul.mubr.f32.gmra.mrb[14].mxu0 %v3606_v49  ;;  %1963 = vmatprep.mubr.f32.mxu1 %v3811_v31  ;;  %v3851_v49 = vld [vmem:[#allocation2 + $0x229] sm:$0xff] }
 0x15f   : > { %1698 = vmatprep.mubr.f32.mxu0 %v3645_v17  ;;  %2768 = vmatpush1.bf16.msra.mxu0 %v3597_v40  ;;  %v3843_v40 = vld [vmem:[#allocation2 + $0x221] sm:$0xff] }
 0x160   : > { %2769 = vmatprep.subr.bf16.mxu0 %v3291_v1  ;;  %2824 = vmatpush3.bf16.msra.mxu1 %v2821_v16 }
 0x161   : > { %1964 = vmatmul.mubr.f32.gmra.mrb[80].mxu1 %v3795_v20 }
 0x162   : > { %1699 = vmatmul.mubr.f32.gmra.mrb[16].mxu0 %v3619_v59  ;;  %1968 = vmatprep.mubr.f32.mxu1 %v3819_v24  ;;  %v3867_v59 = vld [vmem:[#allocation2 + $0x259] sm:$0xff] }
 0x163   : > { %1703 = vmatprep.mubr.f32.mxu0 %v3658_v27  ;;  %2771 = vmatpush1.bf16.msra.mxu0 %v3610_v50  ;;  %v3859_v50 = vld [vmem:[#allocation2 + $0x251] sm:$0xff] }
 0x164   : > { %2772 = vmatprep.subr.bf16.mxu0 %v3291_v1 }
 0x165   : > { %1969 = vmatmul.mubr.f32.gmra.mrb[82].mxu1 %v3803_v34 }
 0x166   : > { %1704 = vmatmul.mubr.f32.gmra.mrb[18].mxu0 %v3632_v6  ;;  %1973 = vmatprep.mubr.f32.mxu1 %v3827_v32  ;;  %v3883_v6 = vld [vmem:[#allocation2 + $0x289] sm:$0xff] }
 0x167   : > { %1708 = vmatprep.mubr.f32.mxu0 %v3669_v37  ;;  %2774 = vmatpush1.bf16.msra.mxu0 %v3623_v60  ;;  %v3875_v60 = vld [vmem:[#allocation2 + $0x281] sm:$0xff] }
 0x168   : > { %2775 = vmatprep.subr.bf16.mxu0 %v3291_v1 }
 0x169   : > { %1974 = vmatmul.mubr.f32.gmra.mrb[84].mxu1 %v3811_v31 }
 0x16a   : > { %1709 = vmatmul.mubr.f32.gmra.mrb[20].mxu0 %v3645_v17  ;;  %1978 = vmatprep.mubr.f32.mxu1 %v3835_v39  ;;  %v3902_v17 = vld [vmem:[#allocation2 + $0x2e1] sm:$0xff] }
 0x16b   : > { %1713 = vmatprep.mubr.f32.mxu0 %v3679_v51  ;;  %2777 = vmatpush1.bf16.msra.mxu0 %v3636_v7  ;;  %v3896_v7 = vld [vmem:[#allocation2 + $0x2b9] sm:$0xff] }
 0x16c   : > { %2778 = vmatprep.subr.bf16.mxu0 %v3291_v1 }
 0x16d   : > { %1979 = vmatmul.mubr.f32.gmra.mrb[86].mxu1 %v3819_v24 }
 0x16e   : > { %1714 = vmatmul.mubr.f32.gmra.mrb[22].mxu0 %v3658_v27  ;;  %1983 = vmatprep.mubr.f32.mxu1 %v3843_v40  ;;  %v3914_v27 = vld [vmem:[#allocation2 + $0x311] sm:$0xff] }
 0x16f   : > { %1718 = vmatprep.mubr.f32.mxu0 %v3688_v5  ;;  %2780 = vmatpush1.bf16.msra.mxu0 %v3649_v18  ;;  %v3908_v18 = vld [vmem:[#allocation2 + $0x2e9] sm:$0xff] }
 0x170   : > { %2781 = vmatprep.subr.bf16.mxu0 %v3291_v1 }
 0x171   : > { %1984 = vmatmul.mubr.f32.gmra.mrb[88].mxu1 %v3827_v32 }
 0x172   : > { %1719 = vmatmul.mubr.f32.gmra.mrb[24].mxu0 %v3669_v37  ;;  %1988 = vmatprep.mubr.f32.mxu1 %v3851_v49 }
 0x173   : > { %1723 = vmatprep.mubr.f32.mxu0 %v3699_v11  ;;  %2783 = vmatpush1.bf16.msra.mxu0 %v3662_v28 }
 0x174   : > { %2784 = vmatprep.subr.bf16.mxu0 %v3291_v1 }
 0x175   : > { %1989 = vmatmul.mubr.f32.gmra.mrb[90].mxu1 %v3835_v39 }
 0x176   : > { %1724 = vmatmul.mubr.f32.gmra.mrb[26].mxu0 %v3679_v51  ;;  %1993 = vmatprep.mubr.f32.mxu1 %v3859_v50 }
 0x177   : > { %1728 = vmatprep.mubr.f32.mxu0 %v3706_v13  ;;  %2786 = vmatpush1.bf16.msra.mxu0 %v3673_v38  ;;  %v3922_v38 = vld [vmem:[#allocation2 + $0x319] sm:$0xff] }
 0x178   : > { %2787 = vmatprep.subr.bf16.mxu0 %v3291_v1 }
 0x179   : > { %1994 = vmatmul.mubr.f32.gmra.mrb[92].mxu1 %v3843_v40 }
 0x17a   : > { %1729 = vmatmul.mubr.f32.gmra.mrb[28].mxu0 %v3688_v5  ;;  %1998 = vmatprep.mubr.f32.mxu1 %v3867_v59  ;;  %v3930_v5 = vld [vmem:[#allocation2 + $0x71] sm:$0xff] }
 0x17b   : > { %1733 = vmatprep.mubr.f32.mxu0 %v3709_v19  ;;  %2789 = vmatpush1.bf16.msra.mxu0 %v3683_v52 }
 0x17c   : > { %2790 = vmatprep.subr.bf16.mxu0 %v3291_v1  ;;  %v3890_v1 = vld [vmem:[#allocation2 + $0x2b1] sm:$0xff] }
 0x17d   : > { %1999 = vmatmul.mubr.f32.gmra.mrb[94].mxu1 %v3851_v49 }
 0x17e   : > { %1734 = vmatmul.mubr.f32.gmra.mrb[30].mxu0 %v3699_v11  ;;  %2003 = vmatprep.mubr.f32.mxu1 %v3875_v60 }
 0x17f   : > { %1738 = vmatprep.mubr.f32.mxu0 %v3712_v21  ;;  %2792 = vmatpush1.bf16.msra.mxu0 %v3692_v4 }
 0x181   : > { %2004 = vmatmul.mubr.f32.gmra.mrb[96].mxu1 %v3859_v50 }
 0x182   : > { %1739 = vmatmul.mubr.f32.gmra.mrb[32].mxu0 %v3706_v13  ;;  %2008 = vmatprep.mubr.f32.mxu1 %v3883_v6  ;;  %v3937_v13 = vld [vmem:[#allocation2 + $0x79] sm:$0xff] }
 0x183   : > { %1743 = vmatprep.mubr.f32.mxu0 %v3715_v25 }
 0x185   : > { %2009 = vmatmul.mubr.f32.gmra.mrb[98].mxu1 %v3867_v59 }
 0x186   : > { %1744 = vmatmul.mubr.f32.gmra.mrb[34].mxu0 %v3709_v19  ;;  %2013 = vmatprep.mubr.f32.mxu1 %v3890_v1  ;;  %v3940_v19 = vld [vmem:[#allocation2 + $0xa1] sm:$0xff] }
 0x187   : > { %1748 = vmatprep.mubr.f32.mxu0 %v3718_v29 }
 0x189   : > { %2014 = vmatmul.mubr.f32.gmra.mrb[100].mxu1 %v3875_v60 }
 0x18a   : > { %1749 = vmatmul.mubr.f32.gmra.mrb[36].mxu0 %v3712_v21  ;;  %2018 = vmatprep.mubr.f32.mxu1 %v3896_v7 }
 0x18b   : > { %1753 = vmatprep.mubr.f32.mxu0 %v3721_v33 }
 0x18d   : > { %2019 = vmatmul.mubr.f32.gmra.mrb[102].mxu1 %v3883_v6 }
 0x18e   : > { %1754 = vmatmul.mubr.f32.gmra.mrb[38].mxu0 %v3715_v25  ;;  %2023 = vmatprep.mubr.f32.mxu1 %v3902_v17 }
 0x18f   : > { %1758 = vmatprep.mubr.f32.mxu0 %v3724_v35 }
 0x191   : > { %2024 = vmatmul.mubr.f32.gmra.mrb[104].mxu1 %v3890_v1 }
 0x192   : > { %1759 = vmatmul.mubr.f32.gmra.mrb[40].mxu0 %v3718_v29  ;;  %2028 = vmatprep.mubr.f32.mxu1 %v3908_v18  ;;  %v3947_v29 = vld [vmem:[#allocation2 + $0xa9] sm:$0xff] }
 0x193   : > { %1763 = vmatprep.mubr.f32.mxu0 %v3727_v41 }
 0x194   : > { %v3916_v28 = vpop.f32.mrb[0].mxu1 }
 0x195   : > { %2029 = vmatmul.mubr.f32.gmra.mrb[106].mxu1 %v3896_v7  ;;  %v1212_v37 = vpop.f32.mrb[1].mxu1 }
 0x196   : > { %1764 = vmatmul.mubr.f32.gmra.mrb[42].mxu0 %v3721_v33  ;;  %2033 = vmatprep.mubr.f32.mxu1 %v3914_v27 }
 0x197   : > { %1768 = vmatprep.mubr.f32.mxu0 %v3730_v45 }
 0x198   : > { %v3924_v51 = vpop.f32.mrb[2].mxu1 }
 0x199   : > { %2034 = vmatmul.mubr.f32.gmra.mrb[108].mxu1 %v3902_v17  ;;  %v1217_v52 = vpop.f32.mrb[3].mxu1 }
 0x19a   : > { %1769 = vmatmul.mubr.f32.gmra.mrb[44].mxu0 %v3724_v35  ;;  %2038 = vmatprep.mubr.f32.mxu1 %v3922_v38 }
 0x19b   : > { %1773 = vmatprep.mubr.f32.mxu0 %v3733_v47 }
 0x19c   : > { %v3932_v4 = vpop.f32.mrb[4].mxu1 }
 0x19d   : > { %2039 = vmatmul.mubr.f32.gmra.mrb[110].mxu1 %v3908_v18  ;;  %v1222_v11 = vpop.f32.mrb[5].mxu1 }
 0x19e   : > { %1774 = vmatmul.mubr.f32.gmra.mrb[46].mxu0 %v3727_v41  ;;  %2553 = vmatprep.mubr.f32.mxu1 %v3930_v5 }
 0x19f   : > { %1778 = vmatprep.mubr.f32.mxu0 %v3736_v53 }
 0x1a0   : > { %v3942_v21 = vpop.f32.mrb[6].mxu1 }
 0x1a1   : > { %2554 = vmatmul.mubr.f32.vlgmr.msra.gmra.mrb[112].mxu1 %v3937_v13  ;;  %v1227_v25 = vpop.f32.mrb[7].mxu1 }
 0x1a2   : > { %1779 = vmatmul.mubr.f32.gmra.mrb[48].mxu0 %v3730_v45  ;;  %2556 = vmatprep.mubr.f32.mxu1 %v3940_v19 }
 0x1a3   : > { %1783 = vmatprep.mubr.f32.mxu0 %v3739_v57 }
 0x1a4   : > { %v3950_v33 = vpop.f32.mrb[8].mxu1 }
 0x1a5   : > { %2557 = vmatmul.mubr.f32.gmra.mrb[114].mxu1 %v3947_v29  ;;  %v1232_v35 = vpop.f32.mrb[9].mxu1 }
 0x1a6   : > { %1784 = vmatmul.mubr.f32.gmra.mrb[50].mxu0 %v3733_v47  ;;  %2559 = vmatprep.mubr.f32.mxu1 %v3751_v12 }
 0x1a7   : > { %1788 = vmatprep.mubr.f32.mxu0 %v3742_v61 }
 0x1a8   : > { %v3956_v41 = vpop.f32.mrb[10].mxu1 }
 0x1a9   : > { %2560 = vmatmul.mubr.f32.gmra.mrb[116].mxu1 %v3759_v30  ;;  %v1237_v45 = vpop.f32.mrb[11].mxu1 }
 0x1aa   : > { %1789 = vmatmul.mubr.f32.gmra.mrb[52].mxu0 %v3736_v53  ;;  %2562 = vmatprep.mubr.f32.mxu1 %v3748_v10 }
 0x1ab   : > { %1793 = vmatprep.mubr.f32.mxu0 %v3745_v2 }
 0x1ac   : > { %v3962_v36 = vpop.f32.mrb[12].mxu1 }
 0x1ad   : > { %2563 = vmatmul.mubr.f32.gmra.mrb[118].mxu1 %v3755_v22  ;;  %v1242_v47 = vpop.f32.mrb[13].mxu1  ;;  %v475_v22 = vld [vmem:[#allocation2 + $0x340] sm:$0xff] }
 0x1ae   : > { %1794 = vmatmul.mubr.f32.gmra.mrb[54].mxu0 %v3739_v57  ;;  %2565 = vmatprep.mubr.f32.mxu1 %v3763_v44 }
 0x1af   : > { %1798 = vmatprep.mubr.f32.mxu0 %v473_v55 }
 0x1b0   : > { %v3967_v9 = vpop.f32.mrb[14].mxu1 }
 0x1b1   : > { %2566 = vmatmul.mubr.f32.gmra.mrb[120].mxu1 %v3772_v43  ;;  %v1247_v53 = vpop.f32.mrb[15].mxu1  ;;  %v476_v43 = vld [vmem:[#allocation2 + $0x348] sm:$0xff] }
 0x1b2   : > { %1799 = vmatmul.mubr.f32.gmra.mrb[56].mxu0 %v3742_v61  ;;  %2568 = vmatprep.mubr.f32.mxu1 %v3779_v58 }
 0x1b3   : > { %1803 = vmatprep.mubr.f32.mxu0 %v474_v46 }
 0x1b4   : > { %v3972_v10 = vpop.f32.mrb[16].mxu1 }
 0x1b5   : > { %2569 = vmatmul.mubr.f32.gmra.mrb[122].mxu1 %v3787_v3  ;;  %v1252_v57 = vpop.f32.mrb[17].mxu1 }
 0x1b6   : > { %1804 = vmatmul.mubr.f32.gmra.mrb[58].mxu0 %v3745_v2  ;;  %2571 = vmatprep.mubr.f32.mxu1 %v3795_v20  ;;  %v573_v2 = vld [vmem:[#allocation2 + $0x11] sm:$0xff] }
 0x1b7   : > { %1808 = vmatprep.mubr.f32.mxu0 %v475_v22 }
 0x1b8   : > { %v3977_v44 = vpop.f32.mrb[18].mxu1 }
 0x1b9   : > { %2572 = vmatmul.mubr.f32.gmra.mrb[124].mxu1 %v3803_v34  ;;  %v1257_v61 = vpop.f32.mrb[19].mxu1 }
 0x1ba   : > { %1809 = vmatmul.mubr.f32.gmra.mrb[60].mxu0 %v473_v55  ;;  %2574 = vmatprep.mubr.f32.mxu1 %v3811_v31  ;;  %v607_v31 = vld [vmem:[#allocation2 + $0x341] sm:$0xff] }
 0x1bb   : > { %1813 = vmatprep.mubr.f32.mxu0 %v476_v43 }
 0x1bc   : > { %v3981_v48 = vpop.f32.mrb[20].mxu1 }
 0x1bd   : > { %2575 = vmatmul.mubr.f32.gmra.mrb[126].mxu1 %v3819_v24  ;;  %v1262_v54 = vpop.f32.mrb[21].mxu1 }
 0x1be   : > { %1814 = vmatmul.mubr.f32.gmra.mrb[62].mxu0 %v474_v46  ;;  %2577 = vmatprep.mubr.f32.mxu1 %v3827_v32 }
 0x1bf   : > { %1883 = vmatprep.mubr.f32.mxu0 %v575_v63 }
 0x1c0   : > { %v3985_v58 = vpop.f32.mrb[22].mxu1 }
 0x1c1   : > { %2578 = vmatmul.mubr.f32.gmra.mrb[128].mxu1 %v3835_v39  ;;  %v1267_v8 = vpop.f32.mrb[23].mxu1  ;;  %v608_v39 = vld [vmem:[#allocation2 + $0x349] sm:$0xff] }
 0x1c2   : > { %1884 = vmatmul.mubr.f32.vlgmr.msra.gmra.mrb[0].mxu0 %v573_v2  ;;  %2580 = vmatprep.mubr.f32.mxu1 %v3843_v40 }
 0x1c3   : > { %1888 = vmatprep.mubr.f32.mxu0 %v576_v56 }
 0x1c4   : > { %v3989_v3 = vpop.f32.mrb[24].mxu1 }
 0x1c5   : > { %2581 = vmatmul.mubr.f32.gmra.mrb[130].mxu1 %v3851_v49  ;;  %v1272_v0 = vpop.f32.mrb[25].mxu1 }
 0x1c6   : > { %1889 = vmatmul.mubr.f32.gmra.mrb[2].mxu0 %v574_v62  ;;  %2583 = vmatprep.mubr.f32.mxu1 %v3859_v50 }
 0x1c7   : > { %1893 = vmatprep.mubr.f32.mxu0 %v3930_v5 }
 0x1c8   : > { %v3994_v15 = vpop.f32.mrb[26].mxu1 }
 0x1c9   : > { %2584 = vmatmul.mubr.f32.gmra.mrb[132].mxu1 %v3867_v59  ;;  %v1277_v14 = vpop.f32.mrb[27].mxu1 }
 0x1ca   : > { %1894 = vmatmul.mubr.f32.gmra.mrb[4].mxu0 %v575_v63  ;;  %2586 = vmatprep.mubr.f32.mxu1 %v3875_v60 }
 0x1cb   : > { %1898 = vmatprep.mubr.f32.mxu0 %v3937_v13 }
 0x1cc   : > { %v3999_v20 = vpop.f32.mrb[28].mxu1 }
 0x1cd   : > { %2587 = vmatmul.mubr.f32.gmra.mrb[134].mxu1 %v3883_v6  ;;  %v1282_v42 = vpop.f32.mrb[29].mxu1 }
 0x1ce   : > { %1899 = vmatmul.mubr.f32.gmra.mrb[6].mxu0 %v576_v56  ;;  %2589 = vmatprep.mubr.f32.mxu1 %v3890_v1 }
 0x1cf   : > { %1903 = vmatprep.mubr.f32.mxu0 %v3940_v19 }
 0x1d0   : > { %v4004_v23 = vpop.f32.mrb[30].mxu1 }
 0x1d1   : > { %2590 = vmatmul.mubr.f32.gmra.mrb[136].mxu1 %v3896_v7  ;;  %v1287_v26 = vpop.f32.mrb[31].mxu1 }
 0x1d2   : > { %1904 = vmatmul.mubr.f32.gmra.mrb[8].mxu0 %v3930_v5  ;;  %2592 = vmatprep.mubr.f32.mxu1 %v3902_v17 }
 0x1d3   : > { %1908 = vmatprep.mubr.f32.mxu0 %v3947_v29 }
 0x1d4   : > { %v4010_v34 = vpop.f32.mrb[32].mxu1 }
 0x1d5   : > { %2593 = vmatmul.mubr.f32.gmra.mrb[138].mxu1 %v3908_v18  ;;  %v1292_v16 = vpop.f32.mrb[33].mxu1 }
 0x1d6   : > { %1909 = vmatmul.mubr.f32.gmra.mrb[10].mxu0 %v3937_v13  ;;  %2595 = vmatprep.mubr.f32.mxu1 %v3914_v27 }
 0x1d7   : > { %1913 = vmatprep.mubr.f32.mxu0 %v3751_v12 }
 0x1d8   : > { %v4016_v24 = vpop.f32.mrb[34].mxu1 }
 0x1d9   : > { %2596 = vmatmul.mubr.f32.gmra.mrb[140].mxu1 %v3922_v38  ;;  %v1297_v32 = vpop.f32.mrb[35].mxu1 }
 0x1da   : > { %1914 = vmatmul.mubr.f32.gmra.mrb[12].mxu0 %v3940_v19  ;;  %2598 = vmatprep.mubr.f32.mxu1 %v607_v31  ;;  %v4050_v32 = vld [vmem:[#allocation8] ss:$0 sm:$0xff] }
 0x1db   : > { %1918 = vmatprep.mubr.f32.mxu0 %v3759_v30 }
 0x1dc   : > { %v4021_v40 = vpop.f32.mrb[36].mxu1 }
 0x1dd   : > { %2599 = vmatmul.mubr.f32.gmra.mrb[142].mxu1 %v608_v39  ;;  %v1302_v49 = vpop.f32.mrb[37].mxu1  ;;  %v1251_v39 = vadd.f32 %v4050_v32, %v3972_v10  ;;  %v1261_v10 = vadd.f32 %v4050_v32, %v3981_v48  ;;  %v1271_v48 = vadd.f32 %v4050_v32, %v3989_v3  ;;  %v1281_v3 = vadd.f32 %v4050_v32, %v3999_v20 }
 0x1de   : > { %1919 = vmatmul.mubr.f32.gmra.mrb[14].mxu0 %v3947_v29  ;;  %v1291_v20 = vadd.f32 %v4050_v32, %v4010_v34 }
 0x1e0   : > { %v4024_v50 = vpop.f32.mrb[38].mxu1 }
 0x1e1   : > { %v1307_v12 = vpop.f32.mrb[39].mxu1 }
 0x1e4   : > { %v4026_v59 = vpop.f32.mrb[40].mxu1 }
 0x1e5   : > { %v1312_v60 = vpop.f32.mrb[41].mxu1 }
 0x1e8   : > { %v4028_v6 = vpop.f32.mrb[42].mxu1 }
 0x1e9   : > { %v1317_v1 = vpop.f32.mrb[43].mxu1 }
 0x1ec   : > { %v4030_v7 = vpop.f32.mrb[44].mxu1 }
 0x1ed   : > { %v1322_v17 = vpop.f32.mrb[45].mxu1 }
 0x1f0   : > { %v4032_v18 = vpop.f32.mrb[46].mxu1 }
 0x1f1   : > { %v1327_v30 = vpop.f32.mrb[47].mxu1 }
 0x1f2   : > { %v1256_v30 = vadd.f32 %v4050_v32, %v3977_v44  ;;  %v1266_v44 = vadd.f32 %v4050_v32, %v3985_v58  ;;  %v1276_v58 = vadd.f32 %v4050_v32, %v3994_v15  ;;  %v1286_v15 = vadd.f32 %v4050_v32, %v4004_v23 }
 0x1f3   : > { %v1296_v23 = vadd.f32 %v4050_v32, %v4016_v24 }
 0x1f4   : > { %v4034_v27 = vpop.f32.mrb[48].mxu1 }
 0x1f5   : > { %v1332_v37 = vpop.f32.mrb[49].mxu1 }
 0x1f8   : > { %v4036_v38 = vpop.f32.mrb[50].mxu1 }
 0x1f9   : > { %v1337_v52 = vpop.f32.mrb[51].mxu1 }
 0x1fc   : > { %v4038_v5 = vpop.f32.mrb[52].mxu1 }
 0x1fd   : > { %v1342_v11 = vpop.f32.mrb[53].mxu1 }
 0x200   : > { %v4040_v13 = vpop.f32.mrb[54].mxu1 }
 0x201   : > { %v1347_v19 = vpop.f32.mrb[55].mxu1 }
 0x204   : > { %v4042_v25 = vpop.f32.mrb[56].mxu1 }
 0x205   : > { %v1352_v29 = vpop.f32.mrb[57].mxu1 }
 0x208   : > { %v4044_v35 = vpop.f32.mrb[58].mxu1 }
 0x209   : > { %v1357_v45 = vpop.f32.mrb[59].mxu1 }
 0x20c   : > { %v4046_v55 = vpop.f32.mrb[60].mxu1 }
 0x20d   : > { %v1362_v47 = vpop.f32.mrb[61].mxu1 }
 0x210   : > { %v4048_v46 = vpop.f32.mrb[62].mxu1 }
 0x211   : > { %v1367_v53 = vpop.f32.mrb[63].mxu1 }
 0x214   : > { %v1925_v22 = vpop.f32.mrb[64].mxu1 }
 0x215   : > { %v1927_v57 = vpop.f32.mrb[65].mxu1 }
 0x218   : > { %v1930_v43 = vpop.f32.mrb[66].mxu1 }
 0x219   : > { %v1932_v61 = vpop.f32.mrb[67].mxu1 }
 0x21c   : > { %v1935_v63 = vpop.f32.mrb[68].mxu1 }
 0x21d   : > { %v1937_v54 = vpop.f32.mrb[69].mxu1 }
 0x220   : > { %v1940_v2 = vpop.f32.mrb[70].mxu1 }
 0x221   : > { %v1942_v56 = vpop.f32.mrb[71].mxu1 }
 0x224   : > { %v1945_v8 = vpop.f32.mrb[72].mxu1 }
 0x225   : > { %v1947_v62 = vpop.f32.mrb[73].mxu1 }
 0x228   : > { %v1950_v0 = vpop.f32.mrb[74].mxu1 }
 0x229   : > { %v1952_v14 = vpop.f32.mrb[75].mxu1 }
 0x22c   : > { %v1955_v42 = vpop.f32.mrb[76].mxu1 }
 0x22d   : > { %v1957_v26 = vpop.f32.mrb[77].mxu1 }
 0x230   : > { %v1960_v16 = vpop.f32.mrb[78].mxu1 }
 0x231   : > { %v1962_v31 = vpop.f32.mrb[79].mxu1 }
 0x234   : > { %v4054_v49 = vpop.f32.mrb[80].mxu1 }
 0x235   : > { %v1700_v12 = vpop.f32.mrb[16].mxu0  ;;  %v1967_v60 = vpop.f32.mrb[81].mxu1 }
 0x236   : > { %v2874_v1 = vadd.f32 %v1700_v12, %v1251_v39  ;;  %v1702_v17 = vpop.f32.mrb[17].mxu0 }
 0x238   : > { %v4058_v37 = vpop.f32.mrb[82].mxu1  ;;  %v4060_v52 = vadd.f32 %v2874_v1, %v1925_v22 }
 0x239   : > { %v1705_v11 = vpop.f32.mrb[18].mxu0  ;;  %v1972_v19 = vpop.f32.mrb[83].mxu1 }
 0x23a   : > { %v2877_v29 = vadd.f32 %v1705_v11, %v1256_v30  ;;  %v1707_v45 = vpop.f32.mrb[19].mxu0 }
 0x23c   : > { %v4064_v47 = vpop.f32.mrb[84].mxu1  ;;  %v4066_v53 = vadd.f32 %v2877_v29, %v1930_v43 }
 0x23d   : > { %v1710_v57 = vpop.f32.mrb[20].mxu0  ;;  %v1977_v61 = vpop.f32.mrb[85].mxu1 }
 0x23e   : > { %v2880_v54 = vadd.f32 %v1710_v57, %v1261_v10  ;;  %v1712_v56 = vpop.f32.mrb[21].mxu0 }
 0x240   : > { %v4070_v22 = vpop.f32.mrb[86].mxu1  ;;  %v4072_v62 = vadd.f32 %v2880_v54, %v1935_v63 }
 0x241   : > { %v1715_v14 = vpop.f32.mrb[22].mxu0  ;;  %v1982_v26 = vpop.f32.mrb[87].mxu1 }
 0x242   : > { %v2883_v31 = vadd.f32 %v1715_v14, %v1266_v44  ;;  %v1717_v39 = vpop.f32.mrb[23].mxu0 }
 0x244   : > { %v4076_v43 = vpop.f32.mrb[88].mxu1  ;;  %v4078_v12 = vadd.f32 %v2883_v31, %v1940_v2 }
 0x245   : > { %v1720_v60 = vpop.f32.mrb[24].mxu0  ;;  %v1987_v1 = vpop.f32.mrb[89].mxu1 }
 0x246   : > { %v2886_v17 = vadd.f32 %v1720_v60, %v1271_v48  ;;  %v1722_v30 = vpop.f32.mrb[25].mxu0 }
 0x248   : > { %v4082_v63 = vpop.f32.mrb[90].mxu1  ;;  %v4084_v11 = vadd.f32 %v2886_v17, %v1945_v8 }
 0x249   : > { %v1725_v19 = vpop.f32.mrb[26].mxu0  ;;  %v1992_v29 = vpop.f32.mrb[91].mxu1 }
 0x24a   : > { %v2889_v45 = vadd.f32 %v1725_v19, %v1276_v58  ;;  %v1727_v10 = vpop.f32.mrb[27].mxu0 }
 0x24c   : > { %v4088_v2 = vpop.f32.mrb[92].mxu1  ;;  %v4090_v57 = vadd.f32 %v2889_v45, %v1950_v0 }
 0x24d   : > { %v1730_v61 = vpop.f32.mrb[28].mxu0  ;;  %v1997_v54 = vpop.f32.mrb[93].mxu1 }
 0x24e   : > { %v2892_v56 = vadd.f32 %v1730_v61, %v1281_v3  ;;  %v1732_v44 = vpop.f32.mrb[29].mxu0 }
 0x250   : > { %v4094_v8 = vpop.f32.mrb[94].mxu1  ;;  %v4096_v14 = vadd.f32 %v2892_v56, %v1955_v42 }
 0x251   : > { %v1735_v26 = vpop.f32.mrb[30].mxu0  ;;  %v2002_v31 = vpop.f32.mrb[95].mxu1 }
 0x252   : > { %v2895_v39 = vadd.f32 %v1735_v26, %v1286_v15  ;;  %v1737_v48 = vpop.f32.mrb[31].mxu0 }
 0x254   : > { %v4100_v0 = vpop.f32.mrb[96].mxu1  ;;  %v4102_v60 = vadd.f32 %v2895_v39, %v1960_v16  ;;  %v1301_v16 = vadd.f32 %v4050_v32, %v4021_v40 }
 0x255   : > { %v1740_v1 = vpop.f32.mrb[32].mxu0  ;;  %v2007_v17 = vpop.f32.mrb[97].mxu1 }
 0x256   : > { %v2898_v30 = vadd.f32 %v1740_v1, %v1291_v20  ;;  %v1742_v58 = vpop.f32.mrb[33].mxu0 }
 0x258   : > { %v4106_v42 = vpop.f32.mrb[98].mxu1  ;;  %v4109_v19 = vadd.f32 %v2898_v30, %v4054_v49  ;;  %v1306_v49 = vadd.f32 %v4050_v32, %v4024_v50 }
 0x259   : > { %v1745_v29 = vpop.f32.mrb[34].mxu0  ;;  %v2012_v45 = vpop.f32.mrb[99].mxu1 }
 0x25a   : > { %v2901_v10 = vadd.f32 %v1745_v29, %v1296_v23  ;;  %v1747_v34 = vpop.f32.mrb[35].mxu0 }
 0x25c   : > { %v4113_v3 = vpop.f32.mrb[100].mxu1  ;;  %v4116_v61 = vadd.f32 %v2901_v10, %v4058_v37  ;;  %v1311_v37 = vadd.f32 %v4050_v32, %v4026_v59 }
 0x25d   : > { %v1750_v54 = vpop.f32.mrb[36].mxu0  ;;  %v2017_v56 = vpop.f32.mrb[101].mxu1 }
 0x25e   : > { %v2904_v24 = vadd.f32 %v1750_v54, %v1301_v16  ;;  %v1752_v44 = vpop.f32.mrb[37].mxu0 }
 0x260   : > { %v4120_v15 = vpop.f32.mrb[102].mxu1  ;;  %v4123_v26 = vadd.f32 %v2904_v24, %v4064_v47  ;;  %v1316_v47 = vadd.f32 %v4050_v32, %v4028_v6 }
 0x261   : > { %v1755_v31 = vpop.f32.mrb[38].mxu0  ;;  %v2022_v39 = vpop.f32.mrb[103].mxu1 }
 0x262   : > { %v2907_v40 = vadd.f32 %v1755_v31, %v1306_v49  ;;  %v1757_v48 = vpop.f32.mrb[39].mxu0 }
 0x264   : > { %v4127_v20 = vpop.f32.mrb[104].mxu1  ;;  %v4130_v1 = vadd.f32 %v2907_v40, %v4070_v22  ;;  %v1321_v22 = vadd.f32 %v4050_v32, %v4030_v7 }
 0x265   : > { %v1760_v17 = vpop.f32.mrb[40].mxu0  ;;  %v2027_v30 = vpop.f32.mrb[105].mxu1 }
 0x266   : > { %v2910_v50 = vadd.f32 %v1760_v17, %v1311_v37  ;;  %v1762_v58 = vpop.f32.mrb[41].mxu0 }
 0x268   : > { %v4134_v23 = vpop.f32.mrb[106].mxu1  ;;  %v4137_v29 = vadd.f32 %v2910_v50, %v4076_v43  ;;  %v1326_v43 = vadd.f32 %v4050_v32, %v4032_v18 }
 0x269   : > { %v1765_v45 = vpop.f32.mrb[42].mxu0  ;;  %v2032_v10 = vpop.f32.mrb[107].mxu1 }
 0x26a   : > { %v2913_v59 = vadd.f32 %v1765_v45, %v1316_v47  ;;  %v1767_v34 = vpop.f32.mrb[43].mxu0 }
 0x26c   : > { %v4141_v16 = vpop.f32.mrb[108].mxu1  ;;  %v4144_v54 = vadd.f32 %v2913_v59, %v4082_v63  ;;  %v1331_v63 = vadd.f32 %v4050_v32, %v4034_v27 }
 0x26d   : > { %v1770_v56 = vpop.f32.mrb[44].mxu0  ;;  %v2037_v24 = vpop.f32.mrb[109].mxu1 }
 0x26e   : > { %v2916_v6 = vadd.f32 %v1770_v56, %v1321_v22  ;;  %v1772_v44 = vpop.f32.mrb[45].mxu0 }
 0x270   : > { %v4148_v49 = vpop.f32.mrb[110].mxu1  ;;  %v4151_v31 = vadd.f32 %v2916_v6, %v4088_v2  ;;  %v1336_v2 = vadd.f32 %v4050_v32, %v4036_v38 }
 0x271   : > { %v1775_v39 = vpop.f32.mrb[46].mxu0  ;;  %v2042_v40 = vpop.f32.mrb[111].mxu1 }
 0x272   : > { %v2919_v7 = vadd.f32 %v1775_v39, %v1326_v43  ;;  %v1777_v48 = vpop.f32.mrb[47].mxu0 }
 0x273   : > { %v1351_v48 = vadd.f32 %v4050_v32, %v4042_v25 }
 0x274   : > { %v4155_v37 = vpop.f32.mrb[112].mxu1  ;;  %v4158_v17 = vadd.f32 %v2919_v7, %v4094_v8  ;;  %v1341_v8 = vadd.f32 %v4050_v32, %v4038_v5 }
 0x275   : > { %v1780_v30 = vpop.f32.mrb[48].mxu0  ;;  %v4160_v50 = vpop.f32.mrb[113].mxu1 }
 0x276   : > { %v2922_v18 = vadd.f32 %v1780_v30, %v1331_v63  ;;  %v1782_v58 = vpop.f32.mrb[49].mxu0 }
 0x278   : > { %v4164_v47 = vpop.f32.mrb[114].mxu1  ;;  %v4167_v45 = vadd.f32 %v2922_v18, %v4100_v0  ;;  %v1346_v0 = vadd.f32 %v4050_v32, %v4040_v13 }
 0x279   : > { %v1785_v10 = vpop.f32.mrb[50].mxu0  ;;  %v4169_v27 = vpop.f32.mrb[115].mxu1 }
 0x27a   : > { %v2925_v59 = vadd.f32 %v1785_v10, %v1336_v2  ;;  %v1787_v34 = vpop.f32.mrb[51].mxu0 }
 0x27c   : > { %v4173_v22 = vpop.f32.mrb[116].mxu1  ;;  %v4176_v56 = vadd.f32 %v2925_v59, %v4106_v42  ;;  %v1356_v59 = vadd.f32 %v4050_v32, %v4044_v35 }
 0x27d   : > { %v1790_v24 = vpop.f32.mrb[52].mxu0  ;;  %v4178_v38 = vpop.f32.mrb[117].mxu1 }
 0x27e   : > { %v2928_v6 = vadd.f32 %v1790_v24, %v1341_v8  ;;  %v1792_v44 = vpop.f32.mrb[53].mxu0 }
 0x280   : > { %v4182_v43 = vpop.f32.mrb[118].mxu1  ;;  %v4185_v39 = vadd.f32 %v2928_v6, %v4113_v3 }
 0x281   : > { %v1795_v5 = vpop.f32.mrb[54].mxu0  ;;  %v4187_v40 = vpop.f32.mrb[119].mxu1 }
 0x282   : > { %v2931_v42 = vadd.f32 %v1795_v5, %v1346_v0  ;;  %v1797_v7 = vpop.f32.mrb[55].mxu0 }
 0x284   : > { %v2567_v63 = vpop.f32.mrb[120].mxu1  ;;  %v4192_v30 = vadd.f32 %v2931_v42, %v4120_v15 }
 0x285   : > { %v1800_v13 = vpop.f32.mrb[56].mxu0  ;;  %v2156_v18 = vadd.f32 %v4066_v53, %v2567_v63  ;;  %v2150_v58 = vpop.f32.mrb[121].mxu1 }
 0x286   : > { %v2934_v3 = vadd.f32 %v1800_v13, %v1351_v48  ;;  %v1802_v2 = vpop.f32.mrb[57].mxu0  ;;  %v2151_v10 = vadd.f32 %v4060_v52, %v2150_v58  ;;  %v1361_v52 = vadd.f32 %v4050_v32, %v4046_v55 }
 0x287   : > { %2278 = vst [vmem:[%s3471_s6 + $0x48] sm:$0xff] %v2156_v18 }
 0x288   : > { %2277 = vst [vmem:[%s3471_s6 + $0x40] sm:$0xff] %v2151_v10  ;;  %v2570_v25 = vpop.f32.mrb[122].mxu1  ;;  %v4201_v34 = vadd.f32 %v2934_v3, %v4127_v20 }
 0x289   : > { %v1805_v15 = vpop.f32.mrb[58].mxu0  ;;  %v2166_v8 = vadd.f32 %v4078_v12, %v2570_v25  ;;  %v2160_v53 = vpop.f32.mrb[123].mxu1 }
 0x28a   : > { %v2937_v24 = vadd.f32 %v1805_v15, %v1356_v59  ;;  %v1807_v6 = vpop.f32.mrb[59].mxu0  ;;  %v2161_v44 = vadd.f32 %v4072_v62, %v2160_v53  ;;  %v1366_v62 = vadd.f32 %v4050_v32, %v4048_v46 }
 0x28b   : > { %2280 = vst [vmem:[%s3471_s6 + $0x58] sm:$0xff] %v2166_v8 }
 0x28c   : > { %2279 = vst [vmem:[%s3471_s6 + $0x50] sm:$0xff] %v2161_v44  ;;  %v2573_v35 = vpop.f32.mrb[124].mxu1  ;;  %v4210_v0 = vadd.f32 %v2937_v24, %v4134_v23 }
 0x28d   : > { %v1810_v20 = vpop.f32.mrb[60].mxu0  ;;  %v2176_v5 = vadd.f32 %v4090_v57, %v2573_v35  ;;  %v2170_v12 = vpop.f32.mrb[125].mxu1 }
 0x28e   : > { %v2940_v42 = vadd.f32 %v1810_v20, %v1361_v52  ;;  %v1812_v7 = vpop.f32.mrb[61].mxu0  ;;  %v2171_v48 = vadd.f32 %v4084_v11, %v2170_v12  ;;  %v1211_v11 = vadd.f32 %v4050_v32, %v3916_v28  ;;  %v1216_v28 = vadd.f32 %v4050_v32, %v3924_v51 }
 0x28f   : > { %2282 = vst [vmem:[%s3471_s6 + $0x68] sm:$0xff] %v2176_v5  ;;  %v1221_v51 = vadd.f32 %v4050_v32, %v3932_v4  ;;  %v1226_v4 = vadd.f32 %v4050_v32, %v3942_v21  ;;  %v1231_v21 = vadd.f32 %v4050_v32, %v3950_v33  ;;  %v1236_v33 = vadd.f32 %v4050_v32, %v3956_v41 }
 0x290   : > { %2281 = vst [vmem:[%s3471_s6 + $0x60] sm:$0xff] %v2171_v48  ;;  %v2576_v55 = vpop.f32.mrb[126].mxu1  ;;  %v4219_v63 = vadd.f32 %v2940_v42, %v4141_v16  ;;  %v1241_v41 = vadd.f32 %v4050_v32, %v3962_v36  ;;  %v1246_v36 = vadd.f32 %v4050_v32, %v3967_v9 }
 0x291   : > { %v1815_v23 = vpop.f32.mrb[62].mxu0  ;;  %v2186_v13 = vadd.f32 %v4102_v60, %v2576_v55  ;;  %v2180_v57 = vpop.f32.mrb[127].mxu1 }
 0x292   : > { %v2943_v18 = vadd.f32 %v1815_v23, %v1366_v62  ;;  %v1817_v58 = vpop.f32.mrb[63].mxu0  ;;  %v2181_v3 = vadd.f32 %v4096_v14, %v2180_v57 }
 0x293   : > { %2284 = vst [vmem:[%s3471_s6 + $0x78] sm:$0xff] %v2186_v13 }
 0x294   : > { %2283 = vst [vmem:[%s3471_s6 + $0x70] sm:$0xff] %v2181_v3  ;;  %v2579_v46 = vpop.f32.mrb[128].mxu1  ;;  %v4228_v16 = vadd.f32 %v2943_v18, %v4148_v49 }
 0x295   : > { %v1885_v2 = vpop.f32.mrb[0].mxu0  ;;  %v2196_v60 = vadd.f32 %v4116_v61, %v2579_v46  ;;  %v2190_v10 = vpop.f32.mrb[129].mxu1 }
 0x296   : > { %v2858_v59 = vadd.f32 %v1885_v2, %v1211_v11  ;;  %v1887_v25 = vpop.f32.mrb[1].mxu0  ;;  %v2191_v15 = vadd.f32 %v4109_v19, %v2190_v10 }
 0x297   : > { %2286 = vst [vmem:[%s3471_s6 + $0x88] sm:$0xff] %v2196_v60 }
 0x298   : > { %v2111_v14 = vadd.f32 %v2858_v59, %v4160_v50  ;;  %2285 = vst [vmem:[%s3471_s6 + $0x80] sm:$0xff] %v2191_v15  ;;  %v2582_v8 = vpop.f32.mrb[130].mxu1 }
 0x299   : > { %v1890_v49 = vpop.f32.mrb[2].mxu0  ;;  %v2206_v53 = vadd.f32 %v4130_v1, %v2582_v8  ;;  %v2200_v61 = vpop.f32.mrb[131].mxu1 }
 0x29a   : > { %2269 = vst [vmem:[%s3471_s6] sm:$0xff] %v2111_v14  ;;  %v2860_v24 = vadd.f32 %v1890_v49, %v1216_v28  ;;  %v1892_v6 = vpop.f32.mrb[3].mxu0  ;;  %v2201_v19 = vadd.f32 %v4123_v26, %v2200_v61 }
 0x29b   : > { %2288 = vst [vmem:[%s3471_s6 + $0x98] sm:$0xff] %v2206_v53 }
 0x29c   : > { %v2116_v50 = vadd.f32 %v2860_v24, %v4155_v37  ;;  %2287 = vst [vmem:[%s3471_s6 + $0x90] sm:$0xff] %v2201_v19  ;;  %v2585_v44 = vpop.f32.mrb[132].mxu1 }
 0x29d   : > { %v1895_v52 = vpop.f32.mrb[4].mxu0  ;;  %v2216_v1 = vadd.f32 %v4144_v54, %v2585_v44  ;;  %v2210_v35 = vpop.f32.mrb[133].mxu1 }
 0x29e   : > { %2270 = vst [vmem:[%s3471_s6 + $0x8] sm:$0xff] %v2116_v50  ;;  %v2862_v20 = vadd.f32 %v1895_v52, %v1221_v51  ;;  %v1897_v5 = vpop.f32.mrb[5].mxu0  ;;  %v2211_v26 = vadd.f32 %v4137_v29, %v2210_v35 }
 0x29f   : > { %2290 = vst [vmem:[%s3471_s6 + $0xa8] sm:$0xff] %v2216_v1 }
 0x2a0   : > { %v2121_v37 = vadd.f32 %v2862_v20, %v4169_v27  ;;  %2289 = vst [vmem:[%s3471_s6 + $0xa0] sm:$0xff] %v2211_v26  ;;  %v2588_v12 = vpop.f32.mrb[134].mxu1 }
 0x2a1   : > { %v1900_v42 = vpop.f32.mrb[6].mxu0  ;;  %v2226_v54 = vadd.f32 %v4158_v17, %v2588_v12  ;;  %v2220_v7 = vpop.f32.mrb[135].mxu1 }
 0x2a2   : > { %2271 = vst [vmem:[%s3471_s6 + $0x10] sm:$0xff] %v2121_v37  ;;  %v2864_v48 = vadd.f32 %v1900_v42, %v1226_v4  ;;  %v1902_v62 = vpop.f32.mrb[7].mxu0  ;;  %v2221_v29 = vadd.f32 %v4151_v31, %v2220_v7 }
 0x2a3   : > { %2292 = vst [vmem:[%s3471_s6 + $0xb8] sm:$0xff] %v2226_v54 }
 0x2a4   : > { %v2126_v27 = vadd.f32 %v2864_v48, %v4164_v47  ;;  %2291 = vst [vmem:[%s3471_s6 + $0xb0] sm:$0xff] %v2221_v29  ;;  %v2591_v55 = vpop.f32.mrb[136].mxu1 }
 0x2a5   : > { %v1905_v23 = vpop.f32.mrb[8].mxu0  ;;  %v2236_v17 = vadd.f32 %v4176_v56, %v2591_v55  ;;  %v2230_v13 = vpop.f32.mrb[137].mxu1 }
 0x2a6   : > { %2272 = vst [vmem:[%s3471_s6 + $0x18] sm:$0xff] %v2126_v27  ;;  %v2866_v57 = vadd.f32 %v1905_v23, %v1231_v21  ;;  %v1907_v18 = vpop.f32.mrb[9].mxu0  ;;  %v2231_v31 = vadd.f32 %v4167_v45, %v2230_v13 }
 0x2a7   : > { %2294 = vst [vmem:[%s3471_s6 + $0xc8] sm:$0xff] %v2236_v17 }
 0x2a8   : > { %v2131_v47 = vadd.f32 %v2866_v57, %v4178_v38  ;;  %2293 = vst [vmem:[%s3471_s6 + $0xc0] sm:$0xff] %v2231_v31  ;;  %v2594_v58 = vpop.f32.mrb[138].mxu1 }
 0x2a9   : > { %v1910_v3 = vpop.f32.mrb[10].mxu0  ;;  %v2246_v56 = vadd.f32 %v4192_v30, %v2594_v58  ;;  %v2240_v11 = vpop.f32.mrb[139].mxu1 }
 0x2aa   : > { %2273 = vst [vmem:[%s3471_s6 + $0x20] sm:$0xff] %v2131_v47  ;;  %v2868_v46 = vadd.f32 %v1910_v3, %v1236_v33  ;;  %v1912_v2 = vpop.f32.mrb[11].mxu0  ;;  %v2241_v45 = vadd.f32 %v4185_v39, %v2240_v11 }
 0x2ab   : > { %2296 = vst [vmem:[%s3471_s6 + $0xd8] sm:$0xff] %v2246_v56 }
 0x2ac   : > { %v2136_v38 = vadd.f32 %v2868_v46, %v4173_v22  ;;  %2295 = vst [vmem:[%s3471_s6 + $0xd0] sm:$0xff] %v2241_v45  ;;  %v2597_v60 = vpop.f32.mrb[140].mxu1 }
 0x2ad   : > { %v1915_v10 = vpop.f32.mrb[12].mxu0  ;;  %v2256_v30 = vadd.f32 %v4210_v0, %v2597_v60  ;;  %v2250_v59 = vpop.f32.mrb[141].mxu1 }
 0x2ae   : > { %2274 = vst [vmem:[%s3471_s6 + $0x28] sm:$0xff] %v2136_v38  ;;  %v2870_v25 = vadd.f32 %v1915_v10, %v1241_v41  ;;  %v1917_v15 = vpop.f32.mrb[13].mxu0  ;;  %v2251_v39 = vadd.f32 %v4201_v34, %v2250_v59 }
 0x2af   : > { %2298 = vst [vmem:[%s3471_s6 + $0xe8] sm:$0xff] %v2256_v30 }
 0x2b0   : > { %v2141_v22 = vadd.f32 %v2870_v25, %v4187_v40  ;;  %2297 = vst [vmem:[%s3471_s6 + $0xe0] sm:$0xff] %v2251_v39  ;;  %v2600_v28 = vpop.f32.mrb[142].mxu1 }
 0x2b1   : > { %v1920_v0 = vpop.f32.mrb[14].mxu0  ;;  %v2266_v14 = vadd.f32 %v4228_v16, %v2600_v28  ;;  %v2260_v8 = vpop.f32.mrb[143].mxu1 }
 0x2b2   : > { %2275 = vst [vmem:[%s3471_s6 + $0x30] sm:$0xff] %v2141_v22  ;;  %v2872_v49 = vadd.f32 %v1920_v0, %v1246_v36  ;;  %v1922_v34 = vpop.f32.mrb[15].mxu0  ;;  %v2261_v53 = vadd.f32 %v4219_v63, %v2260_v8 }
 0x2b3   : > { %2300 = vst [vmem:[%s3471_s6 + $0xf8] sm:$0xff] %v2266_v14 }
 0x2b4   : > { %v2146_v9 = vadd.f32 %v2872_v49, %v4182_v43  ;;  %2299 = vst [vmem:[%s3471_s6 + $0xf0] sm:$0xff] %v2261_v53 }
 0x2b6   : > { %2276 = vst [vmem:[%s3471_s6 + $0x38] sm:$0xff] %v2146_v9 }
 0x2b7   : > { %3204 = shalt.err (!%p3201_p2)
}
 0x2b8   : > { %s3205_s30 = scalar_lea.hbm %s4295_s10, 4096  ;;  %s3209_s23 = scalar_lea.hbm %s4353_s3, 8192 }
 0x2b9   : > { %p3206_p3 = scmp.ne.s32.totalorder %s4295_s10, %s3205_s30  ;;  %p3210_p7 = scmp.lt.u32.totalorder %s4295_s10, %s4353_s3 }
 0x2ba   : > { %p3211_p9 = scmp.lt.u32.totalorder %s3209_s23, %s3205_s30  ;;  %p3213_p0 = scmp.lt.u32.totalorder %s3205_s30, %s4295_s10 }
 0x2bb   : > { %p3207_p5 = pnand %p3206_p3, %p4365_p1 }
 0x2bc   : > { %p3212_p12 = por %p3211_p9, %p3210_p7 }
 0x2bd   : > { %p3208_p6 = pneg %p3207_p5 }
 0x2be   : > { %p3214_p13 = por %p3213_p0, %p3212_p12 }
 0x2c0   : > { %p3215_p4 = pnand %p3214_p13, %p3208_p6 }
 0x2c2   : > { %3218 = shalt.err (!%p3215_p4)
}
 0x2c3   : > { %s3293_s27 = smov 128   ;;  %s3294_s9 = smov 8  }
 0x2c4   : > { %3033 = dma.vmem_to_hbm [thread:$0]  (%p4365_p1), %s4297_s26, 4096, %s4295_s10, %s4304_s11, %s3293_s27, %s3293_s27, %s3294_s9  }
 0x2c5 PF: > { %p3050_p8 = scmp.ge.s32.totalorder %s3279_s17, 2  ;;  %s2334_s6 = sand.u32 1, %s3259_s12  }
 0x2c6   : > { %p4366_p10 = scmp.ne.s32.totalorder %s4359_s24, 0  ;;  %s2335_s7 = scalar_lea.sflag [#allocation7], %s2334_s6 }
 0x2c8   : > { %p3043_p11 = pnand %p3050_p8, %p4366_p10 }
 0x2ca   : > { %3254 = dma.done.wait (!%p3043_p11), %s2335_s7, 4096  }
 0x2cb   : > { %3256 = vsyncadd (!%p3043_p11), %s2335_s7, 4294963200  ;;  %s18_s17 = sadd.s32 1, %s3279_s17   ;;  %s4367_s12 = smov %s3263_s13 }
 0x2cc   : > { %p15_p2 = scmp.ge.s32.totalorder %s18_s17, 4   ;;  %s4368_s13 = smov %s3267_s14 }
 0x2cd   : > { %s4369_s14 = smov %s3368_s25  ;;  %s4370_s15 = smov %s3275_s16 }
 0x2ce   : > { %s4371_s16 = smov %s4373_s20  ;;  %17 = sbr.rel (!%p15_p2) target bundleno = 6 (0x6), region = 110 }
 0x2d5   :  { %2340 = vsyncpa [#allocation6], 1 }
 0x2d6   :  { %2342 = vsyncpa [#allocation6 + $0x1], 1 }
 0x2d7   :  { %2343 = vsyncpa [#allocation9], 1 }
 0x2d8   :  { %2344 = vsyncpa [#allocation7], 1 }
 0x2d9   :  { %2346 = vsyncpa [#allocation7 + $0x1], 1 }
 0x2da   :  { %2347 = vsyncmov [#allocation4] }
 0x2dd   :  { %s2348_s22 = vpop.sfrf %2347 }
 0x2de   :  { %p2467_p1 = scmp.ne.s32.totalorder %s2348_s22, 0 }
 0x2e0   :  { %2352 = shalt.err (%p2467_p1)  }
 0x2e1   :  { %2354 = vsyncmov [#allocation4 + $0x1] }
 0x2e4   :  { %s2355_s24 = vpop.sfrf %2354 }
 0x2e5   :  { %p2468_p3 = scmp.ne.s32.totalorder %s2355_s24, 0 }
 0x2e7   :  { %2359 = shalt.err (%p2468_p3)  }
 0x2e8   :  { %2361 = vsyncmov [#allocation4 + $0x2] }
 0x2eb   :  { %s2362_s25 = vpop.sfrf %2361 }
 0x2ec   :  { %p2469_p5 = scmp.ne.s32.totalorder %s2362_s25, 0 }
 0x2ee   :  { %2366 = shalt.err (%p2469_p5)  }

</bundles_post_ra>
